<compile_context>
chip_gen: v6e
topology: v6e:2x2x1
jax: 0.10.0
libtpu: 0.0.40
codegen_flags: <defaults>
</compile_context>

<pallas_src>
import jax
import jax.numpy as jnp
from jax.experimental import pallas as pl
from jax.experimental.pallas import tpu as pltpu

# Fixed module hyper-parameters (from __init__).
C_IN, C_MID, C_OUT = 256, 512, 1
K1, S1, P1 = 4, 2, 1
K2 = 4
BN_EPS = 1e-5
LRELU_SLOPE = 0.2


def _rf_kernel(p_ref, w1_ref, gamma_ref, beta_ref, w2_ref, out_ref):
    """One Cmid tile of the fused forward pass.

    p_ref    : (R, Cin*K1*K1)  bf16  im2col patches, R = N*OH*OW (grid-invariant)
    w1_ref   : (Cin*K1*K1, tn) bf16  conv1 weight tile (streamed over the grid)
    gamma_ref: (1, tn)         f32   BN scale tile
    beta_ref : (1, tn)         f32   BN shift tile
    w2_ref   : (K2*K2, tn)     f32   conv2 weight tile (16 spatial taps)
    out_ref  : (Npad, tn)      f32   per-batch, per-channel partial sums
    """
    r = p_ref.shape[0]
    n = r // (K2 * K2)
    n_pad = out_ref.shape[0]
    tn = out_ref.shape[1]

    # --- Conv1 tile as matmul: bf16 operands on the MXU, f32 accumulate ---
    conv1 = jnp.dot(p_ref[...], w1_ref[...],
                    preferred_element_type=jnp.float32)            # (R, tn)

    # --- BatchNorm2d (training-mode batch stats, biased variance) in ONE
    #     pass over conv1: sum + sum-of-squares, all f32. ---
    s = jnp.sum(conv1, axis=0, keepdims=True)                      # (1, tn)
    sq = jnp.sum(conv1 * conv1, axis=0, keepdims=True)             # (1, tn)
    inv_r = 1.0 / r
    mean = s * inv_r
    var = sq * inv_r - mean * mean
    scale = gamma_ref[...] * jax.lax.rsqrt(var + BN_EPS)           # (1, tn)
    shift = beta_ref[...] - mean * scale                           # (1, tn)

    # --- LeakyReLU(0.2) on the scaled/shifted conv1 (no xhat/y temporaries) ---
    y = conv1 * scale + shift
    act = jnp.where(y >= 0.0, y, LRELU_SLOPE * y)                  # (R, tn)

    # --- Conv2 partial: per-batch tap-axis reduction (linear in N, no
    #     selector matmul, no concatenated full-size temporaries). ---
    taps = act.reshape(n, K2 * K2, tn)                             # (N, 16, tn)
    red = jnp.sum(taps * w2_ref[...][None, :, :], axis=1)          # (N, tn)

    # Lane-dense store; padding rows n..n_pad-1 explicitly zeroed.
    out_ref[...] = jnp.zeros_like(out_ref)
    out_ref[pl.ds(0, n), :] = red


def _im2col_conv1(x):
    """NCHW input -> (N*OH*OW, Cin*K1*K1) bf16 patches, column order (ci, kh, kw).

    The strided pieces are cast to bf16 *before* stack/transpose so the full
    f32 patch matrix is never materialized in HBM.
    """
    n, c, h, w = x.shape
    oh = (h + 2 * P1 - K1) // S1 + 1
    ow = (w + 2 * P1 - K1) // S1 + 1
    xp = jnp.pad(x, ((0, 0), (0, 0), (P1, P1), (P1, P1)))
    pieces = []
    for kh in range(K1):
        for kw in range(K1):
            piece = xp[:, :, kh:kh + S1 * oh:S1, kw:kw + S1 * ow:S1]
            pieces.append(piece.astype(jnp.bfloat16))
    # (N, C, K1*K1, OH, OW) -> (N, OH, OW, C, K1*K1) -> (N*OH*OW, C*K1*K1)
    p = jnp.stack(pieces, axis=2)
    p = p.transpose(0, 3, 4, 1, 2).reshape(n * oh * ow, c * K1 * K1)
    return p, oh, ow


def rf_output_small_block(x, w1, gamma, beta, w2, *, tn=128):
    """x: (N, 256, H, W) NCHW.  Returns (N, 1, 1, 1) matching PyTorch."""
    n = x.shape[0]
    patches, oh, ow = _im2col_conv1(x)                     # (R, 4096) bf16
    # TODO(synk): generalize the second conv to OH/OW > 4 (sliding 4x4 window);
    # here the downsampled map is exactly 4x4, so conv2 is a full reduction.
    assert oh == K2 and ow == K2, "second conv expects a 4x4 feature map here"
    r = n * oh * ow
    n_pad = -(-n // 8) * 8                                 # sublane-pad batch
    assert C_MID % tn == 0
    n_tiles = C_MID // tn
    ck = C_IN * K1 * K1                                    # 4096

    # bf16 matmul weight; f32 everywhere else.
    w1m = w1.reshape(C_MID, ck).T.astype(jnp.bfloat16)     # (4096, 512)
    w2r = w2[0].transpose(1, 2, 0).reshape(K2 * K2, C_MID).astype(jnp.float32)
    gamma2 = gamma.reshape(1, C_MID).astype(jnp.float32)
    beta2 = beta.reshape(1, C_MID).astype(jnp.float32)

    partial = pl.pallas_call(
        _rf_kernel,
        out_shape=jax.ShapeDtypeStruct((n_pad, C_MID), jnp.float32),
        grid_spec=pltpu.PrefetchScalarGridSpec(
            num_scalar_prefetch=0,
            grid=(n_tiles,),
            in_specs=[
                # Grid-invariant patches: single-buffered (no wasted 2nd copy).
                pl.BlockSpec((r, ck), lambda j: (0, 0),
                             pipeline_mode=pl.Buffered(1)),
                # Streamed conv1 weight tile: default double-buffering.
                pl.BlockSpec((ck, tn), lambda j: (0, j)),
                pl.BlockSpec((1, tn), lambda j: (0, j)),        # gamma tile
                pl.BlockSpec((1, tn), lambda j: (0, j)),        # beta tile
                pl.BlockSpec((K2 * K2, tn), lambda j: (0, j)),  # conv2 weight tile
            ],
            out_specs=pl.BlockSpec((n_pad, tn), lambda j: (0, j)),
        ),
        compiler_params=pltpu.CompilerParams(
            dimension_semantics=("parallel",),
        ),
    )(patches, w1m, gamma2, beta2, w2r)

    # Final channel reduction of the per-tile partials (tiny, done by XLA).
    out = jnp.sum(partial[:n], axis=1)                     # (N,)
    return out.reshape(n, 1, 1, 1)


def _reference(x, w1, gamma, beta, w2):
    """Plain-JAX f32 reference mirroring the PyTorch forward (training-mode BN)."""
    y = jax.lax.conv_general_dilated(
        x, w1, window_strides=(S1, S1), padding=((P1, P1), (P1, P1)),
        dimension_numbers=("NCHW", "OIHW", "NCHW"))
    mean = y.mean(axis=(0, 2, 3), keepdims=True)
    var = ((y - mean) ** 2).mean(axis=(0, 2, 3), keepdims=True)
    y = (y - mean) * jax.lax.rsqrt(var + BN_EPS)
    y = y * gamma.reshape(1, -1, 1, 1) + beta.reshape(1, -1, 1, 1)
    y = jnp.where(y >= 0, y, LRELU_SLOPE * y)
    return jax.lax.conv_general_dilated(
        y, w2, window_strides=(1, 1), padding="VALID",
        dimension_numbers=("NCHW", "OIHW", "NCHW"))


if __name__ == "__main__":
    key = jax.random.PRNGKey(0)
    kx, kw1, kw2, kg, kb = jax.random.split(key, 5)

    # Small spatial size consistent with the module: 8x8 -> down -> 4x4 -> conv4 -> 1x1.
    N, H, W = 2, 8, 8
    x = jax.random.normal(kx, (N, C_IN, H, W), dtype=jnp.float32)

    # Deterministic synthetic parameters (shapes from __init__).
    w1 = jax.random.normal(kw1, (C_MID, C_IN, K1, K1), dtype=jnp.float32) * 0.02
    w2 = jax.random.normal(kw2, (C_OUT, C_MID, K2, K2), dtype=jnp.float32) * 0.02
    gamma = 1.0 + 0.1 * jax.random.normal(kg, (C_MID,), dtype=jnp.float32)
    beta = 0.1 * jax.random.normal(kb, (C_MID,), dtype=jnp.float32)

    fn = jax.jit(rf_output_small_block)
    out = fn(x, w1, gamma, beta, w2)
    out = jax.block_until_ready(out)

    ref = _reference(x, w1, gamma, beta, w2)
    assert out.shape == ref.shape == (N, 1, 1, 1)
    # bf16 matmul operands (f32 accumulation) + bf16 im2col -> looser
    # tolerance than an all-f32 pipeline.
    assert jnp.allclose(out, ref, atol=5e-2, rtol=2e-2), (out, ref)

    print("KERNEL_OK")
</pallas_src>

<mosaic_0001>
module attributes {stable_mosaic.version = 11 : i64} {
  func.func @_rf_kernel(%arg0: i32, %arg1: memref<32x4096xbf16, #tpu.memory_space<vmem>>, %arg2: memref<4096x128xbf16, #tpu.memory_space<vmem>>, %arg3: memref<1x128xf32, #tpu.memory_space<vmem>>, %arg4: memref<1x128xf32, #tpu.memory_space<vmem>>, %arg5: memref<16x128xf32, #tpu.memory_space<vmem>>, %arg6: memref<8x128xf32, #tpu.memory_space<vmem>>) attributes {dimension_semantics = [#tpu.dimension_semantics<parallel>], iteration_bounds = array<i64: 4>, scalar_prefetch = 0 : i64, scratch_operands = 0 : i64, tpu.core_type = #tpu.core_type<tc>, window_params = [{pipeline_mode = #tpu.pipeline_mode<synchronous>, transform_indices = @transform_0, window_bounds = array<i64: 32, 4096>}, {transform_indices = @transform_1, window_bounds = array<i64: 4096, 128>}, {transform_indices = @transform_2, window_bounds = array<i64: 1, 128>}, {transform_indices = @transform_3, window_bounds = array<i64: 1, 128>}, {transform_indices = @transform_4, window_bounds = array<i64: 16, 128>}, {transform_indices = @transform_5, window_bounds = array<i64: 8, 128>}]} {
    %c0 = arith.constant 0 : index
    %c0_0 = arith.constant 0 : index
    %0 = vector.load %arg1[%c0, %c0_0] : memref<32x4096xbf16, #tpu.memory_space<vmem>>, vector<32x4096xbf16>
    %c0_1 = arith.constant 0 : index
    %c0_2 = arith.constant 0 : index
    %1 = vector.load %arg2[%c0_1, %c0_2] : memref<4096x128xbf16, #tpu.memory_space<vmem>>, vector<4096x128xbf16>
    %cst = arith.constant dense<0.000000e+00> : vector<32x128xf32>
    %2 = tpu.matmul %0, %1, %cst {dimension_numbers = #tpu.dot_dimension_numbers<[1], [0], [0], [1], [0, 0, 1, 1], [], []>} : vector<32x4096xbf16>, vector<4096x128xbf16>, vector<32x128xf32> -> vector<32x128xf32>
    %cst_3 = arith.constant dense<0.000000e+00> : vector<128xf32>
    %3 = vector.multi_reduction <add>, %2, %cst_3 [0] : vector<32x128xf32> to vector<128xf32>
    %4 = vector.shape_cast %3 : vector<128xf32> to vector<1x128xf32>
    %5 = arith.mulf %2, %2 : vector<32x128xf32>
    %cst_4 = arith.constant dense<0.000000e+00> : vector<128xf32>
    %6 = vector.multi_reduction <add>, %5, %cst_4 [0] : vector<32x128xf32> to vector<128xf32>
    %7 = vector.shape_cast %6 : vector<128xf32> to vector<1x128xf32>
    %cst_5 = arith.constant 3.125000e-02 : f32
    %8 = vector.broadcast %cst_5 : f32 to vector<1x128xf32>
    %9 = arith.mulf %4, %8 : vector<1x128xf32>
    %cst_6 = arith.constant 3.125000e-02 : f32
    %10 = vector.broadcast %cst_6 : f32 to vector<1x128xf32>
    %11 = arith.mulf %7, %10 : vector<1x128xf32>
    %12 = arith.mulf %9, %9 : vector<1x128xf32>
    %13 = arith.subf %11, %12 : vector<1x128xf32>
    %c0_7 = arith.constant 0 : index
    %c0_8 = arith.constant 0 : index
    %14 = vector.load %arg3[%c0_7, %c0_8] : memref<1x128xf32, #tpu.memory_space<vmem>>, vector<1x128xf32>
    %cst_9 = arith.constant 9.99999974E-6 : f32
    %15 = vector.broadcast %cst_9 : f32 to vector<1x128xf32>
    %16 = arith.addf %13, %15 : vector<1x128xf32>
    %17 = math.rsqrt %16 : vector<1x128xf32>
    %18 = arith.mulf %14, %17 : vector<1x128xf32>
    %c0_10 = arith.constant 0 : index
    %c0_11 = arith.constant 0 : index
    %19 = vector.load %arg4[%c0_10, %c0_11] : memref<1x128xf32, #tpu.memory_space<vmem>>, vector<1x128xf32>
    %20 = arith.mulf %9, %18 : vector<1x128xf32>
    %21 = arith.subf %19, %20 : vector<1x128xf32>
    %22 = vector.broadcast %18 : vector<1x128xf32> to vector<32x128xf32>
    %23 = arith.mulf %2, %22 : vector<32x128xf32>
    %24 = vector.broadcast %21 : vector<1x128xf32> to vector<32x128xf32>
    %25 = arith.addf %23, %24 : vector<32x128xf32>
    %cst_12 = arith.constant 0.000000e+00 : f32
    %26 = vector.broadcast %cst_12 : f32 to vector<32x128xf32>
    %27 = arith.cmpf oge, %25, %26 : vector<32x128xf32>
    %cst_13 = arith.constant 2.000000e-01 : f32
    %28 = vector.broadcast %cst_13 : f32 to vector<32x128xf32>
    %29 = arith.mulf %28, %25 : vector<32x128xf32>
    %30 = arith.select %27, %25, %29 : vector<32x128xi1>, vector<32x128xf32>
    %31 = vector.shape_cast %30 : vector<32x128xf32> to vector<2x16x128xf32>
    %c0_14 = arith.constant 0 : index
    %c0_15 = arith.constant 0 : index
    %32 = vector.load %arg5[%c0_14, %c0_15] : memref<16x128xf32, #tpu.memory_space<vmem>>, vector<16x128xf32>
    %33 = vector.shape_cast %32 : vector<16x128xf32> to vector<1x16x128xf32>
    %34 = vector.broadcast %33 : vector<1x16x128xf32> to vector<2x16x128xf32>
    %35 = arith.mulf %31, %34 : vector<2x16x128xf32>
    %cst_16 = arith.constant dense<0.000000e+00> : vector<2x128xf32>
    %36 = vector.multi_reduction <add>, %35, %cst_16 [1] : vector<2x16x128xf32> to vector<2x128xf32>
    %cst_17 = arith.constant 0.000000e+00 : f32
    %37 = vector.broadcast %cst_17 : f32 to vector<8x128xf32>
    %c0_18 = arith.constant 0 : index
    %c0_19 = arith.constant 0 : index
    %38 = vector.load %arg6[%c0_18, %c0_19] : memref<8x128xf32, #tpu.memory_space<vmem>>, vector<8x128xf32>
    tpu.vector_store %arg6[%c0_18, %c0_19], %37 {strides = array<i32>} : memref<8x128xf32, #tpu.memory_space<vmem>>, vector<8x128xf32>,
    %c0_20 = arith.constant 0 : index
    %c0_21 = arith.constant 0 : index
    %39 = vector.load %arg6[%c0_20, %c0_21] : memref<8x128xf32, #tpu.memory_space<vmem>>, vector<2x128xf32>
    tpu.vector_store %arg6[%c0_20, %c0_21], %36 {strides = array<i32>} : memref<8x128xf32, #tpu.memory_space<vmem>>, vector<2x128xf32>,
    return
  }
  func.func @transform_0(%arg0: i32) -> (i32, i32) {
    %c0_i32 = arith.constant 0 : i32
    %c0_i32_0 = arith.constant 0 : i32
    %c0_i32_1 = arith.constant 0 : i32
    return %c0_i32, %c0_i32_0 : i32, i32
  }
  func.func @transform_1(%arg0: i32) -> (i32, i32) {
    %c0_i32 = arith.constant 0 : i32
    %c0_i32_0 = arith.constant 0 : i32
    return %c0_i32, %arg0 : i32, i32
  }
  func.func @transform_2(%arg0: i32) -> (i32, i32) {
    %c0_i32 = arith.constant 0 : i32
    %c0_i32_0 = arith.constant 0 : i32
    return %c0_i32, %arg0 : i32, i32
  }
  func.func @transform_3(%arg0: i32) -> (i32, i32) {
    %c0_i32 = arith.constant 0 : i32
    %c0_i32_0 = arith.constant 0 : i32
    return %c0_i32, %arg0 : i32, i32
  }
  func.func @transform_4(%arg0: i32) -> (i32, i32) {
    %c0_i32 = arith.constant 0 : i32
    %c0_i32_0 = arith.constant 0 : i32
    return %c0_i32, %arg0 : i32, i32
  }
  func.func @transform_5(%arg0: i32) -> (i32, i32) {
    %c0_i32 = arith.constant 0 : i32
    %c0_i32_0 = arith.constant 0 : i32
    return %c0_i32, %arg0 : i32, i32
  }
}

</mosaic_0001>

<bundles_post_ra>
// kernel: rf_output_small_block.1
= control target key start
LH: loop header
LB: loop body
LE: loop exit
PB: predicated region body
PF: predicated region fallthrough
CT: control target
= control target key end

     0   :  { %s9007_s18 = smov 0   ;;  %s9009_s19 = smov 0   ;;  %s10710_s0 = inlined_call_operand.vmem [shape: bf16[32,4096], index: 0, kind: input, shape index: {}]   ;;  %s10711_s1 = inlined_call_operand.vmem [shape: bf16[4096,512], index: 1, kind: input, shape index: {}]   ;;  %s10712_s2 = inlined_call_operand.vmem [shape: f32[1,512], index: 2, kind: input, shape index: {}]   ;;  %s10713_s3 = inlined_call_operand.vmem [shape: f32[1,512], index: 3, kind: input, shape index: {}]   ;;  %s10714_s4 = inlined_call_operand.vmem [shape: f32[16,512], index: 4, kind: input, shape index: {}]   ;;  %s10715_s5 = inlined_call_operand.vmem [shape: f32[8,512], index: 5, kind: output, shape index: {}]  }
   0x1   :  { %s9011_s20 = smov 0  }
   0x2 LB: > { %s7887_s21 = sadd.s32 4294967295, %s8974_s20   ;;  %s9024_s22 = sadd.s32 1, %s8974_s20   ;;  %s8974_s20 = sphi %s9011_s20, %s10739_s20   ;;  %s8970_s19 = sphi %s9009_s19, %s10738_s19   ;;  %s8966_s18 = sphi %s9007_s18, %s10737_s18  }
   0x3   : > { %s40_s23 = ssub.s32 %s8974_s20, %s9024_s22  ;;  %s43_s24 = sadd.s32 1, %s8970_s19 }
   0x4   : > { %p41_p0 = scmp.eq.s32.totalorder %s40_s23, 0  ;;  %p50_p1 = scmp.ne.s32.totalorder %s8970_s19, %s8966_s18 }
   0x5   : > { %p51_p2 = scmp.eq.s32.totalorder %s8974_s20, 0  ;;  %p7890_p4 = scmp.ge.s32.totalorder %s8974_s20, 4 }
   0x6   : > { %s9033_s25 = scalar_select %p41_p0, %s8970_s19, %s43_s24  }
   0x7   : > { %p9035_p3 = por %p51_p2, %p50_p1  ;;  %183 = sbr.rel (%p7890_p4) target bundleno = 363 (0x16b), region = 20 }
   0xc   : > { %186 = sbr.rel (!%p9035_p3) target bundleno = 357 (0x165), region = 24  ;;  %s188_s27 = sand.u32 (%p9035_p3), 1, %s8970_s19  }
   0xd   : > { %s7892_s28 = sshll.u32 (%p9035_p3), %s8974_s20, 2  ;;  %s7891_s29 = sshll.u32 (%p9035_p3), %s188_s27, 11 }
   0xe   : > { %s9047_s7 = scalar_lea.vmem (%p9035_p3), %s10711_s1, %s7892_s28  ;;  %s9051_s8 = scalar_lea.vmem (%p9035_p3), [#allocation2], %s7891_s29 }
   0xf   : > { %v209_v0 = vld [vmem:[%s9047_s7] sm:$0xf] (%p9035_p3)  ;;  %v211_v1 = vld [vmem:[%s9047_s7 + $0x10] sm:$0xf] (%p9035_p3) }
  0x10   : > { %210 = vst [vmem:[%s9051_s8] sm:$0xf] (%p9035_p3), %v209_v0  ;;  %212 = vst [vmem:[%s9051_s8 + $0x4] sm:$0xf] (%p9035_p3), %v211_v1  ;;  %v213_v2 = vld [vmem:[%s9047_s7 + $0x20] sm:$0xf] (%p9035_p3) }
  0x11   : > { %v215_v3 = vld [vmem:[%s9047_s7 + $0x30] sm:$0xf]  ;;  %v217_v4 = vld [vmem:[%s9047_s7 + $0x40] sm:$0xf]  ;;  %214 = vst [vmem:[%s9051_s8 + $0x8] sm:$0xf] %v213_v2 }
  0x12   : > { %216 = vst [vmem:[%s9051_s8 + $0xc] sm:$0xf] %v215_v3  ;;  %218 = vst [vmem:[%s9051_s8 + $0x10] sm:$0xf] %v217_v4  ;;  %v219_v5 = vld [vmem:[%s9047_s7 + $0x50] sm:$0xf] }
  0x13   : > { %v221_v6 = vld [vmem:[%s9047_s7 + $0x60] sm:$0xf]  ;;  %v223_v7 = vld [vmem:[%s9047_s7 + $0x70] sm:$0xf]  ;;  %220 = vst [vmem:[%s9051_s8 + $0x14] sm:$0xf] %v219_v5 }
  0x14   : > { %222 = vst [vmem:[%s9051_s8 + $0x18] sm:$0xf] %v221_v6  ;;  %224 = vst [vmem:[%s9051_s8 + $0x1c] sm:$0xf] %v223_v7  ;;  %v225_v8 = vld [vmem:[%s9047_s7 + $0x80] sm:$0xf] }
  0x15   : > { %v227_v9 = vld [vmem:[%s9047_s7 + $0x90] sm:$0xf]  ;;  %v229_v10 = vld [vmem:[%s9047_s7 + $0xa0] sm:$0xf]  ;;  %226 = vst [vmem:[%s9051_s8 + $0x20] sm:$0xf] %v225_v8 }
  0x16   : > { %228 = vst [vmem:[%s9051_s8 + $0x24] sm:$0xf] %v227_v9  ;;  %230 = vst [vmem:[%s9051_s8 + $0x28] sm:$0xf] %v229_v10  ;;  %v231_v11 = vld [vmem:[%s9047_s7 + $0xb0] sm:$0xf] }
  0x17   : > { %v233_v12 = vld [vmem:[%s9047_s7 + $0xc0] sm:$0xf]  ;;  %v235_v13 = vld [vmem:[%s9047_s7 + $0xd0] sm:$0xf]  ;;  %232 = vst [vmem:[%s9051_s8 + $0x2c] sm:$0xf] %v231_v11 }
  0x18   : > { %234 = vst [vmem:[%s9051_s8 + $0x30] sm:$0xf] %v233_v12  ;;  %236 = vst [vmem:[%s9051_s8 + $0x34] sm:$0xf] %v235_v13  ;;  %v237_v14 = vld [vmem:[%s9047_s7 + $0xe0] sm:$0xf] }
  0x19   : > { %v239_v15 = vld [vmem:[%s9047_s7 + $0xf0] sm:$0xf]  ;;  %v241_v16 = vld [vmem:[%s9047_s7 + $0x100] sm:$0xf]  ;;  %238 = vst [vmem:[%s9051_s8 + $0x38] sm:$0xf] %v237_v14 }
  0x1a   : > { %240 = vst [vmem:[%s9051_s8 + $0x3c] sm:$0xf] %v239_v15  ;;  %242 = vst [vmem:[%s9051_s8 + $0x40] sm:$0xf] %v241_v16  ;;  %v243_v17 = vld [vmem:[%s9047_s7 + $0x110] sm:$0xf] }
  0x1b   : > { %v245_v18 = vld [vmem:[%s9047_s7 + $0x120] sm:$0xf]  ;;  %v247_v19 = vld [vmem:[%s9047_s7 + $0x130] sm:$0xf]  ;;  %244 = vst [vmem:[%s9051_s8 + $0x44] sm:$0xf] %v243_v17 }
  0x1c   : > { %246 = vst [vmem:[%s9051_s8 + $0x48] sm:$0xf] %v245_v18  ;;  %248 = vst [vmem:[%s9051_s8 + $0x4c] sm:$0xf] %v247_v19  ;;  %v249_v20 = vld [vmem:[%s9047_s7 + $0x140] sm:$0xf] }
  0x1d   : > { %v251_v21 = vld [vmem:[%s9047_s7 + $0x150] sm:$0xf]  ;;  %v253_v22 = vld [vmem:[%s9047_s7 + $0x160] sm:$0xf]  ;;  %250 = vst [vmem:[%s9051_s8 + $0x50] sm:$0xf] %v249_v20 }
  0x1e   : > { %252 = vst [vmem:[%s9051_s8 + $0x54] sm:$0xf] %v251_v21  ;;  %254 = vst [vmem:[%s9051_s8 + $0x58] sm:$0xf] %v253_v22  ;;  %v255_v23 = vld [vmem:[%s9047_s7 + $0x170] sm:$0xf] }
  0x1f   : > { %v257_v24 = vld [vmem:[%s9047_s7 + $0x180] sm:$0xf]  ;;  %v259_v25 = vld [vmem:[%s9047_s7 + $0x190] sm:$0xf]  ;;  %256 = vst [vmem:[%s9051_s8 + $0x5c] sm:$0xf] %v255_v23 }
  0x20   : > { %258 = vst [vmem:[%s9051_s8 + $0x60] sm:$0xf] %v257_v24  ;;  %260 = vst [vmem:[%s9051_s8 + $0x64] sm:$0xf] %v259_v25  ;;  %v261_v26 = vld [vmem:[%s9047_s7 + $0x1a0] sm:$0xf] }
  0x21   : > { %v263_v27 = vld [vmem:[%s9047_s7 + $0x1b0] sm:$0xf]  ;;  %v265_v28 = vld [vmem:[%s9047_s7 + $0x1c0] sm:$0xf]  ;;  %262 = vst [vmem:[%s9051_s8 + $0x68] sm:$0xf] %v261_v26 }
  0x22   : > { %264 = vst [vmem:[%s9051_s8 + $0x6c] sm:$0xf] %v263_v27  ;;  %266 = vst [vmem:[%s9051_s8 + $0x70] sm:$0xf] %v265_v28  ;;  %v267_v29 = vld [vmem:[%s9047_s7 + $0x1d0] sm:$0xf] }
  0x23   : > { %v269_v30 = vld [vmem:[%s9047_s7 + $0x1e0] sm:$0xf]  ;;  %v271_v31 = vld [vmem:[%s9047_s7 + $0x1f0] sm:$0xf]  ;;  %268 = vst [vmem:[%s9051_s8 + $0x74] sm:$0xf] %v267_v29 }
  0x24   : > { %270 = vst [vmem:[%s9051_s8 + $0x78] sm:$0xf] %v269_v30  ;;  %272 = vst [vmem:[%s9051_s8 + $0x7c] sm:$0xf] %v271_v31  ;;  %v273_v32 = vld [vmem:[%s9047_s7 + $0x200] sm:$0xf] }
  0x25   : > { %v275_v33 = vld [vmem:[%s9047_s7 + $0x210] sm:$0xf]  ;;  %v277_v34 = vld [vmem:[%s9047_s7 + $0x220] sm:$0xf]  ;;  %274 = vst [vmem:[%s9051_s8 + $0x80] sm:$0xf] %v273_v32 }
  0x26   : > { %276 = vst [vmem:[%s9051_s8 + $0x84] sm:$0xf] %v275_v33  ;;  %278 = vst [vmem:[%s9051_s8 + $0x88] sm:$0xf] %v277_v34  ;;  %v279_v35 = vld [vmem:[%s9047_s7 + $0x230] sm:$0xf] }
  0x27   : > { %v281_v36 = vld [vmem:[%s9047_s7 + $0x240] sm:$0xf]  ;;  %v283_v37 = vld [vmem:[%s9047_s7 + $0x250] sm:$0xf]  ;;  %280 = vst [vmem:[%s9051_s8 + $0x8c] sm:$0xf] %v279_v35 }
  0x28   : > { %282 = vst [vmem:[%s9051_s8 + $0x90] sm:$0xf] %v281_v36  ;;  %284 = vst [vmem:[%s9051_s8 + $0x94] sm:$0xf] %v283_v37  ;;  %v285_v38 = vld [vmem:[%s9047_s7 + $0x260] sm:$0xf] }
  0x29   : > { %v287_v39 = vld [vmem:[%s9047_s7 + $0x270] sm:$0xf]  ;;  %v289_v40 = vld [vmem:[%s9047_s7 + $0x280] sm:$0xf]  ;;  %286 = vst [vmem:[%s9051_s8 + $0x98] sm:$0xf] %v285_v38 }
  0x2a   : > { %288 = vst [vmem:[%s9051_s8 + $0x9c] sm:$0xf] %v287_v39  ;;  %290 = vst [vmem:[%s9051_s8 + $0xa0] sm:$0xf] %v289_v40  ;;  %v291_v41 = vld [vmem:[%s9047_s7 + $0x290] sm:$0xf] }
  0x2b   : > { %v293_v42 = vld [vmem:[%s9047_s7 + $0x2a0] sm:$0xf]  ;;  %v295_v43 = vld [vmem:[%s9047_s7 + $0x2b0] sm:$0xf]  ;;  %292 = vst [vmem:[%s9051_s8 + $0xa4] sm:$0xf] %v291_v41 }
  0x2c   : > { %294 = vst [vmem:[%s9051_s8 + $0xa8] sm:$0xf] %v293_v42  ;;  %296 = vst [vmem:[%s9051_s8 + $0xac] sm:$0xf] %v295_v43  ;;  %v297_v44 = vld [vmem:[%s9047_s7 + $0x2c0] sm:$0xf] }
  0x2d   : > { %v299_v45 = vld [vmem:[%s9047_s7 + $0x2d0] sm:$0xf]  ;;  %v301_v46 = vld [vmem:[%s9047_s7 + $0x2e0] sm:$0xf]  ;;  %298 = vst [vmem:[%s9051_s8 + $0xb0] sm:$0xf] %v297_v44 }
  0x2e   : > { %300 = vst [vmem:[%s9051_s8 + $0xb4] sm:$0xf] %v299_v45  ;;  %302 = vst [vmem:[%s9051_s8 + $0xb8] sm:$0xf] %v301_v46  ;;  %v303_v47 = vld [vmem:[%s9047_s7 + $0x2f0] sm:$0xf] }
  0x2f   : > { %v305_v48 = vld [vmem:[%s9047_s7 + $0x300] sm:$0xf]  ;;  %v307_v49 = vld [vmem:[%s9047_s7 + $0x310] sm:$0xf]  ;;  %304 = vst [vmem:[%s9051_s8 + $0xbc] sm:$0xf] %v303_v47 }
  0x30   : > { %306 = vst [vmem:[%s9051_s8 + $0xc0] sm:$0xf] %v305_v48  ;;  %308 = vst [vmem:[%s9051_s8 + $0xc4] sm:$0xf] %v307_v49  ;;  %v309_v50 = vld [vmem:[%s9047_s7 + $0x320] sm:$0xf] }
  0x31   : > { %v311_v51 = vld [vmem:[%s9047_s7 + $0x330] sm:$0xf]  ;;  %v313_v52 = vld [vmem:[%s9047_s7 + $0x340] sm:$0xf]  ;;  %310 = vst [vmem:[%s9051_s8 + $0xc8] sm:$0xf] %v309_v50 }
  0x32   : > { %312 = vst [vmem:[%s9051_s8 + $0xcc] sm:$0xf] %v311_v51  ;;  %314 = vst [vmem:[%s9051_s8 + $0xd0] sm:$0xf] %v313_v52  ;;  %v315_v53 = vld [vmem:[%s9047_s7 + $0x350] sm:$0xf] }
  0x33   : > { %v317_v54 = vld [vmem:[%s9047_s7 + $0x360] sm:$0xf]  ;;  %v319_v55 = vld [vmem:[%s9047_s7 + $0x370] sm:$0xf]  ;;  %316 = vst [vmem:[%s9051_s8 + $0xd4] sm:$0xf] %v315_v53 }
  0x34   : > { %318 = vst [vmem:[%s9051_s8 + $0xd8] sm:$0xf] %v317_v54  ;;  %320 = vst [vmem:[%s9051_s8 + $0xdc] sm:$0xf] %v319_v55  ;;  %v321_v56 = vld [vmem:[%s9047_s7 + $0x380] sm:$0xf] }
  0x35   : > { %v323_v57 = vld [vmem:[%s9047_s7 + $0x390] sm:$0xf]  ;;  %v325_v58 = vld [vmem:[%s9047_s7 + $0x3a0] sm:$0xf]  ;;  %322 = vst [vmem:[%s9051_s8 + $0xe0] sm:$0xf] %v321_v56 }
  0x36   : > { %324 = vst [vmem:[%s9051_s8 + $0xe4] sm:$0xf] %v323_v57  ;;  %326 = vst [vmem:[%s9051_s8 + $0xe8] sm:$0xf] %v325_v58  ;;  %v327_v59 = vld [vmem:[%s9047_s7 + $0x3b0] sm:$0xf] }
  0x37   : > { %v329_v60 = vld [vmem:[%s9047_s7 + $0x3c0] sm:$0xf]  ;;  %v331_v61 = vld [vmem:[%s9047_s7 + $0x3d0] sm:$0xf]  ;;  %328 = vst [vmem:[%s9051_s8 + $0xec] sm:$0xf] %v327_v59 }
  0x38   : > { %330 = vst [vmem:[%s9051_s8 + $0xf0] sm:$0xf] %v329_v60  ;;  %332 = vst [vmem:[%s9051_s8 + $0xf4] sm:$0xf] %v331_v61  ;;  %v333_v62 = vld [vmem:[%s9047_s7 + $0x3e0] sm:$0xf] }
  0x39   : > { %v335_v63 = vld [vmem:[%s9047_s7 + $0x3f0] sm:$0xf]  ;;  %v337_v0 = vld [vmem:[%s9047_s7 + $0x400] sm:$0xf]  ;;  %334 = vst [vmem:[%s9051_s8 + $0xf8] sm:$0xf] %v333_v62 }
  0x3a   : > { %336 = vst [vmem:[%s9051_s8 + $0xfc] sm:$0xf] %v335_v63  ;;  %338 = vst [vmem:[%s9051_s8 + $0x100] sm:$0xf] %v337_v0  ;;  %v339_v1 = vld [vmem:[%s9047_s7 + $0x410] sm:$0xf] }
  0x3b   : > { %v341_v2 = vld [vmem:[%s9047_s7 + $0x420] sm:$0xf]  ;;  %v343_v3 = vld [vmem:[%s9047_s7 + $0x430] sm:$0xf]  ;;  %340 = vst [vmem:[%s9051_s8 + $0x104] sm:$0xf] %v339_v1 }
  0x3c   : > { %342 = vst [vmem:[%s9051_s8 + $0x108] sm:$0xf] %v341_v2  ;;  %344 = vst [vmem:[%s9051_s8 + $0x10c] sm:$0xf] %v343_v3  ;;  %v345_v4 = vld [vmem:[%s9047_s7 + $0x440] sm:$0xf] }
  0x3d   : > { %v347_v5 = vld [vmem:[%s9047_s7 + $0x450] sm:$0xf]  ;;  %v349_v6 = vld [vmem:[%s9047_s7 + $0x460] sm:$0xf]  ;;  %346 = vst [vmem:[%s9051_s8 + $0x110] sm:$0xf] %v345_v4 }
  0x3e   : > { %348 = vst [vmem:[%s9051_s8 + $0x114] sm:$0xf] %v347_v5  ;;  %350 = vst [vmem:[%s9051_s8 + $0x118] sm:$0xf] %v349_v6  ;;  %v351_v7 = vld [vmem:[%s9047_s7 + $0x470] sm:$0xf] }
  0x3f   : > { %v353_v8 = vld [vmem:[%s9047_s7 + $0x480] sm:$0xf]  ;;  %v355_v9 = vld [vmem:[%s9047_s7 + $0x490] sm:$0xf]  ;;  %352 = vst [vmem:[%s9051_s8 + $0x11c] sm:$0xf] %v351_v7 }
  0x40   : > { %354 = vst [vmem:[%s9051_s8 + $0x120] sm:$0xf] %v353_v8  ;;  %356 = vst [vmem:[%s9051_s8 + $0x124] sm:$0xf] %v355_v9  ;;  %v357_v10 = vld [vmem:[%s9047_s7 + $0x4a0] sm:$0xf] }
  0x41   : > { %v359_v11 = vld [vmem:[%s9047_s7 + $0x4b0] sm:$0xf]  ;;  %v361_v12 = vld [vmem:[%s9047_s7 + $0x4c0] sm:$0xf]  ;;  %358 = vst [vmem:[%s9051_s8 + $0x128] sm:$0xf] %v357_v10 }
  0x42   : > { %360 = vst [vmem:[%s9051_s8 + $0x12c] sm:$0xf] %v359_v11  ;;  %362 = vst [vmem:[%s9051_s8 + $0x130] sm:$0xf] %v361_v12  ;;  %v363_v13 = vld [vmem:[%s9047_s7 + $0x4d0] sm:$0xf] }
  0x43   : > { %v365_v14 = vld [vmem:[%s9047_s7 + $0x4e0] sm:$0xf]  ;;  %v367_v15 = vld [vmem:[%s9047_s7 + $0x4f0] sm:$0xf]  ;;  %364 = vst [vmem:[%s9051_s8 + $0x134] sm:$0xf] %v363_v13 }
  0x44   : > { %366 = vst [vmem:[%s9051_s8 + $0x138] sm:$0xf] %v365_v14  ;;  %368 = vst [vmem:[%s9051_s8 + $0x13c] sm:$0xf] %v367_v15  ;;  %v369_v16 = vld [vmem:[%s9047_s7 + $0x500] sm:$0xf] }
  0x45   : > { %v371_v17 = vld [vmem:[%s9047_s7 + $0x510] sm:$0xf]  ;;  %v373_v18 = vld [vmem:[%s9047_s7 + $0x520] sm:$0xf]  ;;  %370 = vst [vmem:[%s9051_s8 + $0x140] sm:$0xf] %v369_v16 }
  0x46   : > { %372 = vst [vmem:[%s9051_s8 + $0x144] sm:$0xf] %v371_v17  ;;  %374 = vst [vmem:[%s9051_s8 + $0x148] sm:$0xf] %v373_v18  ;;  %v375_v19 = vld [vmem:[%s9047_s7 + $0x530] sm:$0xf] }
  0x47   : > { %v377_v20 = vld [vmem:[%s9047_s7 + $0x540] sm:$0xf]  ;;  %v379_v21 = vld [vmem:[%s9047_s7 + $0x550] sm:$0xf]  ;;  %376 = vst [vmem:[%s9051_s8 + $0x14c] sm:$0xf] %v375_v19 }
  0x48   : > { %378 = vst [vmem:[%s9051_s8 + $0x150] sm:$0xf] %v377_v20  ;;  %380 = vst [vmem:[%s9051_s8 + $0x154] sm:$0xf] %v379_v21  ;;  %v381_v22 = vld [vmem:[%s9047_s7 + $0x560] sm:$0xf] }
  0x49   : > { %v383_v23 = vld [vmem:[%s9047_s7 + $0x570] sm:$0xf]  ;;  %v385_v24 = vld [vmem:[%s9047_s7 + $0x580] sm:$0xf]  ;;  %382 = vst [vmem:[%s9051_s8 + $0x158] sm:$0xf] %v381_v22 }
  0x4a   : > { %384 = vst [vmem:[%s9051_s8 + $0x15c] sm:$0xf] %v383_v23  ;;  %386 = vst [vmem:[%s9051_s8 + $0x160] sm:$0xf] %v385_v24  ;;  %v387_v25 = vld [vmem:[%s9047_s7 + $0x590] sm:$0xf] }
  0x4b   : > { %v389_v26 = vld [vmem:[%s9047_s7 + $0x5a0] sm:$0xf]  ;;  %v391_v27 = vld [vmem:[%s9047_s7 + $0x5b0] sm:$0xf]  ;;  %388 = vst [vmem:[%s9051_s8 + $0x164] sm:$0xf] %v387_v25 }
  0x4c   : > { %390 = vst [vmem:[%s9051_s8 + $0x168] sm:$0xf] %v389_v26  ;;  %392 = vst [vmem:[%s9051_s8 + $0x16c] sm:$0xf] %v391_v27  ;;  %v393_v28 = vld [vmem:[%s9047_s7 + $0x5c0] sm:$0xf] }
  0x4d   : > { %v395_v29 = vld [vmem:[%s9047_s7 + $0x5d0] sm:$0xf]  ;;  %v397_v30 = vld [vmem:[%s9047_s7 + $0x5e0] sm:$0xf]  ;;  %394 = vst [vmem:[%s9051_s8 + $0x170] sm:$0xf] %v393_v28 }
  0x4e   : > { %396 = vst [vmem:[%s9051_s8 + $0x174] sm:$0xf] %v395_v29  ;;  %398 = vst [vmem:[%s9051_s8 + $0x178] sm:$0xf] %v397_v30  ;;  %v399_v31 = vld [vmem:[%s9047_s7 + $0x5f0] sm:$0xf] }
  0x4f   : > { %v401_v32 = vld [vmem:[%s9047_s7 + $0x600] sm:$0xf]  ;;  %v403_v33 = vld [vmem:[%s9047_s7 + $0x610] sm:$0xf]  ;;  %400 = vst [vmem:[%s9051_s8 + $0x17c] sm:$0xf] %v399_v31 }
  0x50   : > { %402 = vst [vmem:[%s9051_s8 + $0x180] sm:$0xf] %v401_v32  ;;  %404 = vst [vmem:[%s9051_s8 + $0x184] sm:$0xf] %v403_v33  ;;  %v405_v34 = vld [vmem:[%s9047_s7 + $0x620] sm:$0xf] }
  0x51   : > { %v407_v35 = vld [vmem:[%s9047_s7 + $0x630] sm:$0xf]  ;;  %v409_v36 = vld [vmem:[%s9047_s7 + $0x640] sm:$0xf]  ;;  %406 = vst [vmem:[%s9051_s8 + $0x188] sm:$0xf] %v405_v34 }
  0x52   : > { %408 = vst [vmem:[%s9051_s8 + $0x18c] sm:$0xf] %v407_v35  ;;  %410 = vst [vmem:[%s9051_s8 + $0x190] sm:$0xf] %v409_v36  ;;  %v411_v37 = vld [vmem:[%s9047_s7 + $0x650] sm:$0xf] }
  0x53   : > { %v413_v38 = vld [vmem:[%s9047_s7 + $0x660] sm:$0xf]  ;;  %v415_v39 = vld [vmem:[%s9047_s7 + $0x670] sm:$0xf]  ;;  %412 = vst [vmem:[%s9051_s8 + $0x194] sm:$0xf] %v411_v37 }
  0x54   : > { %414 = vst [vmem:[%s9051_s8 + $0x198] sm:$0xf] %v413_v38  ;;  %416 = vst [vmem:[%s9051_s8 + $0x19c] sm:$0xf] %v415_v39  ;;  %v417_v40 = vld [vmem:[%s9047_s7 + $0x680] sm:$0xf] }
  0x55   : > { %v419_v41 = vld [vmem:[%s9047_s7 + $0x690] sm:$0xf]  ;;  %v421_v42 = vld [vmem:[%s9047_s7 + $0x6a0] sm:$0xf]  ;;  %418 = vst [vmem:[%s9051_s8 + $0x1a0] sm:$0xf] %v417_v40 }
  0x56   : > { %420 = vst [vmem:[%s9051_s8 + $0x1a4] sm:$0xf] %v419_v41  ;;  %422 = vst [vmem:[%s9051_s8 + $0x1a8] sm:$0xf] %v421_v42  ;;  %v423_v43 = vld [vmem:[%s9047_s7 + $0x6b0] sm:$0xf] }
  0x57   : > { %v425_v44 = vld [vmem:[%s9047_s7 + $0x6c0] sm:$0xf]  ;;  %v427_v45 = vld [vmem:[%s9047_s7 + $0x6d0] sm:$0xf]  ;;  %424 = vst [vmem:[%s9051_s8 + $0x1ac] sm:$0xf] %v423_v43 }
  0x58   : > { %426 = vst [vmem:[%s9051_s8 + $0x1b0] sm:$0xf] %v425_v44  ;;  %428 = vst [vmem:[%s9051_s8 + $0x1b4] sm:$0xf] %v427_v45  ;;  %v429_v46 = vld [vmem:[%s9047_s7 + $0x6e0] sm:$0xf] }
  0x59   : > { %v431_v47 = vld [vmem:[%s9047_s7 + $0x6f0] sm:$0xf]  ;;  %v433_v48 = vld [vmem:[%s9047_s7 + $0x700] sm:$0xf]  ;;  %430 = vst [vmem:[%s9051_s8 + $0x1b8] sm:$0xf] %v429_v46 }
  0x5a   : > { %432 = vst [vmem:[%s9051_s8 + $0x1bc] sm:$0xf] %v431_v47  ;;  %434 = vst [vmem:[%s9051_s8 + $0x1c0] sm:$0xf] %v433_v48  ;;  %v435_v49 = vld [vmem:[%s9047_s7 + $0x710] sm:$0xf] }
  0x5b   : > { %v437_v50 = vld [vmem:[%s9047_s7 + $0x720] sm:$0xf]  ;;  %v439_v51 = vld [vmem:[%s9047_s7 + $0x730] sm:$0xf]  ;;  %436 = vst [vmem:[%s9051_s8 + $0x1c4] sm:$0xf] %v435_v49 }
  0x5c   : > { %438 = vst [vmem:[%s9051_s8 + $0x1c8] sm:$0xf] %v437_v50  ;;  %440 = vst [vmem:[%s9051_s8 + $0x1cc] sm:$0xf] %v439_v51  ;;  %v441_v52 = vld [vmem:[%s9047_s7 + $0x740] sm:$0xf] }
  0x5d   : > { %v443_v53 = vld [vmem:[%s9047_s7 + $0x750] sm:$0xf]  ;;  %v445_v54 = vld [vmem:[%s9047_s7 + $0x760] sm:$0xf]  ;;  %442 = vst [vmem:[%s9051_s8 + $0x1d0] sm:$0xf] %v441_v52 }
  0x5e   : > { %444 = vst [vmem:[%s9051_s8 + $0x1d4] sm:$0xf] %v443_v53  ;;  %446 = vst [vmem:[%s9051_s8 + $0x1d8] sm:$0xf] %v445_v54  ;;  %v447_v55 = vld [vmem:[%s9047_s7 + $0x770] sm:$0xf] }
  0x5f   : > { %v449_v56 = vld [vmem:[%s9047_s7 + $0x780] sm:$0xf]  ;;  %v451_v57 = vld [vmem:[%s9047_s7 + $0x790] sm:$0xf]  ;;  %448 = vst [vmem:[%s9051_s8 + $0x1dc] sm:$0xf] %v447_v55 }
  0x60   : > { %450 = vst [vmem:[%s9051_s8 + $0x1e0] sm:$0xf] %v449_v56  ;;  %452 = vst [vmem:[%s9051_s8 + $0x1e4] sm:$0xf] %v451_v57  ;;  %v453_v58 = vld [vmem:[%s9047_s7 + $0x7a0] sm:$0xf] }
  0x61   : > { %v455_v59 = vld [vmem:[%s9047_s7 + $0x7b0] sm:$0xf]  ;;  %v457_v60 = vld [vmem:[%s9047_s7 + $0x7c0] sm:$0xf]  ;;  %454 = vst [vmem:[%s9051_s8 + $0x1e8] sm:$0xf] %v453_v58 }
  0x62   : > { %456 = vst [vmem:[%s9051_s8 + $0x1ec] sm:$0xf] %v455_v59  ;;  %458 = vst [vmem:[%s9051_s8 + $0x1f0] sm:$0xf] %v457_v60  ;;  %v459_v61 = vld [vmem:[%s9047_s7 + $0x7d0] sm:$0xf] }
  0x63   : > { %v461_v62 = vld [vmem:[%s9047_s7 + $0x7e0] sm:$0xf]  ;;  %v463_v63 = vld [vmem:[%s9047_s7 + $0x7f0] sm:$0xf]  ;;  %460 = vst [vmem:[%s9051_s8 + $0x1f4] sm:$0xf] %v459_v61 }
  0x64   : > { %462 = vst [vmem:[%s9051_s8 + $0x1f8] sm:$0xf] %v461_v62  ;;  %464 = vst [vmem:[%s9051_s8 + $0x1fc] sm:$0xf] %v463_v63  ;;  %v465_v0 = vld [vmem:[%s9047_s7 + $0x800] sm:$0xf] }
  0x65   : > { %v467_v1 = vld [vmem:[%s9047_s7 + $0x810] sm:$0xf]  ;;  %v469_v2 = vld [vmem:[%s9047_s7 + $0x820] sm:$0xf]  ;;  %466 = vst [vmem:[%s9051_s8 + $0x200] sm:$0xf] %v465_v0 }
  0x66   : > { %468 = vst [vmem:[%s9051_s8 + $0x204] sm:$0xf] %v467_v1  ;;  %470 = vst [vmem:[%s9051_s8 + $0x208] sm:$0xf] %v469_v2  ;;  %v471_v3 = vld [vmem:[%s9047_s7 + $0x830] sm:$0xf] }
  0x67   : > { %v473_v4 = vld [vmem:[%s9047_s7 + $0x840] sm:$0xf]  ;;  %v475_v5 = vld [vmem:[%s9047_s7 + $0x850] sm:$0xf]  ;;  %472 = vst [vmem:[%s9051_s8 + $0x20c] sm:$0xf] %v471_v3 }
  0x68   : > { %474 = vst [vmem:[%s9051_s8 + $0x210] sm:$0xf] %v473_v4  ;;  %476 = vst [vmem:[%s9051_s8 + $0x214] sm:$0xf] %v475_v5  ;;  %v477_v6 = vld [vmem:[%s9047_s7 + $0x860] sm:$0xf] }
  0x69   : > { %v479_v7 = vld [vmem:[%s9047_s7 + $0x870] sm:$0xf]  ;;  %v481_v8 = vld [vmem:[%s9047_s7 + $0x880] sm:$0xf]  ;;  %478 = vst [vmem:[%s9051_s8 + $0x218] sm:$0xf] %v477_v6 }
  0x6a   : > { %480 = vst [vmem:[%s9051_s8 + $0x21c] sm:$0xf] %v479_v7  ;;  %482 = vst [vmem:[%s9051_s8 + $0x220] sm:$0xf] %v481_v8  ;;  %v483_v9 = vld [vmem:[%s9047_s7 + $0x890] sm:$0xf] }
  0x6b   : > { %v485_v10 = vld [vmem:[%s9047_s7 + $0x8a0] sm:$0xf]  ;;  %v487_v11 = vld [vmem:[%s9047_s7 + $0x8b0] sm:$0xf]  ;;  %484 = vst [vmem:[%s9051_s8 + $0x224] sm:$0xf] %v483_v9 }
  0x6c   : > { %486 = vst [vmem:[%s9051_s8 + $0x228] sm:$0xf] %v485_v10  ;;  %488 = vst [vmem:[%s9051_s8 + $0x22c] sm:$0xf] %v487_v11  ;;  %v489_v12 = vld [vmem:[%s9047_s7 + $0x8c0] sm:$0xf] }
  0x6d   : > { %v491_v13 = vld [vmem:[%s9047_s7 + $0x8d0] sm:$0xf]  ;;  %v493_v14 = vld [vmem:[%s9047_s7 + $0x8e0] sm:$0xf]  ;;  %490 = vst [vmem:[%s9051_s8 + $0x230] sm:$0xf] %v489_v12 }
  0x6e   : > { %492 = vst [vmem:[%s9051_s8 + $0x234] sm:$0xf] %v491_v13  ;;  %494 = vst [vmem:[%s9051_s8 + $0x238] sm:$0xf] %v493_v14  ;;  %v495_v15 = vld [vmem:[%s9047_s7 + $0x8f0] sm:$0xf] }
  0x6f   : > { %v497_v16 = vld [vmem:[%s9047_s7 + $0x900] sm:$0xf]  ;;  %v499_v17 = vld [vmem:[%s9047_s7 + $0x910] sm:$0xf]  ;;  %496 = vst [vmem:[%s9051_s8 + $0x23c] sm:$0xf] %v495_v15 }
  0x70   : > { %498 = vst [vmem:[%s9051_s8 + $0x240] sm:$0xf] %v497_v16  ;;  %500 = vst [vmem:[%s9051_s8 + $0x244] sm:$0xf] %v499_v17  ;;  %v501_v18 = vld [vmem:[%s9047_s7 + $0x920] sm:$0xf] }
  0x71   : > { %v503_v19 = vld [vmem:[%s9047_s7 + $0x930] sm:$0xf]  ;;  %v505_v20 = vld [vmem:[%s9047_s7 + $0x940] sm:$0xf]  ;;  %502 = vst [vmem:[%s9051_s8 + $0x248] sm:$0xf] %v501_v18 }
  0x72   : > { %504 = vst [vmem:[%s9051_s8 + $0x24c] sm:$0xf] %v503_v19  ;;  %506 = vst [vmem:[%s9051_s8 + $0x250] sm:$0xf] %v505_v20  ;;  %v507_v21 = vld [vmem:[%s9047_s7 + $0x950] sm:$0xf] }
  0x73   : > { %v509_v22 = vld [vmem:[%s9047_s7 + $0x960] sm:$0xf]  ;;  %v511_v23 = vld [vmem:[%s9047_s7 + $0x970] sm:$0xf]  ;;  %508 = vst [vmem:[%s9051_s8 + $0x254] sm:$0xf] %v507_v21 }
  0x74   : > { %510 = vst [vmem:[%s9051_s8 + $0x258] sm:$0xf] %v509_v22  ;;  %512 = vst [vmem:[%s9051_s8 + $0x25c] sm:$0xf] %v511_v23  ;;  %v513_v24 = vld [vmem:[%s9047_s7 + $0x980] sm:$0xf] }
  0x75   : > { %v515_v25 = vld [vmem:[%s9047_s7 + $0x990] sm:$0xf]  ;;  %v517_v26 = vld [vmem:[%s9047_s7 + $0x9a0] sm:$0xf]  ;;  %514 = vst [vmem:[%s9051_s8 + $0x260] sm:$0xf] %v513_v24 }
  0x76   : > { %516 = vst [vmem:[%s9051_s8 + $0x264] sm:$0xf] %v515_v25  ;;  %518 = vst [vmem:[%s9051_s8 + $0x268] sm:$0xf] %v517_v26  ;;  %v519_v27 = vld [vmem:[%s9047_s7 + $0x9b0] sm:$0xf] }
  0x77   : > { %v521_v28 = vld [vmem:[%s9047_s7 + $0x9c0] sm:$0xf]  ;;  %v523_v29 = vld [vmem:[%s9047_s7 + $0x9d0] sm:$0xf]  ;;  %520 = vst [vmem:[%s9051_s8 + $0x26c] sm:$0xf] %v519_v27 }
  0x78   : > { %522 = vst [vmem:[%s9051_s8 + $0x270] sm:$0xf] %v521_v28  ;;  %524 = vst [vmem:[%s9051_s8 + $0x274] sm:$0xf] %v523_v29  ;;  %v525_v30 = vld [vmem:[%s9047_s7 + $0x9e0] sm:$0xf] }
  0x79   : > { %v527_v31 = vld [vmem:[%s9047_s7 + $0x9f0] sm:$0xf]  ;;  %v529_v32 = vld [vmem:[%s9047_s7 + $0xa00] sm:$0xf]  ;;  %526 = vst [vmem:[%s9051_s8 + $0x278] sm:$0xf] %v525_v30 }
  0x7a   : > { %528 = vst [vmem:[%s9051_s8 + $0x27c] sm:$0xf] %v527_v31  ;;  %530 = vst [vmem:[%s9051_s8 + $0x280] sm:$0xf] %v529_v32  ;;  %v531_v33 = vld [vmem:[%s9047_s7 + $0xa10] sm:$0xf] }
  0x7b   : > { %v533_v34 = vld [vmem:[%s9047_s7 + $0xa20] sm:$0xf]  ;;  %v535_v35 = vld [vmem:[%s9047_s7 + $0xa30] sm:$0xf]  ;;  %532 = vst [vmem:[%s9051_s8 + $0x284] sm:$0xf] %v531_v33 }
  0x7c   : > { %534 = vst [vmem:[%s9051_s8 + $0x288] sm:$0xf] %v533_v34  ;;  %536 = vst [vmem:[%s9051_s8 + $0x28c] sm:$0xf] %v535_v35  ;;  %v537_v36 = vld [vmem:[%s9047_s7 + $0xa40] sm:$0xf] }
  0x7d   : > { %v539_v37 = vld [vmem:[%s9047_s7 + $0xa50] sm:$0xf]  ;;  %v541_v38 = vld [vmem:[%s9047_s7 + $0xa60] sm:$0xf]  ;;  %538 = vst [vmem:[%s9051_s8 + $0x290] sm:$0xf] %v537_v36 }
  0x7e   : > { %540 = vst [vmem:[%s9051_s8 + $0x294] sm:$0xf] %v539_v37  ;;  %542 = vst [vmem:[%s9051_s8 + $0x298] sm:$0xf] %v541_v38  ;;  %v543_v39 = vld [vmem:[%s9047_s7 + $0xa70] sm:$0xf] }
  0x7f   : > { %v545_v40 = vld [vmem:[%s9047_s7 + $0xa80] sm:$0xf]  ;;  %v547_v41 = vld [vmem:[%s9047_s7 + $0xa90] sm:$0xf]  ;;  %544 = vst [vmem:[%s9051_s8 + $0x29c] sm:$0xf] %v543_v39 }
  0x80   : > { %546 = vst [vmem:[%s9051_s8 + $0x2a0] sm:$0xf] %v545_v40  ;;  %548 = vst [vmem:[%s9051_s8 + $0x2a4] sm:$0xf] %v547_v41  ;;  %v549_v42 = vld [vmem:[%s9047_s7 + $0xaa0] sm:$0xf] }
  0x81   : > { %v551_v43 = vld [vmem:[%s9047_s7 + $0xab0] sm:$0xf]  ;;  %v553_v44 = vld [vmem:[%s9047_s7 + $0xac0] sm:$0xf]  ;;  %550 = vst [vmem:[%s9051_s8 + $0x2a8] sm:$0xf] %v549_v42 }
  0x82   : > { %552 = vst [vmem:[%s9051_s8 + $0x2ac] sm:$0xf] %v551_v43  ;;  %554 = vst [vmem:[%s9051_s8 + $0x2b0] sm:$0xf] %v553_v44  ;;  %v555_v45 = vld [vmem:[%s9047_s7 + $0xad0] sm:$0xf] }
  0x83   : > { %v557_v46 = vld [vmem:[%s9047_s7 + $0xae0] sm:$0xf]  ;;  %v559_v47 = vld [vmem:[%s9047_s7 + $0xaf0] sm:$0xf]  ;;  %556 = vst [vmem:[%s9051_s8 + $0x2b4] sm:$0xf] %v555_v45 }
  0x84   : > { %558 = vst [vmem:[%s9051_s8 + $0x2b8] sm:$0xf] %v557_v46  ;;  %560 = vst [vmem:[%s9051_s8 + $0x2bc] sm:$0xf] %v559_v47  ;;  %v561_v48 = vld [vmem:[%s9047_s7 + $0xb00] sm:$0xf] }
  0x85   : > { %v563_v49 = vld [vmem:[%s9047_s7 + $0xb10] sm:$0xf]  ;;  %v565_v50 = vld [vmem:[%s9047_s7 + $0xb20] sm:$0xf]  ;;  %562 = vst [vmem:[%s9051_s8 + $0x2c0] sm:$0xf] %v561_v48 }
  0x86   : > { %564 = vst [vmem:[%s9051_s8 + $0x2c4] sm:$0xf] %v563_v49  ;;  %566 = vst [vmem:[%s9051_s8 + $0x2c8] sm:$0xf] %v565_v50  ;;  %v567_v51 = vld [vmem:[%s9047_s7 + $0xb30] sm:$0xf] }
  0x87   : > { %v569_v52 = vld [vmem:[%s9047_s7 + $0xb40] sm:$0xf]  ;;  %v571_v53 = vld [vmem:[%s9047_s7 + $0xb50] sm:$0xf]  ;;  %568 = vst [vmem:[%s9051_s8 + $0x2cc] sm:$0xf] %v567_v51 }
  0x88   : > { %570 = vst [vmem:[%s9051_s8 + $0x2d0] sm:$0xf] %v569_v52  ;;  %572 = vst [vmem:[%s9051_s8 + $0x2d4] sm:$0xf] %v571_v53  ;;  %v573_v54 = vld [vmem:[%s9047_s7 + $0xb60] sm:$0xf] }
  0x89   : > { %v575_v55 = vld [vmem:[%s9047_s7 + $0xb70] sm:$0xf]  ;;  %v577_v56 = vld [vmem:[%s9047_s7 + $0xb80] sm:$0xf]  ;;  %574 = vst [vmem:[%s9051_s8 + $0x2d8] sm:$0xf] %v573_v54 }
  0x8a   : > { %576 = vst [vmem:[%s9051_s8 + $0x2dc] sm:$0xf] %v575_v55  ;;  %578 = vst [vmem:[%s9051_s8 + $0x2e0] sm:$0xf] %v577_v56  ;;  %v579_v57 = vld [vmem:[%s9047_s7 + $0xb90] sm:$0xf] }
  0x8b   : > { %v581_v58 = vld [vmem:[%s9047_s7 + $0xba0] sm:$0xf]  ;;  %v583_v59 = vld [vmem:[%s9047_s7 + $0xbb0] sm:$0xf]  ;;  %580 = vst [vmem:[%s9051_s8 + $0x2e4] sm:$0xf] %v579_v57 }
  0x8c   : > { %582 = vst [vmem:[%s9051_s8 + $0x2e8] sm:$0xf] %v581_v58  ;;  %584 = vst [vmem:[%s9051_s8 + $0x2ec] sm:$0xf] %v583_v59  ;;  %v585_v60 = vld [vmem:[%s9047_s7 + $0xbc0] sm:$0xf] }
  0x8d   : > { %v587_v61 = vld [vmem:[%s9047_s7 + $0xbd0] sm:$0xf]  ;;  %v589_v62 = vld [vmem:[%s9047_s7 + $0xbe0] sm:$0xf]  ;;  %586 = vst [vmem:[%s9051_s8 + $0x2f0] sm:$0xf] %v585_v60 }
  0x8e   : > { %588 = vst [vmem:[%s9051_s8 + $0x2f4] sm:$0xf] %v587_v61  ;;  %590 = vst [vmem:[%s9051_s8 + $0x2f8] sm:$0xf] %v589_v62  ;;  %v591_v63 = vld [vmem:[%s9047_s7 + $0xbf0] sm:$0xf] }
  0x8f   : > { %v593_v0 = vld [vmem:[%s9047_s7 + $0xc00] sm:$0xf]  ;;  %v595_v1 = vld [vmem:[%s9047_s7 + $0xc10] sm:$0xf]  ;;  %592 = vst [vmem:[%s9051_s8 + $0x2fc] sm:$0xf] %v591_v63 }
  0x90   : > { %594 = vst [vmem:[%s9051_s8 + $0x300] sm:$0xf] %v593_v0  ;;  %596 = vst [vmem:[%s9051_s8 + $0x304] sm:$0xf] %v595_v1  ;;  %v597_v2 = vld [vmem:[%s9047_s7 + $0xc20] sm:$0xf] }
  0x91   : > { %v599_v3 = vld [vmem:[%s9047_s7 + $0xc30] sm:$0xf]  ;;  %v601_v4 = vld [vmem:[%s9047_s7 + $0xc40] sm:$0xf]  ;;  %598 = vst [vmem:[%s9051_s8 + $0x308] sm:$0xf] %v597_v2 }
  0x92   : > { %600 = vst [vmem:[%s9051_s8 + $0x30c] sm:$0xf] %v599_v3  ;;  %602 = vst [vmem:[%s9051_s8 + $0x310] sm:$0xf] %v601_v4  ;;  %v603_v5 = vld [vmem:[%s9047_s7 + $0xc50] sm:$0xf] }
  0x93   : > { %v605_v6 = vld [vmem:[%s9047_s7 + $0xc60] sm:$0xf]  ;;  %v607_v7 = vld [vmem:[%s9047_s7 + $0xc70] sm:$0xf]  ;;  %604 = vst [vmem:[%s9051_s8 + $0x314] sm:$0xf] %v603_v5 }
  0x94   : > { %606 = vst [vmem:[%s9051_s8 + $0x318] sm:$0xf] %v605_v6  ;;  %608 = vst [vmem:[%s9051_s8 + $0x31c] sm:$0xf] %v607_v7  ;;  %v609_v8 = vld [vmem:[%s9047_s7 + $0xc80] sm:$0xf] }
  0x95   : > { %v611_v9 = vld [vmem:[%s9047_s7 + $0xc90] sm:$0xf]  ;;  %v613_v10 = vld [vmem:[%s9047_s7 + $0xca0] sm:$0xf]  ;;  %610 = vst [vmem:[%s9051_s8 + $0x320] sm:$0xf] %v609_v8 }
  0x96   : > { %612 = vst [vmem:[%s9051_s8 + $0x324] sm:$0xf] %v611_v9  ;;  %614 = vst [vmem:[%s9051_s8 + $0x328] sm:$0xf] %v613_v10  ;;  %v615_v11 = vld [vmem:[%s9047_s7 + $0xcb0] sm:$0xf] }
  0x97   : > { %v617_v12 = vld [vmem:[%s9047_s7 + $0xcc0] sm:$0xf]  ;;  %v619_v13 = vld [vmem:[%s9047_s7 + $0xcd0] sm:$0xf]  ;;  %616 = vst [vmem:[%s9051_s8 + $0x32c] sm:$0xf] %v615_v11 }
  0x98   : > { %618 = vst [vmem:[%s9051_s8 + $0x330] sm:$0xf] %v617_v12  ;;  %620 = vst [vmem:[%s9051_s8 + $0x334] sm:$0xf] %v619_v13  ;;  %v621_v14 = vld [vmem:[%s9047_s7 + $0xce0] sm:$0xf] }
  0x99   : > { %v623_v15 = vld [vmem:[%s9047_s7 + $0xcf0] sm:$0xf]  ;;  %v625_v16 = vld [vmem:[%s9047_s7 + $0xd00] sm:$0xf]  ;;  %622 = vst [vmem:[%s9051_s8 + $0x338] sm:$0xf] %v621_v14 }
  0x9a   : > { %624 = vst [vmem:[%s9051_s8 + $0x33c] sm:$0xf] %v623_v15  ;;  %626 = vst [vmem:[%s9051_s8 + $0x340] sm:$0xf] %v625_v16  ;;  %v627_v17 = vld [vmem:[%s9047_s7 + $0xd10] sm:$0xf] }
  0x9b   : > { %v629_v18 = vld [vmem:[%s9047_s7 + $0xd20] sm:$0xf]  ;;  %v631_v19 = vld [vmem:[%s9047_s7 + $0xd30] sm:$0xf]  ;;  %628 = vst [vmem:[%s9051_s8 + $0x344] sm:$0xf] %v627_v17 }
  0x9c   : > { %630 = vst [vmem:[%s9051_s8 + $0x348] sm:$0xf] %v629_v18  ;;  %632 = vst [vmem:[%s9051_s8 + $0x34c] sm:$0xf] %v631_v19  ;;  %v633_v20 = vld [vmem:[%s9047_s7 + $0xd40] sm:$0xf] }
  0x9d   : > { %v635_v21 = vld [vmem:[%s9047_s7 + $0xd50] sm:$0xf]  ;;  %v637_v22 = vld [vmem:[%s9047_s7 + $0xd60] sm:$0xf]  ;;  %634 = vst [vmem:[%s9051_s8 + $0x350] sm:$0xf] %v633_v20 }
  0x9e   : > { %636 = vst [vmem:[%s9051_s8 + $0x354] sm:$0xf] %v635_v21  ;;  %638 = vst [vmem:[%s9051_s8 + $0x358] sm:$0xf] %v637_v22  ;;  %v639_v23 = vld [vmem:[%s9047_s7 + $0xd70] sm:$0xf] }
  0x9f   : > { %v641_v24 = vld [vmem:[%s9047_s7 + $0xd80] sm:$0xf]  ;;  %v643_v25 = vld [vmem:[%s9047_s7 + $0xd90] sm:$0xf]  ;;  %640 = vst [vmem:[%s9051_s8 + $0x35c] sm:$0xf] %v639_v23 }
  0xa0   : > { %642 = vst [vmem:[%s9051_s8 + $0x360] sm:$0xf] %v641_v24  ;;  %644 = vst [vmem:[%s9051_s8 + $0x364] sm:$0xf] %v643_v25  ;;  %v645_v26 = vld [vmem:[%s9047_s7 + $0xda0] sm:$0xf] }
  0xa1   : > { %v647_v27 = vld [vmem:[%s9047_s7 + $0xdb0] sm:$0xf]  ;;  %v649_v28 = vld [vmem:[%s9047_s7 + $0xdc0] sm:$0xf]  ;;  %646 = vst [vmem:[%s9051_s8 + $0x368] sm:$0xf] %v645_v26 }
  0xa2   : > { %648 = vst [vmem:[%s9051_s8 + $0x36c] sm:$0xf] %v647_v27  ;;  %650 = vst [vmem:[%s9051_s8 + $0x370] sm:$0xf] %v649_v28  ;;  %v651_v29 = vld [vmem:[%s9047_s7 + $0xdd0] sm:$0xf] }
  0xa3   : > { %v653_v30 = vld [vmem:[%s9047_s7 + $0xde0] sm:$0xf]  ;;  %v655_v31 = vld [vmem:[%s9047_s7 + $0xdf0] sm:$0xf]  ;;  %652 = vst [vmem:[%s9051_s8 + $0x374] sm:$0xf] %v651_v29 }
  0xa4   : > { %654 = vst [vmem:[%s9051_s8 + $0x378] sm:$0xf] %v653_v30  ;;  %656 = vst [vmem:[%s9051_s8 + $0x37c] sm:$0xf] %v655_v31  ;;  %v657_v32 = vld [vmem:[%s9047_s7 + $0xe00] sm:$0xf] }
  0xa5   : > { %v659_v33 = vld [vmem:[%s9047_s7 + $0xe10] sm:$0xf]  ;;  %v661_v34 = vld [vmem:[%s9047_s7 + $0xe20] sm:$0xf]  ;;  %658 = vst [vmem:[%s9051_s8 + $0x380] sm:$0xf] %v657_v32 }
  0xa6   : > { %660 = vst [vmem:[%s9051_s8 + $0x384] sm:$0xf] %v659_v33  ;;  %662 = vst [vmem:[%s9051_s8 + $0x388] sm:$0xf] %v661_v34  ;;  %v663_v35 = vld [vmem:[%s9047_s7 + $0xe30] sm:$0xf] }
  0xa7   : > { %v665_v36 = vld [vmem:[%s9047_s7 + $0xe40] sm:$0xf]  ;;  %v667_v37 = vld [vmem:[%s9047_s7 + $0xe50] sm:$0xf]  ;;  %664 = vst [vmem:[%s9051_s8 + $0x38c] sm:$0xf] %v663_v35 }
  0xa8   : > { %666 = vst [vmem:[%s9051_s8 + $0x390] sm:$0xf] %v665_v36  ;;  %668 = vst [vmem:[%s9051_s8 + $0x394] sm:$0xf] %v667_v37  ;;  %v669_v38 = vld [vmem:[%s9047_s7 + $0xe60] sm:$0xf] }
  0xa9   : > { %v671_v39 = vld [vmem:[%s9047_s7 + $0xe70] sm:$0xf]  ;;  %v673_v40 = vld [vmem:[%s9047_s7 + $0xe80] sm:$0xf]  ;;  %670 = vst [vmem:[%s9051_s8 + $0x398] sm:$0xf] %v669_v38 }
  0xaa   : > { %672 = vst [vmem:[%s9051_s8 + $0x39c] sm:$0xf] %v671_v39  ;;  %674 = vst [vmem:[%s9051_s8 + $0x3a0] sm:$0xf] %v673_v40  ;;  %v675_v41 = vld [vmem:[%s9047_s7 + $0xe90] sm:$0xf] }
  0xab   : > { %v677_v42 = vld [vmem:[%s9047_s7 + $0xea0] sm:$0xf]  ;;  %v679_v43 = vld [vmem:[%s9047_s7 + $0xeb0] sm:$0xf]  ;;  %676 = vst [vmem:[%s9051_s8 + $0x3a4] sm:$0xf] %v675_v41 }
  0xac   : > { %678 = vst [vmem:[%s9051_s8 + $0x3a8] sm:$0xf] %v677_v42  ;;  %680 = vst [vmem:[%s9051_s8 + $0x3ac] sm:$0xf] %v679_v43  ;;  %v681_v44 = vld [vmem:[%s9047_s7 + $0xec0] sm:$0xf] }
  0xad   : > { %v683_v45 = vld [vmem:[%s9047_s7 + $0xed0] sm:$0xf]  ;;  %v685_v46 = vld [vmem:[%s9047_s7 + $0xee0] sm:$0xf]  ;;  %682 = vst [vmem:[%s9051_s8 + $0x3b0] sm:$0xf] %v681_v44 }
  0xae   : > { %684 = vst [vmem:[%s9051_s8 + $0x3b4] sm:$0xf] %v683_v45  ;;  %686 = vst [vmem:[%s9051_s8 + $0x3b8] sm:$0xf] %v685_v46  ;;  %v687_v47 = vld [vmem:[%s9047_s7 + $0xef0] sm:$0xf] }
  0xaf   : > { %v689_v48 = vld [vmem:[%s9047_s7 + $0xf00] sm:$0xf]  ;;  %v691_v49 = vld [vmem:[%s9047_s7 + $0xf10] sm:$0xf]  ;;  %688 = vst [vmem:[%s9051_s8 + $0x3bc] sm:$0xf] %v687_v47 }
  0xb0   : > { %690 = vst [vmem:[%s9051_s8 + $0x3c0] sm:$0xf] %v689_v48  ;;  %692 = vst [vmem:[%s9051_s8 + $0x3c4] sm:$0xf] %v691_v49  ;;  %v693_v50 = vld [vmem:[%s9047_s7 + $0xf20] sm:$0xf] }
  0xb1   : > { %v695_v51 = vld [vmem:[%s9047_s7 + $0xf30] sm:$0xf]  ;;  %v697_v52 = vld [vmem:[%s9047_s7 + $0xf40] sm:$0xf]  ;;  %694 = vst [vmem:[%s9051_s8 + $0x3c8] sm:$0xf] %v693_v50 }
  0xb2   : > { %696 = vst [vmem:[%s9051_s8 + $0x3cc] sm:$0xf] %v695_v51  ;;  %698 = vst [vmem:[%s9051_s8 + $0x3d0] sm:$0xf] %v697_v52  ;;  %v699_v53 = vld [vmem:[%s9047_s7 + $0xf50] sm:$0xf] }
  0xb3   : > { %v701_v54 = vld [vmem:[%s9047_s7 + $0xf60] sm:$0xf]  ;;  %v703_v55 = vld [vmem:[%s9047_s7 + $0xf70] sm:$0xf]  ;;  %700 = vst [vmem:[%s9051_s8 + $0x3d4] sm:$0xf] %v699_v53 }
  0xb4   : > { %702 = vst [vmem:[%s9051_s8 + $0x3d8] sm:$0xf] %v701_v54  ;;  %704 = vst [vmem:[%s9051_s8 + $0x3dc] sm:$0xf] %v703_v55  ;;  %v705_v56 = vld [vmem:[%s9047_s7 + $0xf80] sm:$0xf] }
  0xb5   : > { %v707_v57 = vld [vmem:[%s9047_s7 + $0xf90] sm:$0xf]  ;;  %v709_v58 = vld [vmem:[%s9047_s7 + $0xfa0] sm:$0xf]  ;;  %706 = vst [vmem:[%s9051_s8 + $0x3e0] sm:$0xf] %v705_v56 }
  0xb6   : > { %708 = vst [vmem:[%s9051_s8 + $0x3e4] sm:$0xf] %v707_v57  ;;  %710 = vst [vmem:[%s9051_s8 + $0x3e8] sm:$0xf] %v709_v58  ;;  %v711_v59 = vld [vmem:[%s9047_s7 + $0xfb0] sm:$0xf] }
  0xb7   : > { %v713_v60 = vld [vmem:[%s9047_s7 + $0xfc0] sm:$0xf]  ;;  %v715_v61 = vld [vmem:[%s9047_s7 + $0xfd0] sm:$0xf]  ;;  %712 = vst [vmem:[%s9051_s8 + $0x3ec] sm:$0xf] %v711_v59 }
  0xb8   : > { %714 = vst [vmem:[%s9051_s8 + $0x3f0] sm:$0xf] %v713_v60  ;;  %716 = vst [vmem:[%s9051_s8 + $0x3f4] sm:$0xf] %v715_v61  ;;  %v717_v62 = vld [vmem:[%s9047_s7 + $0xfe0] sm:$0xf] }
  0xb9   : > { %v719_v63 = vld [vmem:[%s9047_s7 + $0xff0] sm:$0xf]  ;;  %v721_v0 = vld [vmem:[%s9047_s7 + $0x1000] sm:$0xf]  ;;  %718 = vst [vmem:[%s9051_s8 + $0x3f8] sm:$0xf] %v717_v62 }
  0xba   : > { %720 = vst [vmem:[%s9051_s8 + $0x3fc] sm:$0xf] %v719_v63  ;;  %722 = vst [vmem:[%s9051_s8 + $0x400] sm:$0xf] %v721_v0  ;;  %v723_v1 = vld [vmem:[%s9047_s7 + $0x1010] sm:$0xf] }
  0xbb   : > { %v725_v2 = vld [vmem:[%s9047_s7 + $0x1020] sm:$0xf]  ;;  %v727_v3 = vld [vmem:[%s9047_s7 + $0x1030] sm:$0xf]  ;;  %724 = vst [vmem:[%s9051_s8 + $0x404] sm:$0xf] %v723_v1 }
  0xbc   : > { %726 = vst [vmem:[%s9051_s8 + $0x408] sm:$0xf] %v725_v2  ;;  %728 = vst [vmem:[%s9051_s8 + $0x40c] sm:$0xf] %v727_v3  ;;  %v729_v4 = vld [vmem:[%s9047_s7 + $0x1040] sm:$0xf] }
  0xbd   : > { %v731_v5 = vld [vmem:[%s9047_s7 + $0x1050] sm:$0xf]  ;;  %v733_v6 = vld [vmem:[%s9047_s7 + $0x1060] sm:$0xf]  ;;  %730 = vst [vmem:[%s9051_s8 + $0x410] sm:$0xf] %v729_v4 }
  0xbe   : > { %732 = vst [vmem:[%s9051_s8 + $0x414] sm:$0xf] %v731_v5  ;;  %734 = vst [vmem:[%s9051_s8 + $0x418] sm:$0xf] %v733_v6  ;;  %v735_v7 = vld [vmem:[%s9047_s7 + $0x1070] sm:$0xf] }
  0xbf   : > { %v737_v8 = vld [vmem:[%s9047_s7 + $0x1080] sm:$0xf]  ;;  %v739_v9 = vld [vmem:[%s9047_s7 + $0x1090] sm:$0xf]  ;;  %736 = vst [vmem:[%s9051_s8 + $0x41c] sm:$0xf] %v735_v7 }
  0xc0   : > { %738 = vst [vmem:[%s9051_s8 + $0x420] sm:$0xf] %v737_v8  ;;  %740 = vst [vmem:[%s9051_s8 + $0x424] sm:$0xf] %v739_v9  ;;  %v741_v10 = vld [vmem:[%s9047_s7 + $0x10a0] sm:$0xf] }
  0xc1   : > { %v743_v11 = vld [vmem:[%s9047_s7 + $0x10b0] sm:$0xf]  ;;  %v745_v12 = vld [vmem:[%s9047_s7 + $0x10c0] sm:$0xf]  ;;  %742 = vst [vmem:[%s9051_s8 + $0x428] sm:$0xf] %v741_v10 }
  0xc2   : > { %744 = vst [vmem:[%s9051_s8 + $0x42c] sm:$0xf] %v743_v11  ;;  %746 = vst [vmem:[%s9051_s8 + $0x430] sm:$0xf] %v745_v12  ;;  %v747_v13 = vld [vmem:[%s9047_s7 + $0x10d0] sm:$0xf] }
  0xc3   : > { %v749_v14 = vld [vmem:[%s9047_s7 + $0x10e0] sm:$0xf]  ;;  %v751_v15 = vld [vmem:[%s9047_s7 + $0x10f0] sm:$0xf]  ;;  %748 = vst [vmem:[%s9051_s8 + $0x434] sm:$0xf] %v747_v13 }
  0xc4   : > { %750 = vst [vmem:[%s9051_s8 + $0x438] sm:$0xf] %v749_v14  ;;  %752 = vst [vmem:[%s9051_s8 + $0x43c] sm:$0xf] %v751_v15  ;;  %v753_v16 = vld [vmem:[%s9047_s7 + $0x1100] sm:$0xf] }
  0xc5   : > { %v755_v17 = vld [vmem:[%s9047_s7 + $0x1110] sm:$0xf]  ;;  %v757_v18 = vld [vmem:[%s9047_s7 + $0x1120] sm:$0xf]  ;;  %754 = vst [vmem:[%s9051_s8 + $0x440] sm:$0xf] %v753_v16 }
  0xc6   : > { %756 = vst [vmem:[%s9051_s8 + $0x444] sm:$0xf] %v755_v17  ;;  %758 = vst [vmem:[%s9051_s8 + $0x448] sm:$0xf] %v757_v18  ;;  %v759_v19 = vld [vmem:[%s9047_s7 + $0x1130] sm:$0xf] }
  0xc7   : > { %v761_v20 = vld [vmem:[%s9047_s7 + $0x1140] sm:$0xf]  ;;  %v763_v21 = vld [vmem:[%s9047_s7 + $0x1150] sm:$0xf]  ;;  %760 = vst [vmem:[%s9051_s8 + $0x44c] sm:$0xf] %v759_v19 }
  0xc8   : > { %762 = vst [vmem:[%s9051_s8 + $0x450] sm:$0xf] %v761_v20  ;;  %764 = vst [vmem:[%s9051_s8 + $0x454] sm:$0xf] %v763_v21  ;;  %v765_v22 = vld [vmem:[%s9047_s7 + $0x1160] sm:$0xf] }
  0xc9   : > { %v767_v23 = vld [vmem:[%s9047_s7 + $0x1170] sm:$0xf]  ;;  %v769_v24 = vld [vmem:[%s9047_s7 + $0x1180] sm:$0xf]  ;;  %766 = vst [vmem:[%s9051_s8 + $0x458] sm:$0xf] %v765_v22 }
  0xca   : > { %768 = vst [vmem:[%s9051_s8 + $0x45c] sm:$0xf] %v767_v23  ;;  %770 = vst [vmem:[%s9051_s8 + $0x460] sm:$0xf] %v769_v24  ;;  %v771_v25 = vld [vmem:[%s9047_s7 + $0x1190] sm:$0xf] }
  0xcb   : > { %v773_v26 = vld [vmem:[%s9047_s7 + $0x11a0] sm:$0xf]  ;;  %v775_v27 = vld [vmem:[%s9047_s7 + $0x11b0] sm:$0xf]  ;;  %772 = vst [vmem:[%s9051_s8 + $0x464] sm:$0xf] %v771_v25 }
  0xcc   : > { %774 = vst [vmem:[%s9051_s8 + $0x468] sm:$0xf] %v773_v26  ;;  %776 = vst [vmem:[%s9051_s8 + $0x46c] sm:$0xf] %v775_v27  ;;  %v777_v28 = vld [vmem:[%s9047_s7 + $0x11c0] sm:$0xf] }
  0xcd   : > { %v779_v29 = vld [vmem:[%s9047_s7 + $0x11d0] sm:$0xf]  ;;  %v781_v30 = vld [vmem:[%s9047_s7 + $0x11e0] sm:$0xf]  ;;  %778 = vst [vmem:[%s9051_s8 + $0x470] sm:$0xf] %v777_v28 }
  0xce   : > { %780 = vst [vmem:[%s9051_s8 + $0x474] sm:$0xf] %v779_v29  ;;  %782 = vst [vmem:[%s9051_s8 + $0x478] sm:$0xf] %v781_v30  ;;  %v783_v31 = vld [vmem:[%s9047_s7 + $0x11f0] sm:$0xf] }
  0xcf   : > { %v785_v32 = vld [vmem:[%s9047_s7 + $0x1200] sm:$0xf]  ;;  %v787_v33 = vld [vmem:[%s9047_s7 + $0x1210] sm:$0xf]  ;;  %784 = vst [vmem:[%s9051_s8 + $0x47c] sm:$0xf] %v783_v31 }
  0xd0   : > { %786 = vst [vmem:[%s9051_s8 + $0x480] sm:$0xf] %v785_v32  ;;  %788 = vst [vmem:[%s9051_s8 + $0x484] sm:$0xf] %v787_v33  ;;  %v789_v34 = vld [vmem:[%s9047_s7 + $0x1220] sm:$0xf] }
  0xd1   : > { %v791_v35 = vld [vmem:[%s9047_s7 + $0x1230] sm:$0xf]  ;;  %v793_v36 = vld [vmem:[%s9047_s7 + $0x1240] sm:$0xf]  ;;  %790 = vst [vmem:[%s9051_s8 + $0x488] sm:$0xf] %v789_v34 }
  0xd2   : > { %792 = vst [vmem:[%s9051_s8 + $0x48c] sm:$0xf] %v791_v35  ;;  %794 = vst [vmem:[%s9051_s8 + $0x490] sm:$0xf] %v793_v36  ;;  %v795_v37 = vld [vmem:[%s9047_s7 + $0x1250] sm:$0xf] }
  0xd3   : > { %v797_v38 = vld [vmem:[%s9047_s7 + $0x1260] sm:$0xf]  ;;  %v799_v39 = vld [vmem:[%s9047_s7 + $0x1270] sm:$0xf]  ;;  %796 = vst [vmem:[%s9051_s8 + $0x494] sm:$0xf] %v795_v37 }
  0xd4   : > { %798 = vst [vmem:[%s9051_s8 + $0x498] sm:$0xf] %v797_v38  ;;  %800 = vst [vmem:[%s9051_s8 + $0x49c] sm:$0xf] %v799_v39  ;;  %v801_v40 = vld [vmem:[%s9047_s7 + $0x1280] sm:$0xf] }
  0xd5   : > { %v803_v41 = vld [vmem:[%s9047_s7 + $0x1290] sm:$0xf]  ;;  %v805_v42 = vld [vmem:[%s9047_s7 + $0x12a0] sm:$0xf]  ;;  %802 = vst [vmem:[%s9051_s8 + $0x4a0] sm:$0xf] %v801_v40 }
  0xd6   : > { %804 = vst [vmem:[%s9051_s8 + $0x4a4] sm:$0xf] %v803_v41  ;;  %806 = vst [vmem:[%s9051_s8 + $0x4a8] sm:$0xf] %v805_v42  ;;  %v807_v43 = vld [vmem:[%s9047_s7 + $0x12b0] sm:$0xf] }
  0xd7   : > { %v809_v44 = vld [vmem:[%s9047_s7 + $0x12c0] sm:$0xf]  ;;  %v811_v45 = vld [vmem:[%s9047_s7 + $0x12d0] sm:$0xf]  ;;  %808 = vst [vmem:[%s9051_s8 + $0x4ac] sm:$0xf] %v807_v43 }
  0xd8   : > { %810 = vst [vmem:[%s9051_s8 + $0x4b0] sm:$0xf] %v809_v44  ;;  %812 = vst [vmem:[%s9051_s8 + $0x4b4] sm:$0xf] %v811_v45  ;;  %v813_v46 = vld [vmem:[%s9047_s7 + $0x12e0] sm:$0xf] }
  0xd9   : > { %v815_v47 = vld [vmem:[%s9047_s7 + $0x12f0] sm:$0xf]  ;;  %v817_v48 = vld [vmem:[%s9047_s7 + $0x1300] sm:$0xf]  ;;  %814 = vst [vmem:[%s9051_s8 + $0x4b8] sm:$0xf] %v813_v46 }
  0xda   : > { %816 = vst [vmem:[%s9051_s8 + $0x4bc] sm:$0xf] %v815_v47  ;;  %818 = vst [vmem:[%s9051_s8 + $0x4c0] sm:$0xf] %v817_v48  ;;  %v819_v49 = vld [vmem:[%s9047_s7 + $0x1310] sm:$0xf] }
  0xdb   : > { %v821_v50 = vld [vmem:[%s9047_s7 + $0x1320] sm:$0xf]  ;;  %v823_v51 = vld [vmem:[%s9047_s7 + $0x1330] sm:$0xf]  ;;  %820 = vst [vmem:[%s9051_s8 + $0x4c4] sm:$0xf] %v819_v49 }
  0xdc   : > { %822 = vst [vmem:[%s9051_s8 + $0x4c8] sm:$0xf] %v821_v50  ;;  %824 = vst [vmem:[%s9051_s8 + $0x4cc] sm:$0xf] %v823_v51  ;;  %v825_v52 = vld [vmem:[%s9047_s7 + $0x1340] sm:$0xf] }
  0xdd   : > { %v827_v53 = vld [vmem:[%s9047_s7 + $0x1350] sm:$0xf]  ;;  %v829_v54 = vld [vmem:[%s9047_s7 + $0x1360] sm:$0xf]  ;;  %826 = vst [vmem:[%s9051_s8 + $0x4d0] sm:$0xf] %v825_v52 }
  0xde   : > { %828 = vst [vmem:[%s9051_s8 + $0x4d4] sm:$0xf] %v827_v53  ;;  %830 = vst [vmem:[%s9051_s8 + $0x4d8] sm:$0xf] %v829_v54  ;;  %v831_v55 = vld [vmem:[%s9047_s7 + $0x1370] sm:$0xf] }
  0xdf   : > { %v833_v56 = vld [vmem:[%s9047_s7 + $0x1380] sm:$0xf]  ;;  %v835_v57 = vld [vmem:[%s9047_s7 + $0x1390] sm:$0xf]  ;;  %832 = vst [vmem:[%s9051_s8 + $0x4dc] sm:$0xf] %v831_v55 }
  0xe0   : > { %834 = vst [vmem:[%s9051_s8 + $0x4e0] sm:$0xf] %v833_v56  ;;  %836 = vst [vmem:[%s9051_s8 + $0x4e4] sm:$0xf] %v835_v57  ;;  %v837_v58 = vld [vmem:[%s9047_s7 + $0x13a0] sm:$0xf] }
  0xe1   : > { %v839_v59 = vld [vmem:[%s9047_s7 + $0x13b0] sm:$0xf]  ;;  %v841_v60 = vld [vmem:[%s9047_s7 + $0x13c0] sm:$0xf]  ;;  %838 = vst [vmem:[%s9051_s8 + $0x4e8] sm:$0xf] %v837_v58 }
  0xe2   : > { %840 = vst [vmem:[%s9051_s8 + $0x4ec] sm:$0xf] %v839_v59  ;;  %842 = vst [vmem:[%s9051_s8 + $0x4f0] sm:$0xf] %v841_v60  ;;  %v843_v61 = vld [vmem:[%s9047_s7 + $0x13d0] sm:$0xf] }
  0xe3   : > { %v845_v62 = vld [vmem:[%s9047_s7 + $0x13e0] sm:$0xf]  ;;  %v847_v63 = vld [vmem:[%s9047_s7 + $0x13f0] sm:$0xf]  ;;  %844 = vst [vmem:[%s9051_s8 + $0x4f4] sm:$0xf] %v843_v61 }
  0xe4   : > { %846 = vst [vmem:[%s9051_s8 + $0x4f8] sm:$0xf] %v845_v62  ;;  %848 = vst [vmem:[%s9051_s8 + $0x4fc] sm:$0xf] %v847_v63  ;;  %v849_v0 = vld [vmem:[%s9047_s7 + $0x1400] sm:$0xf] }
  0xe5   : > { %v851_v1 = vld [vmem:[%s9047_s7 + $0x1410] sm:$0xf]  ;;  %v853_v2 = vld [vmem:[%s9047_s7 + $0x1420] sm:$0xf]  ;;  %850 = vst [vmem:[%s9051_s8 + $0x500] sm:$0xf] %v849_v0 }
  0xe6   : > { %852 = vst [vmem:[%s9051_s8 + $0x504] sm:$0xf] %v851_v1  ;;  %854 = vst [vmem:[%s9051_s8 + $0x508] sm:$0xf] %v853_v2  ;;  %v855_v3 = vld [vmem:[%s9047_s7 + $0x1430] sm:$0xf] }
  0xe7   : > { %v857_v4 = vld [vmem:[%s9047_s7 + $0x1440] sm:$0xf]  ;;  %v859_v5 = vld [vmem:[%s9047_s7 + $0x1450] sm:$0xf]  ;;  %856 = vst [vmem:[%s9051_s8 + $0x50c] sm:$0xf] %v855_v3 }
  0xe8   : > { %858 = vst [vmem:[%s9051_s8 + $0x510] sm:$0xf] %v857_v4  ;;  %860 = vst [vmem:[%s9051_s8 + $0x514] sm:$0xf] %v859_v5  ;;  %v861_v6 = vld [vmem:[%s9047_s7 + $0x1460] sm:$0xf] }
  0xe9   : > { %v863_v7 = vld [vmem:[%s9047_s7 + $0x1470] sm:$0xf]  ;;  %v865_v8 = vld [vmem:[%s9047_s7 + $0x1480] sm:$0xf]  ;;  %862 = vst [vmem:[%s9051_s8 + $0x518] sm:$0xf] %v861_v6 }
  0xea   : > { %864 = vst [vmem:[%s9051_s8 + $0x51c] sm:$0xf] %v863_v7  ;;  %866 = vst [vmem:[%s9051_s8 + $0x520] sm:$0xf] %v865_v8  ;;  %v867_v9 = vld [vmem:[%s9047_s7 + $0x1490] sm:$0xf] }
  0xeb   : > { %v869_v10 = vld [vmem:[%s9047_s7 + $0x14a0] sm:$0xf]  ;;  %v871_v11 = vld [vmem:[%s9047_s7 + $0x14b0] sm:$0xf]  ;;  %868 = vst [vmem:[%s9051_s8 + $0x524] sm:$0xf] %v867_v9 }
  0xec   : > { %870 = vst [vmem:[%s9051_s8 + $0x528] sm:$0xf] %v869_v10  ;;  %872 = vst [vmem:[%s9051_s8 + $0x52c] sm:$0xf] %v871_v11  ;;  %v873_v12 = vld [vmem:[%s9047_s7 + $0x14c0] sm:$0xf] }
  0xed   : > { %v875_v13 = vld [vmem:[%s9047_s7 + $0x14d0] sm:$0xf]  ;;  %v877_v14 = vld [vmem:[%s9047_s7 + $0x14e0] sm:$0xf]  ;;  %874 = vst [vmem:[%s9051_s8 + $0x530] sm:$0xf] %v873_v12 }
  0xee   : > { %876 = vst [vmem:[%s9051_s8 + $0x534] sm:$0xf] %v875_v13  ;;  %878 = vst [vmem:[%s9051_s8 + $0x538] sm:$0xf] %v877_v14  ;;  %v879_v15 = vld [vmem:[%s9047_s7 + $0x14f0] sm:$0xf] }
  0xef   : > { %v881_v16 = vld [vmem:[%s9047_s7 + $0x1500] sm:$0xf]  ;;  %v883_v17 = vld [vmem:[%s9047_s7 + $0x1510] sm:$0xf]  ;;  %880 = vst [vmem:[%s9051_s8 + $0x53c] sm:$0xf] %v879_v15 }
  0xf0   : > { %882 = vst [vmem:[%s9051_s8 + $0x540] sm:$0xf] %v881_v16  ;;  %884 = vst [vmem:[%s9051_s8 + $0x544] sm:$0xf] %v883_v17  ;;  %v885_v18 = vld [vmem:[%s9047_s7 + $0x1520] sm:$0xf] }
  0xf1   : > { %v887_v19 = vld [vmem:[%s9047_s7 + $0x1530] sm:$0xf]  ;;  %v889_v20 = vld [vmem:[%s9047_s7 + $0x1540] sm:$0xf]  ;;  %886 = vst [vmem:[%s9051_s8 + $0x548] sm:$0xf] %v885_v18 }
  0xf2   : > { %888 = vst [vmem:[%s9051_s8 + $0x54c] sm:$0xf] %v887_v19  ;;  %890 = vst [vmem:[%s9051_s8 + $0x550] sm:$0xf] %v889_v20  ;;  %v891_v21 = vld [vmem:[%s9047_s7 + $0x1550] sm:$0xf] }
  0xf3   : > { %v893_v22 = vld [vmem:[%s9047_s7 + $0x1560] sm:$0xf]  ;;  %v895_v23 = vld [vmem:[%s9047_s7 + $0x1570] sm:$0xf]  ;;  %892 = vst [vmem:[%s9051_s8 + $0x554] sm:$0xf] %v891_v21 }
  0xf4   : > { %894 = vst [vmem:[%s9051_s8 + $0x558] sm:$0xf] %v893_v22  ;;  %896 = vst [vmem:[%s9051_s8 + $0x55c] sm:$0xf] %v895_v23  ;;  %v897_v24 = vld [vmem:[%s9047_s7 + $0x1580] sm:$0xf] }
  0xf5   : > { %v899_v25 = vld [vmem:[%s9047_s7 + $0x1590] sm:$0xf]  ;;  %v901_v26 = vld [vmem:[%s9047_s7 + $0x15a0] sm:$0xf]  ;;  %898 = vst [vmem:[%s9051_s8 + $0x560] sm:$0xf] %v897_v24 }
  0xf6   : > { %900 = vst [vmem:[%s9051_s8 + $0x564] sm:$0xf] %v899_v25  ;;  %902 = vst [vmem:[%s9051_s8 + $0x568] sm:$0xf] %v901_v26  ;;  %v903_v27 = vld [vmem:[%s9047_s7 + $0x15b0] sm:$0xf] }
  0xf7   : > { %v905_v28 = vld [vmem:[%s9047_s7 + $0x15c0] sm:$0xf]  ;;  %v907_v29 = vld [vmem:[%s9047_s7 + $0x15d0] sm:$0xf]  ;;  %904 = vst [vmem:[%s9051_s8 + $0x56c] sm:$0xf] %v903_v27 }
  0xf8   : > { %906 = vst [vmem:[%s9051_s8 + $0x570] sm:$0xf] %v905_v28  ;;  %908 = vst [vmem:[%s9051_s8 + $0x574] sm:$0xf] %v907_v29  ;;  %v909_v30 = vld [vmem:[%s9047_s7 + $0x15e0] sm:$0xf] }
  0xf9   : > { %v911_v31 = vld [vmem:[%s9047_s7 + $0x15f0] sm:$0xf]  ;;  %v913_v32 = vld [vmem:[%s9047_s7 + $0x1600] sm:$0xf]  ;;  %910 = vst [vmem:[%s9051_s8 + $0x578] sm:$0xf] %v909_v30 }
  0xfa   : > { %912 = vst [vmem:[%s9051_s8 + $0x57c] sm:$0xf] %v911_v31  ;;  %914 = vst [vmem:[%s9051_s8 + $0x580] sm:$0xf] %v913_v32  ;;  %v915_v33 = vld [vmem:[%s9047_s7 + $0x1610] sm:$0xf] }
  0xfb   : > { %v917_v34 = vld [vmem:[%s9047_s7 + $0x1620] sm:$0xf]  ;;  %v919_v35 = vld [vmem:[%s9047_s7 + $0x1630] sm:$0xf]  ;;  %916 = vst [vmem:[%s9051_s8 + $0x584] sm:$0xf] %v915_v33 }
  0xfc   : > { %918 = vst [vmem:[%s9051_s8 + $0x588] sm:$0xf] %v917_v34  ;;  %920 = vst [vmem:[%s9051_s8 + $0x58c] sm:$0xf] %v919_v35  ;;  %v921_v36 = vld [vmem:[%s9047_s7 + $0x1640] sm:$0xf] }
  0xfd   : > { %v923_v37 = vld [vmem:[%s9047_s7 + $0x1650] sm:$0xf]  ;;  %v925_v38 = vld [vmem:[%s9047_s7 + $0x1660] sm:$0xf]  ;;  %922 = vst [vmem:[%s9051_s8 + $0x590] sm:$0xf] %v921_v36 }
  0xfe   : > { %924 = vst [vmem:[%s9051_s8 + $0x594] sm:$0xf] %v923_v37  ;;  %926 = vst [vmem:[%s9051_s8 + $0x598] sm:$0xf] %v925_v38  ;;  %v927_v39 = vld [vmem:[%s9047_s7 + $0x1670] sm:$0xf] }
  0xff   : > { %v929_v40 = vld [vmem:[%s9047_s7 + $0x1680] sm:$0xf]  ;;  %v931_v41 = vld [vmem:[%s9047_s7 + $0x1690] sm:$0xf]  ;;  %928 = vst [vmem:[%s9051_s8 + $0x59c] sm:$0xf] %v927_v39 }
 0x100   : > { %930 = vst [vmem:[%s9051_s8 + $0x5a0] sm:$0xf] %v929_v40  ;;  %932 = vst [vmem:[%s9051_s8 + $0x5a4] sm:$0xf] %v931_v41  ;;  %v933_v42 = vld [vmem:[%s9047_s7 + $0x16a0] sm:$0xf] }
 0x101   : > { %v935_v43 = vld [vmem:[%s9047_s7 + $0x16b0] sm:$0xf]  ;;  %v937_v44 = vld [vmem:[%s9047_s7 + $0x16c0] sm:$0xf]  ;;  %934 = vst [vmem:[%s9051_s8 + $0x5a8] sm:$0xf] %v933_v42 }
 0x102   : > { %936 = vst [vmem:[%s9051_s8 + $0x5ac] sm:$0xf] %v935_v43  ;;  %938 = vst [vmem:[%s9051_s8 + $0x5b0] sm:$0xf] %v937_v44  ;;  %v939_v45 = vld [vmem:[%s9047_s7 + $0x16d0] sm:$0xf] }
 0x103   : > { %v941_v46 = vld [vmem:[%s9047_s7 + $0x16e0] sm:$0xf]  ;;  %v943_v47 = vld [vmem:[%s9047_s7 + $0x16f0] sm:$0xf]  ;;  %940 = vst [vmem:[%s9051_s8 + $0x5b4] sm:$0xf] %v939_v45 }
 0x104   : > { %942 = vst [vmem:[%s9051_s8 + $0x5b8] sm:$0xf] %v941_v46  ;;  %944 = vst [vmem:[%s9051_s8 + $0x5bc] sm:$0xf] %v943_v47  ;;  %v945_v48 = vld [vmem:[%s9047_s7 + $0x1700] sm:$0xf] }
 0x105   : > { %v947_v49 = vld [vmem:[%s9047_s7 + $0x1710] sm:$0xf]  ;;  %v949_v50 = vld [vmem:[%s9047_s7 + $0x1720] sm:$0xf]  ;;  %946 = vst [vmem:[%s9051_s8 + $0x5c0] sm:$0xf] %v945_v48 }
 0x106   : > { %948 = vst [vmem:[%s9051_s8 + $0x5c4] sm:$0xf] %v947_v49  ;;  %950 = vst [vmem:[%s9051_s8 + $0x5c8] sm:$0xf] %v949_v50  ;;  %v951_v51 = vld [vmem:[%s9047_s7 + $0x1730] sm:$0xf] }
 0x107   : > { %v953_v52 = vld [vmem:[%s9047_s7 + $0x1740] sm:$0xf]  ;;  %v955_v53 = vld [vmem:[%s9047_s7 + $0x1750] sm:$0xf]  ;;  %952 = vst [vmem:[%s9051_s8 + $0x5cc] sm:$0xf] %v951_v51 }
 0x108   : > { %954 = vst [vmem:[%s9051_s8 + $0x5d0] sm:$0xf] %v953_v52  ;;  %956 = vst [vmem:[%s9051_s8 + $0x5d4] sm:$0xf] %v955_v53  ;;  %v957_v54 = vld [vmem:[%s9047_s7 + $0x1760] sm:$0xf] }
 0x109   : > { %v959_v55 = vld [vmem:[%s9047_s7 + $0x1770] sm:$0xf]  ;;  %v961_v56 = vld [vmem:[%s9047_s7 + $0x1780] sm:$0xf]  ;;  %958 = vst [vmem:[%s9051_s8 + $0x5d8] sm:$0xf] %v957_v54 }
 0x10a   : > { %960 = vst [vmem:[%s9051_s8 + $0x5dc] sm:$0xf] %v959_v55  ;;  %962 = vst [vmem:[%s9051_s8 + $0x5e0] sm:$0xf] %v961_v56  ;;  %v963_v57 = vld [vmem:[%s9047_s7 + $0x1790] sm:$0xf] }
 0x10b   : > { %v965_v58 = vld [vmem:[%s9047_s7 + $0x17a0] sm:$0xf]  ;;  %v967_v59 = vld [vmem:[%s9047_s7 + $0x17b0] sm:$0xf]  ;;  %964 = vst [vmem:[%s9051_s8 + $0x5e4] sm:$0xf] %v963_v57 }
 0x10c   : > { %966 = vst [vmem:[%s9051_s8 + $0x5e8] sm:$0xf] %v965_v58  ;;  %968 = vst [vmem:[%s9051_s8 + $0x5ec] sm:$0xf] %v967_v59  ;;  %v969_v60 = vld [vmem:[%s9047_s7 + $0x17c0] sm:$0xf] }
 0x10d   : > { %v971_v61 = vld [vmem:[%s9047_s7 + $0x17d0] sm:$0xf]  ;;  %v973_v62 = vld [vmem:[%s9047_s7 + $0x17e0] sm:$0xf]  ;;  %970 = vst [vmem:[%s9051_s8 + $0x5f0] sm:$0xf] %v969_v60 }
 0x10e   : > { %972 = vst [vmem:[%s9051_s8 + $0x5f4] sm:$0xf] %v971_v61  ;;  %974 = vst [vmem:[%s9051_s8 + $0x5f8] sm:$0xf] %v973_v62  ;;  %v975_v63 = vld [vmem:[%s9047_s7 + $0x17f0] sm:$0xf] }
 0x10f   : > { %v977_v0 = vld [vmem:[%s9047_s7 + $0x1800] sm:$0xf]  ;;  %v979_v1 = vld [vmem:[%s9047_s7 + $0x1810] sm:$0xf]  ;;  %976 = vst [vmem:[%s9051_s8 + $0x5fc] sm:$0xf] %v975_v63 }
 0x110   : > { %978 = vst [vmem:[%s9051_s8 + $0x600] sm:$0xf] %v977_v0  ;;  %980 = vst [vmem:[%s9051_s8 + $0x604] sm:$0xf] %v979_v1  ;;  %v981_v2 = vld [vmem:[%s9047_s7 + $0x1820] sm:$0xf] }
 0x111   : > { %v983_v3 = vld [vmem:[%s9047_s7 + $0x1830] sm:$0xf]  ;;  %v985_v4 = vld [vmem:[%s9047_s7 + $0x1840] sm:$0xf]  ;;  %982 = vst [vmem:[%s9051_s8 + $0x608] sm:$0xf] %v981_v2 }
 0x112   : > { %984 = vst [vmem:[%s9051_s8 + $0x60c] sm:$0xf] %v983_v3  ;;  %986 = vst [vmem:[%s9051_s8 + $0x610] sm:$0xf] %v985_v4  ;;  %v987_v5 = vld [vmem:[%s9047_s7 + $0x1850] sm:$0xf] }
 0x113   : > { %v989_v6 = vld [vmem:[%s9047_s7 + $0x1860] sm:$0xf]  ;;  %v991_v7 = vld [vmem:[%s9047_s7 + $0x1870] sm:$0xf]  ;;  %988 = vst [vmem:[%s9051_s8 + $0x614] sm:$0xf] %v987_v5 }
 0x114   : > { %990 = vst [vmem:[%s9051_s8 + $0x618] sm:$0xf] %v989_v6  ;;  %992 = vst [vmem:[%s9051_s8 + $0x61c] sm:$0xf] %v991_v7  ;;  %v993_v8 = vld [vmem:[%s9047_s7 + $0x1880] sm:$0xf] }
 0x115   : > { %v995_v9 = vld [vmem:[%s9047_s7 + $0x1890] sm:$0xf]  ;;  %v997_v10 = vld [vmem:[%s9047_s7 + $0x18a0] sm:$0xf]  ;;  %994 = vst [vmem:[%s9051_s8 + $0x620] sm:$0xf] %v993_v8 }
 0x116   : > { %996 = vst [vmem:[%s9051_s8 + $0x624] sm:$0xf] %v995_v9  ;;  %998 = vst [vmem:[%s9051_s8 + $0x628] sm:$0xf] %v997_v10  ;;  %v999_v11 = vld [vmem:[%s9047_s7 + $0x18b0] sm:$0xf] }
 0x117   : > { %v1001_v12 = vld [vmem:[%s9047_s7 + $0x18c0] sm:$0xf]  ;;  %v1003_v13 = vld [vmem:[%s9047_s7 + $0x18d0] sm:$0xf]  ;;  %1000 = vst [vmem:[%s9051_s8 + $0x62c] sm:$0xf] %v999_v11 }
 0x118   : > { %1002 = vst [vmem:[%s9051_s8 + $0x630] sm:$0xf] %v1001_v12  ;;  %1004 = vst [vmem:[%s9051_s8 + $0x634] sm:$0xf] %v1003_v13  ;;  %v1005_v14 = vld [vmem:[%s9047_s7 + $0x18e0] sm:$0xf] }
 0x119   : > { %v1007_v15 = vld [vmem:[%s9047_s7 + $0x18f0] sm:$0xf]  ;;  %v1009_v16 = vld [vmem:[%s9047_s7 + $0x1900] sm:$0xf]  ;;  %1006 = vst [vmem:[%s9051_s8 + $0x638] sm:$0xf] %v1005_v14 }
 0x11a   : > { %1008 = vst [vmem:[%s9051_s8 + $0x63c] sm:$0xf] %v1007_v15  ;;  %1010 = vst [vmem:[%s9051_s8 + $0x640] sm:$0xf] %v1009_v16  ;;  %v1011_v17 = vld [vmem:[%s9047_s7 + $0x1910] sm:$0xf] }
 0x11b   : > { %v1013_v18 = vld [vmem:[%s9047_s7 + $0x1920] sm:$0xf]  ;;  %v1015_v19 = vld [vmem:[%s9047_s7 + $0x1930] sm:$0xf]  ;;  %1012 = vst [vmem:[%s9051_s8 + $0x644] sm:$0xf] %v1011_v17 }
 0x11c   : > { %1014 = vst [vmem:[%s9051_s8 + $0x648] sm:$0xf] %v1013_v18  ;;  %1016 = vst [vmem:[%s9051_s8 + $0x64c] sm:$0xf] %v1015_v19  ;;  %v1017_v20 = vld [vmem:[%s9047_s7 + $0x1940] sm:$0xf] }
 0x11d   : > { %v1019_v21 = vld [vmem:[%s9047_s7 + $0x1950] sm:$0xf]  ;;  %v1021_v22 = vld [vmem:[%s9047_s7 + $0x1960] sm:$0xf]  ;;  %1018 = vst [vmem:[%s9051_s8 + $0x650] sm:$0xf] %v1017_v20 }
 0x11e   : > { %1020 = vst [vmem:[%s9051_s8 + $0x654] sm:$0xf] %v1019_v21  ;;  %1022 = vst [vmem:[%s9051_s8 + $0x658] sm:$0xf] %v1021_v22  ;;  %v1023_v23 = vld [vmem:[%s9047_s7 + $0x1970] sm:$0xf] }
 0x11f   : > { %v1025_v24 = vld [vmem:[%s9047_s7 + $0x1980] sm:$0xf]  ;;  %v1027_v25 = vld [vmem:[%s9047_s7 + $0x1990] sm:$0xf]  ;;  %1024 = vst [vmem:[%s9051_s8 + $0x65c] sm:$0xf] %v1023_v23 }
 0x120   : > { %1026 = vst [vmem:[%s9051_s8 + $0x660] sm:$0xf] %v1025_v24  ;;  %1028 = vst [vmem:[%s9051_s8 + $0x664] sm:$0xf] %v1027_v25  ;;  %v1029_v26 = vld [vmem:[%s9047_s7 + $0x19a0] sm:$0xf] }
 0x121   : > { %v1031_v27 = vld [vmem:[%s9047_s7 + $0x19b0] sm:$0xf]  ;;  %v1033_v28 = vld [vmem:[%s9047_s7 + $0x19c0] sm:$0xf]  ;;  %1030 = vst [vmem:[%s9051_s8 + $0x668] sm:$0xf] %v1029_v26 }
 0x122   : > { %1032 = vst [vmem:[%s9051_s8 + $0x66c] sm:$0xf] %v1031_v27  ;;  %1034 = vst [vmem:[%s9051_s8 + $0x670] sm:$0xf] %v1033_v28  ;;  %v1035_v29 = vld [vmem:[%s9047_s7 + $0x19d0] sm:$0xf] }
 0x123   : > { %v1037_v30 = vld [vmem:[%s9047_s7 + $0x19e0] sm:$0xf]  ;;  %v1039_v31 = vld [vmem:[%s9047_s7 + $0x19f0] sm:$0xf]  ;;  %1036 = vst [vmem:[%s9051_s8 + $0x674] sm:$0xf] %v1035_v29 }
 0x124   : > { %1038 = vst [vmem:[%s9051_s8 + $0x678] sm:$0xf] %v1037_v30  ;;  %1040 = vst [vmem:[%s9051_s8 + $0x67c] sm:$0xf] %v1039_v31  ;;  %v1041_v32 = vld [vmem:[%s9047_s7 + $0x1a00] sm:$0xf] }
 0x125   : > { %v1043_v33 = vld [vmem:[%s9047_s7 + $0x1a10] sm:$0xf]  ;;  %v1045_v34 = vld [vmem:[%s9047_s7 + $0x1a20] sm:$0xf]  ;;  %1042 = vst [vmem:[%s9051_s8 + $0x680] sm:$0xf] %v1041_v32 }
 0x126   : > { %1044 = vst [vmem:[%s9051_s8 + $0x684] sm:$0xf] %v1043_v33  ;;  %1046 = vst [vmem:[%s9051_s8 + $0x688] sm:$0xf] %v1045_v34  ;;  %v1047_v35 = vld [vmem:[%s9047_s7 + $0x1a30] sm:$0xf] }
 0x127   : > { %v1049_v36 = vld [vmem:[%s9047_s7 + $0x1a40] sm:$0xf]  ;;  %v1051_v37 = vld [vmem:[%s9047_s7 + $0x1a50] sm:$0xf]  ;;  %1048 = vst [vmem:[%s9051_s8 + $0x68c] sm:$0xf] %v1047_v35 }
 0x128   : > { %1050 = vst [vmem:[%s9051_s8 + $0x690] sm:$0xf] %v1049_v36  ;;  %1052 = vst [vmem:[%s9051_s8 + $0x694] sm:$0xf] %v1051_v37  ;;  %v1053_v38 = vld [vmem:[%s9047_s7 + $0x1a60] sm:$0xf] }
 0x129   : > { %v1055_v39 = vld [vmem:[%s9047_s7 + $0x1a70] sm:$0xf]  ;;  %v1057_v40 = vld [vmem:[%s9047_s7 + $0x1a80] sm:$0xf]  ;;  %1054 = vst [vmem:[%s9051_s8 + $0x698] sm:$0xf] %v1053_v38 }
 0x12a   : > { %1056 = vst [vmem:[%s9051_s8 + $0x69c] sm:$0xf] %v1055_v39  ;;  %1058 = vst [vmem:[%s9051_s8 + $0x6a0] sm:$0xf] %v1057_v40  ;;  %v1059_v41 = vld [vmem:[%s9047_s7 + $0x1a90] sm:$0xf] }
 0x12b   : > { %v1061_v42 = vld [vmem:[%s9047_s7 + $0x1aa0] sm:$0xf]  ;;  %v1063_v43 = vld [vmem:[%s9047_s7 + $0x1ab0] sm:$0xf]  ;;  %1060 = vst [vmem:[%s9051_s8 + $0x6a4] sm:$0xf] %v1059_v41 }
 0x12c   : > { %1062 = vst [vmem:[%s9051_s8 + $0x6a8] sm:$0xf] %v1061_v42  ;;  %1064 = vst [vmem:[%s9051_s8 + $0x6ac] sm:$0xf] %v1063_v43  ;;  %v1065_v44 = vld [vmem:[%s9047_s7 + $0x1ac0] sm:$0xf] }
 0x12d   : > { %v1067_v45 = vld [vmem:[%s9047_s7 + $0x1ad0] sm:$0xf]  ;;  %v1069_v46 = vld [vmem:[%s9047_s7 + $0x1ae0] sm:$0xf]  ;;  %1066 = vst [vmem:[%s9051_s8 + $0x6b0] sm:$0xf] %v1065_v44 }
 0x12e   : > { %1068 = vst [vmem:[%s9051_s8 + $0x6b4] sm:$0xf] %v1067_v45  ;;  %1070 = vst [vmem:[%s9051_s8 + $0x6b8] sm:$0xf] %v1069_v46  ;;  %v1071_v47 = vld [vmem:[%s9047_s7 + $0x1af0] sm:$0xf] }
 0x12f   : > { %v1073_v48 = vld [vmem:[%s9047_s7 + $0x1b00] sm:$0xf]  ;;  %v1075_v49 = vld [vmem:[%s9047_s7 + $0x1b10] sm:$0xf]  ;;  %1072 = vst [vmem:[%s9051_s8 + $0x6bc] sm:$0xf] %v1071_v47 }
 0x130   : > { %1074 = vst [vmem:[%s9051_s8 + $0x6c0] sm:$0xf] %v1073_v48  ;;  %1076 = vst [vmem:[%s9051_s8 + $0x6c4] sm:$0xf] %v1075_v49  ;;  %v1077_v50 = vld [vmem:[%s9047_s7 + $0x1b20] sm:$0xf] }
 0x131   : > { %v1079_v51 = vld [vmem:[%s9047_s7 + $0x1b30] sm:$0xf]  ;;  %v1081_v52 = vld [vmem:[%s9047_s7 + $0x1b40] sm:$0xf]  ;;  %1078 = vst [vmem:[%s9051_s8 + $0x6c8] sm:$0xf] %v1077_v50 }
 0x132   : > { %1080 = vst [vmem:[%s9051_s8 + $0x6cc] sm:$0xf] %v1079_v51  ;;  %1082 = vst [vmem:[%s9051_s8 + $0x6d0] sm:$0xf] %v1081_v52  ;;  %v1083_v53 = vld [vmem:[%s9047_s7 + $0x1b50] sm:$0xf] }
 0x133   : > { %v1085_v54 = vld [vmem:[%s9047_s7 + $0x1b60] sm:$0xf]  ;;  %v1087_v55 = vld [vmem:[%s9047_s7 + $0x1b70] sm:$0xf]  ;;  %1084 = vst [vmem:[%s9051_s8 + $0x6d4] sm:$0xf] %v1083_v53 }
 0x134   : > { %1086 = vst [vmem:[%s9051_s8 + $0x6d8] sm:$0xf] %v1085_v54  ;;  %1088 = vst [vmem:[%s9051_s8 + $0x6dc] sm:$0xf] %v1087_v55  ;;  %v1089_v56 = vld [vmem:[%s9047_s7 + $0x1b80] sm:$0xf] }
 0x135   : > { %v1091_v57 = vld [vmem:[%s9047_s7 + $0x1b90] sm:$0xf]  ;;  %v1093_v58 = vld [vmem:[%s9047_s7 + $0x1ba0] sm:$0xf]  ;;  %1090 = vst [vmem:[%s9051_s8 + $0x6e0] sm:$0xf] %v1089_v56 }
 0x136   : > { %1092 = vst [vmem:[%s9051_s8 + $0x6e4] sm:$0xf] %v1091_v57  ;;  %1094 = vst [vmem:[%s9051_s8 + $0x6e8] sm:$0xf] %v1093_v58  ;;  %v1095_v59 = vld [vmem:[%s9047_s7 + $0x1bb0] sm:$0xf] }
 0x137   : > { %v1097_v60 = vld [vmem:[%s9047_s7 + $0x1bc0] sm:$0xf]  ;;  %v1099_v61 = vld [vmem:[%s9047_s7 + $0x1bd0] sm:$0xf]  ;;  %1096 = vst [vmem:[%s9051_s8 + $0x6ec] sm:$0xf] %v1095_v59 }
 0x138   : > { %1098 = vst [vmem:[%s9051_s8 + $0x6f0] sm:$0xf] %v1097_v60  ;;  %1100 = vst [vmem:[%s9051_s8 + $0x6f4] sm:$0xf] %v1099_v61  ;;  %v1101_v62 = vld [vmem:[%s9047_s7 + $0x1be0] sm:$0xf] }
 0x139   : > { %v1103_v63 = vld [vmem:[%s9047_s7 + $0x1bf0] sm:$0xf]  ;;  %v1105_v0 = vld [vmem:[%s9047_s7 + $0x1c00] sm:$0xf]  ;;  %1102 = vst [vmem:[%s9051_s8 + $0x6f8] sm:$0xf] %v1101_v62 }
 0x13a   : > { %1104 = vst [vmem:[%s9051_s8 + $0x6fc] sm:$0xf] %v1103_v63  ;;  %1106 = vst [vmem:[%s9051_s8 + $0x700] sm:$0xf] %v1105_v0  ;;  %v1107_v1 = vld [vmem:[%s9047_s7 + $0x1c10] sm:$0xf] }
 0x13b   : > { %v1109_v2 = vld [vmem:[%s9047_s7 + $0x1c20] sm:$0xf]  ;;  %v1111_v3 = vld [vmem:[%s9047_s7 + $0x1c30] sm:$0xf]  ;;  %1108 = vst [vmem:[%s9051_s8 + $0x704] sm:$0xf] %v1107_v1 }
 0x13c   : > { %1110 = vst [vmem:[%s9051_s8 + $0x708] sm:$0xf] %v1109_v2  ;;  %1112 = vst [vmem:[%s9051_s8 + $0x70c] sm:$0xf] %v1111_v3  ;;  %v1113_v4 = vld [vmem:[%s9047_s7 + $0x1c40] sm:$0xf] }
 0x13d   : > { %v1115_v5 = vld [vmem:[%s9047_s7 + $0x1c50] sm:$0xf]  ;;  %v1117_v6 = vld [vmem:[%s9047_s7 + $0x1c60] sm:$0xf]  ;;  %1114 = vst [vmem:[%s9051_s8 + $0x710] sm:$0xf] %v1113_v4 }
 0x13e   : > { %1116 = vst [vmem:[%s9051_s8 + $0x714] sm:$0xf] %v1115_v5  ;;  %1118 = vst [vmem:[%s9051_s8 + $0x718] sm:$0xf] %v1117_v6  ;;  %v1119_v7 = vld [vmem:[%s9047_s7 + $0x1c70] sm:$0xf] }
 0x13f   : > { %v1121_v8 = vld [vmem:[%s9047_s7 + $0x1c80] sm:$0xf]  ;;  %v1123_v9 = vld [vmem:[%s9047_s7 + $0x1c90] sm:$0xf]  ;;  %1120 = vst [vmem:[%s9051_s8 + $0x71c] sm:$0xf] %v1119_v7 }
 0x140   : > { %1122 = vst [vmem:[%s9051_s8 + $0x720] sm:$0xf] %v1121_v8  ;;  %1124 = vst [vmem:[%s9051_s8 + $0x724] sm:$0xf] %v1123_v9  ;;  %v1125_v10 = vld [vmem:[%s9047_s7 + $0x1ca0] sm:$0xf] }
 0x141   : > { %v1127_v11 = vld [vmem:[%s9047_s7 + $0x1cb0] sm:$0xf]  ;;  %v1129_v12 = vld [vmem:[%s9047_s7 + $0x1cc0] sm:$0xf]  ;;  %1126 = vst [vmem:[%s9051_s8 + $0x728] sm:$0xf] %v1125_v10 }
 0x142   : > { %1128 = vst [vmem:[%s9051_s8 + $0x72c] sm:$0xf] %v1127_v11  ;;  %1130 = vst [vmem:[%s9051_s8 + $0x730] sm:$0xf] %v1129_v12  ;;  %v1131_v13 = vld [vmem:[%s9047_s7 + $0x1cd0] sm:$0xf] }
 0x143   : > { %v1133_v14 = vld [vmem:[%s9047_s7 + $0x1ce0] sm:$0xf]  ;;  %v1135_v15 = vld [vmem:[%s9047_s7 + $0x1cf0] sm:$0xf]  ;;  %1132 = vst [vmem:[%s9051_s8 + $0x734] sm:$0xf] %v1131_v13 }
 0x144   : > { %1134 = vst [vmem:[%s9051_s8 + $0x738] sm:$0xf] %v1133_v14  ;;  %1136 = vst [vmem:[%s9051_s8 + $0x73c] sm:$0xf] %v1135_v15  ;;  %v1137_v16 = vld [vmem:[%s9047_s7 + $0x1d00] sm:$0xf] }
 0x145   : > { %v1139_v17 = vld [vmem:[%s9047_s7 + $0x1d10] sm:$0xf]  ;;  %v1141_v18 = vld [vmem:[%s9047_s7 + $0x1d20] sm:$0xf]  ;;  %1138 = vst [vmem:[%s9051_s8 + $0x740] sm:$0xf] %v1137_v16 }
 0x146   : > { %1140 = vst [vmem:[%s9051_s8 + $0x744] sm:$0xf] %v1139_v17  ;;  %1142 = vst [vmem:[%s9051_s8 + $0x748] sm:$0xf] %v1141_v18  ;;  %v1143_v19 = vld [vmem:[%s9047_s7 + $0x1d30] sm:$0xf] }
 0x147   : > { %v1145_v20 = vld [vmem:[%s9047_s7 + $0x1d40] sm:$0xf]  ;;  %v1147_v21 = vld [vmem:[%s9047_s7 + $0x1d50] sm:$0xf]  ;;  %1144 = vst [vmem:[%s9051_s8 + $0x74c] sm:$0xf] %v1143_v19 }
 0x148   : > { %1146 = vst [vmem:[%s9051_s8 + $0x750] sm:$0xf] %v1145_v20  ;;  %1148 = vst [vmem:[%s9051_s8 + $0x754] sm:$0xf] %v1147_v21  ;;  %v1149_v22 = vld [vmem:[%s9047_s7 + $0x1d60] sm:$0xf] }
 0x149   : > { %v1151_v23 = vld [vmem:[%s9047_s7 + $0x1d70] sm:$0xf]  ;;  %v1153_v24 = vld [vmem:[%s9047_s7 + $0x1d80] sm:$0xf]  ;;  %1150 = vst [vmem:[%s9051_s8 + $0x758] sm:$0xf] %v1149_v22 }
 0x14a   : > { %1152 = vst [vmem:[%s9051_s8 + $0x75c] sm:$0xf] %v1151_v23  ;;  %1154 = vst [vmem:[%s9051_s8 + $0x760] sm:$0xf] %v1153_v24  ;;  %v1155_v25 = vld [vmem:[%s9047_s7 + $0x1d90] sm:$0xf] }
 0x14b   : > { %v1157_v26 = vld [vmem:[%s9047_s7 + $0x1da0] sm:$0xf]  ;;  %v1159_v27 = vld [vmem:[%s9047_s7 + $0x1db0] sm:$0xf]  ;;  %1156 = vst [vmem:[%s9051_s8 + $0x764] sm:$0xf] %v1155_v25 }
 0x14c   : > { %1158 = vst [vmem:[%s9051_s8 + $0x768] sm:$0xf] %v1157_v26  ;;  %1160 = vst [vmem:[%s9051_s8 + $0x76c] sm:$0xf] %v1159_v27  ;;  %v1161_v28 = vld [vmem:[%s9047_s7 + $0x1dc0] sm:$0xf] }
 0x14d   : > { %v1163_v29 = vld [vmem:[%s9047_s7 + $0x1dd0] sm:$0xf]  ;;  %v1165_v30 = vld [vmem:[%s9047_s7 + $0x1de0] sm:$0xf]  ;;  %1162 = vst [vmem:[%s9051_s8 + $0x770] sm:$0xf] %v1161_v28 }
 0x14e   : > { %1164 = vst [vmem:[%s9051_s8 + $0x774] sm:$0xf] %v1163_v29  ;;  %1166 = vst [vmem:[%s9051_s8 + $0x778] sm:$0xf] %v1165_v30  ;;  %v1167_v31 = vld [vmem:[%s9047_s7 + $0x1df0] sm:$0xf] }
 0x14f   : > { %v1169_v32 = vld [vmem:[%s9047_s7 + $0x1e00] sm:$0xf]  ;;  %v1171_v33 = vld [vmem:[%s9047_s7 + $0x1e10] sm:$0xf]  ;;  %1168 = vst [vmem:[%s9051_s8 + $0x77c] sm:$0xf] %v1167_v31 }
 0x150   : > { %1170 = vst [vmem:[%s9051_s8 + $0x780] sm:$0xf] %v1169_v32  ;;  %1172 = vst [vmem:[%s9051_s8 + $0x784] sm:$0xf] %v1171_v33  ;;  %v1173_v34 = vld [vmem:[%s9047_s7 + $0x1e20] sm:$0xf] }
 0x151   : > { %v1175_v35 = vld [vmem:[%s9047_s7 + $0x1e30] sm:$0xf]  ;;  %v1177_v36 = vld [vmem:[%s9047_s7 + $0x1e40] sm:$0xf]  ;;  %1174 = vst [vmem:[%s9051_s8 + $0x788] sm:$0xf] %v1173_v34 }
 0x152   : > { %1176 = vst [vmem:[%s9051_s8 + $0x78c] sm:$0xf] %v1175_v35  ;;  %1178 = vst [vmem:[%s9051_s8 + $0x790] sm:$0xf] %v1177_v36  ;;  %v1179_v37 = vld [vmem:[%s9047_s7 + $0x1e50] sm:$0xf] }
 0x153   : > { %v1181_v38 = vld [vmem:[%s9047_s7 + $0x1e60] sm:$0xf]  ;;  %v1183_v39 = vld [vmem:[%s9047_s7 + $0x1e70] sm:$0xf]  ;;  %1180 = vst [vmem:[%s9051_s8 + $0x794] sm:$0xf] %v1179_v37 }
 0x154   : > { %1182 = vst [vmem:[%s9051_s8 + $0x798] sm:$0xf] %v1181_v38  ;;  %1184 = vst [vmem:[%s9051_s8 + $0x79c] sm:$0xf] %v1183_v39  ;;  %v1185_v40 = vld [vmem:[%s9047_s7 + $0x1e80] sm:$0xf] }
 0x155   : > { %v1187_v41 = vld [vmem:[%s9047_s7 + $0x1e90] sm:$0xf]  ;;  %v1189_v42 = vld [vmem:[%s9047_s7 + $0x1ea0] sm:$0xf]  ;;  %1186 = vst [vmem:[%s9051_s8 + $0x7a0] sm:$0xf] %v1185_v40 }
 0x156   : > { %1188 = vst [vmem:[%s9051_s8 + $0x7a4] sm:$0xf] %v1187_v41  ;;  %1190 = vst [vmem:[%s9051_s8 + $0x7a8] sm:$0xf] %v1189_v42  ;;  %v1191_v43 = vld [vmem:[%s9047_s7 + $0x1eb0] sm:$0xf] }
 0x157   : > { %v1193_v44 = vld [vmem:[%s9047_s7 + $0x1ec0] sm:$0xf]  ;;  %v1195_v45 = vld [vmem:[%s9047_s7 + $0x1ed0] sm:$0xf]  ;;  %1192 = vst [vmem:[%s9051_s8 + $0x7ac] sm:$0xf] %v1191_v43 }
 0x158   : > { %1194 = vst [vmem:[%s9051_s8 + $0x7b0] sm:$0xf] %v1193_v44  ;;  %1196 = vst [vmem:[%s9051_s8 + $0x7b4] sm:$0xf] %v1195_v45  ;;  %v1197_v46 = vld [vmem:[%s9047_s7 + $0x1ee0] sm:$0xf] }
 0x159   : > { %v1199_v47 = vld [vmem:[%s9047_s7 + $0x1ef0] sm:$0xf]  ;;  %v1201_v48 = vld [vmem:[%s9047_s7 + $0x1f00] sm:$0xf]  ;;  %1198 = vst [vmem:[%s9051_s8 + $0x7b8] sm:$0xf] %v1197_v46 }
 0x15a   : > { %1200 = vst [vmem:[%s9051_s8 + $0x7bc] sm:$0xf] %v1199_v47  ;;  %1202 = vst [vmem:[%s9051_s8 + $0x7c0] sm:$0xf] %v1201_v48  ;;  %v1203_v49 = vld [vmem:[%s9047_s7 + $0x1f10] sm:$0xf] }
 0x15b   : > { %v1205_v50 = vld [vmem:[%s9047_s7 + $0x1f20] sm:$0xf]  ;;  %v1207_v51 = vld [vmem:[%s9047_s7 + $0x1f30] sm:$0xf]  ;;  %1204 = vst [vmem:[%s9051_s8 + $0x7c4] sm:$0xf] %v1203_v49 }
 0x15c   : > { %1206 = vst [vmem:[%s9051_s8 + $0x7c8] sm:$0xf] %v1205_v50  ;;  %1208 = vst [vmem:[%s9051_s8 + $0x7cc] sm:$0xf] %v1207_v51  ;;  %v1209_v52 = vld [vmem:[%s9047_s7 + $0x1f40] sm:$0xf] }
 0x15d   : > { %v1211_v53 = vld [vmem:[%s9047_s7 + $0x1f50] sm:$0xf]  ;;  %v1213_v54 = vld [vmem:[%s9047_s7 + $0x1f60] sm:$0xf]  ;;  %1210 = vst [vmem:[%s9051_s8 + $0x7d0] sm:$0xf] %v1209_v52 }
 0x15e   : > { %1212 = vst [vmem:[%s9051_s8 + $0x7d4] sm:$0xf] %v1211_v53  ;;  %1214 = vst [vmem:[%s9051_s8 + $0x7d8] sm:$0xf] %v1213_v54  ;;  %v1215_v55 = vld [vmem:[%s9047_s7 + $0x1f70] sm:$0xf] }
 0x15f   : > { %v1217_v56 = vld [vmem:[%s9047_s7 + $0x1f80] sm:$0xf]  ;;  %v1219_v57 = vld [vmem:[%s9047_s7 + $0x1f90] sm:$0xf]  ;;  %1216 = vst [vmem:[%s9051_s8 + $0x7dc] sm:$0xf] %v1215_v55 }
 0x160   : > { %1218 = vst [vmem:[%s9051_s8 + $0x7e0] sm:$0xf] %v1217_v56  ;;  %1220 = vst [vmem:[%s9051_s8 + $0x7e4] sm:$0xf] %v1219_v57  ;;  %v1221_v58 = vld [vmem:[%s9047_s7 + $0x1fa0] sm:$0xf] }
 0x161   : > { %v1223_v59 = vld [vmem:[%s9047_s7 + $0x1fb0] sm:$0xf]  ;;  %v1225_v60 = vld [vmem:[%s9047_s7 + $0x1fc0] sm:$0xf]  ;;  %1222 = vst [vmem:[%s9051_s8 + $0x7e8] sm:$0xf] %v1221_v58 }
 0x162   : > { %1224 = vst [vmem:[%s9051_s8 + $0x7ec] sm:$0xf] %v1223_v59  ;;  %1226 = vst [vmem:[%s9051_s8 + $0x7f0] sm:$0xf] %v1225_v60  ;;  %v1227_v61 = vld [vmem:[%s9047_s7 + $0x1fd0] sm:$0xf] }
 0x163   : > { %v1229_v62 = vld [vmem:[%s9047_s7 + $0x1fe0] sm:$0xf]  ;;  %v1231_v63 = vld [vmem:[%s9047_s7 + $0x1ff0] sm:$0xf]  ;;  %1228 = vst [vmem:[%s9051_s8 + $0x7f4] sm:$0xf] %v1227_v61 }
 0x164   : > { %1230 = vst [vmem:[%s9051_s8 + $0x7f8] sm:$0xf] %v1229_v62  ;;  %1232 = vst [vmem:[%s9051_s8 + $0x7fc] sm:$0xf] %v1231_v63 }
 0x165 PF: > { %4370 = sbr.rel (!%p9035_p3) target bundleno = 363 (0x16b), region = 84  ;;  %s4372_s9 = sand.u32 (%p9035_p3), 1, %s8970_s19  }
 0x166   : > { %s7894_s10 = sshll.u32 (%p9035_p3), %s8974_s20, 3  ;;  %s7893_s11 = sshll.u32 (%p9035_p3), %s4372_s9, 4 }
 0x167   : > { %s4376_s14 = scalar_lea.vmem (%p9035_p3), %s10714_s4, %s7894_s10  ;;  %s4374_s15 = scalar_lea.vmem (%p9035_p3), [#allocation3], %s7893_s11 }
 0x168   : > { %v4407_v0 = vld [vmem:[%s4376_s14] sm:$0xff] (%p9035_p3) }
 0x169   : > { %v4409_v1 = vld [vmem:[%s4376_s14 + $0x20] sm:$0xff] (%p9035_p3)  ;;  %4408 = vst [vmem:[%s4374_s15] sm:$0xff] (%p9035_p3), %v4407_v0 }
 0x16a   : > { %4410 = vst [vmem:[%s4374_s15 + $0x8] sm:$0xff] %v4409_v1 }
 0x16b PF: > { %p7895_p5 = scmp.ge.s32.totalorder %s8974_s20, 1  ;;  %p4415_p6 = scmp.lt.s32.totalorder %s8974_s20, 5 }
 0x16d   : > { %p4416_p7 = pnand %p7895_p5, %p4415_p6 }
 0x16f   : > { %4419 = sbr.rel (%p4416_p7) target bundleno = 926 (0x39e), region = 122 }
 0x174   : > { %s4422_s16 = sand.u32 1, %s8966_s18   ;;  %v10088_v2 = vld [vmem:[%s10710_s0] sm:$0xff]  ;;  %v10098_v4 = vld [vmem:[%s10710_s0 + $0x8] sm:$0xff]  ;;  %p4465_p8 = scmp.lt.s32.totalorder %s7887_s21, 3  ;;  %vm7780_vm4 = vcmask 1041409  }
 0x175   : > { %v10093_v3 = vld [vmem:[%s10710_s0 + $0x80] sm:$0xff]  ;;  %s7896_s29 = sshll.u32 %s4422_s16, 11  ;;  %v10107_v6 = vld [vmem:[%s10710_s0 + $0x88] sm:$0xff]  ;;  %s7897_s23 = sshll.u32 %s4422_s16, 4 }
 0x176   : > { %v7900_v5 = vcombine.high %v10088_v2, %v10093_v3  ;;  %v7902_v7 = vcombine.high %v10098_v4, %v10107_v6  ;;  %s10111_s7 = scalar_lea.vmem [#allocation2], %s7896_s29  ;;  %v4508_v37 = vld [vmem:[%s10710_s0 + $0x100] sm:$0xff]  ;;  %v4509_v40 = vld [vmem:[%s10710_s0 + $0x108] sm:$0xff]  ;;  %v7899_v44 = vcombine.low %v10088_v2, %v10093_v3  ;;  %v7901_v45 = vcombine.low %v10098_v4, %v10107_v6  ;;  %s10741_s21 = smov (!%p4465_p8, %s7887_s21), 3 }
 0x177   : > { %v8694_v8 = vld [vmem:[%s10111_s7 + $0x78] sm:$0xff]   ;;  %v8698_v12 = vld [vmem:[%s10111_s7 + $0x70] sm:$0xff]   ;;  %v8702_v16 = vld [vmem:[%s10111_s7 + $0x68] sm:$0xff]   ;;  %s7898_s8 = sshll.u32 %s10741_s21, 3  ;;  %s4467_s13 = scalar_lea.vmem %s10712_s2, %s10741_s21 }
 0x178   : > { %6940 = vmatprep.mubr.bf16.mxu0 %v7900_v5  ;;  %v8695_v9 = vld [vmem:[%s10111_s7 + $0xf8] sm:$0xff]   ;;  %6989 = vmatprep.mubr.bf16.mxu1 %v7902_v7  ;;  %v8699_v13 = vld [vmem:[%s10111_s7 + $0xf0] sm:$0xff]   ;;  %v8703_v17 = vld [vmem:[%s10111_s7 + $0xe8] sm:$0xff]   ;;  %s10627_s11 = scalar_lea.vmem %s10715_s5, %s7898_s8  ;;  %s4470_s17 = scalar_lea.vmem %s10713_s3, %s10741_s21 }
 0x179   : > { %8221 = vmatprep.subr.bf16.mxu0 %v8694_v8  ;;  %v8696_v10 = vld [vmem:[%s10111_s7 + $0x38] sm:$0xff]   ;;  %8249 = vmatprep.subr.bf16.mxu1 %v8695_v9  ;;  %v8700_v14 = vld [vmem:[%s10111_s7 + $0x30] sm:$0xff]   ;;  %v8704_v18 = vld [vmem:[%s10111_s7 + $0x28] sm:$0xff]   ;;  %s4431_s21 = scalar_lea.vmem [#allocation3], %s7897_s23 }
 0x17a   : > { %v8697_v11 = vld [vmem:[%s10111_s7 + $0xb8] sm:$0xff]   ;;  %8222 = vmatpush3.bf16.msra.mxu0 %v8696_v10  ;;  %v8701_v15 = vld [vmem:[%s10111_s7 + $0xb0] sm:$0xff]   ;;  %v8705_v19 = vld [vmem:[%s10111_s7 + $0xa8] sm:$0xff]  }
 0x17b   : > { %8250 = vmatpush3.bf16.msra.mxu1 %v8697_v11  ;;  %8223 = vmatprep.subr.bf16.mxu0 %v8698_v12  ;;  %v8706_v20 = vld [vmem:[%s10111_s7 + $0x60] sm:$0xff]   ;;  %v8710_v24 = vld [vmem:[%s10111_s7 + $0x58] sm:$0xff]   ;;  %v8714_v28 = vld [vmem:[%s10111_s7 + $0x50] sm:$0xff]  }
 0x17c   : > { %8251 = vmatprep.subr.bf16.mxu1 %v8699_v13  ;;  %v8707_v21 = vld [vmem:[%s10111_s7 + $0xe0] sm:$0xff]   ;;  %v8711_v25 = vld [vmem:[%s10111_s7 + $0xd8] sm:$0xff]   ;;  %v8715_v29 = vld [vmem:[%s10111_s7 + $0xd0] sm:$0xff]  }
 0x17d   : > { %v8708_v22 = vld [vmem:[%s10111_s7 + $0x20] sm:$0xff]   ;;  %v8712_v26 = vld [vmem:[%s10111_s7 + $0x18] sm:$0xff]   ;;  %v8716_v30 = vld [vmem:[%s10111_s7 + $0x10] sm:$0xff]  }
 0x17e   : > { %8224 = vmatpush3.bf16.msra.mxu0 %v8700_v14  ;;  %v8709_v23 = vld [vmem:[%s10111_s7 + $0xa0] sm:$0xff]   ;;  %v8713_v27 = vld [vmem:[%s10111_s7 + $0x98] sm:$0xff]   ;;  %v8717_v31 = vld [vmem:[%s10111_s7 + $0x90] sm:$0xff]  }
 0x17f   : > { %8252 = vmatpush3.bf16.msra.mxu1 %v8701_v15  ;;  %8225 = vmatprep.subr.bf16.mxu0 %v8702_v16  ;;  %v8718_v32 = vld [vmem:[%s10111_s7 + $0x48] sm:$0xff]   ;;  %v8722_v36 = vld [vmem:[%s10111_s7 + $0x40] sm:$0xff]   ;;  %v8726_v46 = vld [vmem:[%s10111_s7 + $0x178] sm:$0xff]  }
 0x180   : > { %8253 = vmatprep.subr.bf16.mxu1 %v8703_v17  ;;  %v8719_v33 = vld [vmem:[%s10111_s7 + $0xc8] sm:$0xff]   ;;  %v4524_v38 = vld [vmem:[%s10710_s0 + $0x180] sm:$0xff]  ;;  %v8727_v47 = vld [vmem:[%s10111_s7 + $0x1f8] sm:$0xff]  }
 0x181   : > { %v8720_v34 = vld [vmem:[%s10111_s7 + $0x8] sm:$0xff]   ;;  %v8723_v39 = vld [vmem:[%s10111_s7 + $0xc0] sm:$0xff]   ;;  %v7932_v48 = vcombine.high %v4508_v37, %v4524_v38  ;;  %v8728_v49 = vld [vmem:[%s10111_s7 + $0x138] sm:$0xff]   ;;  %v7931_v56 = vcombine.low %v4508_v37, %v4524_v38 }
 0x182   : > { %8226 = vmatpush3.bf16.msra.mxu0 %v8704_v18  ;;  %v8721_v35 = vld [vmem:[%s10111_s7 + $0x88] sm:$0xff]   ;;  %v8724_v42 = vld [vmem:[%s10111_s7] sm:$0xff]   ;;  %v8729_v51 = vld [vmem:[%s10111_s7 + $0x1b8] sm:$0xff]  }
 0x183   : > { %8254 = vmatpush3.bf16.msra.mxu1 %v8705_v19  ;;  %8227 = vmatprep.subr.bf16.mxu0 %v8706_v20  ;;  %v4525_v41 = vld [vmem:[%s10710_s0 + $0x188] sm:$0xff]  ;;  %v8725_v43 = vld [vmem:[%s10111_s7 + $0x80] sm:$0xff]   ;;  %v8730_v52 = vld [vmem:[%s10111_s7 + $0x170] sm:$0xff]  }
 0x184   : > { %8255 = vmatprep.subr.bf16.mxu1 %v8707_v21  ;;  %v7934_v50 = vcombine.high %v4509_v40, %v4525_v41  ;;  %v8731_v53 = vld [vmem:[%s10111_s7 + $0x1f0] sm:$0xff]   ;;  %v8734_v57 = vld [vmem:[%s10111_s7 + $0x168] sm:$0xff]   ;;  %v7933_v58 = vcombine.low %v4509_v40, %v4525_v41  ;;  %v8738_v62 = vld [vmem:[%s10111_s7 + $0x160] sm:$0xff]  }
 0x185   : > { %v8732_v54 = vld [vmem:[%s10111_s7 + $0x130] sm:$0xff]   ;;  %v8735_v59 = vld [vmem:[%s10111_s7 + $0x1e8] sm:$0xff]   ;;  %v8739_v63 = vld [vmem:[%s10111_s7 + $0x1e0] sm:$0xff]  }
 0x186   : > { %8228 = vmatpush3.bf16.msra.mxu0 %v8708_v22  ;;  %v8733_v55 = vld [vmem:[%s10111_s7 + $0x1b0] sm:$0xff]   ;;  %v8736_v60 = vld [vmem:[%s10111_s7 + $0x128] sm:$0xff]   ;;  %v8740_v0 = vld [vmem:[%s10111_s7 + $0x120] sm:$0xff]  }
 0x187   : > { %8256 = vmatpush3.bf16.msra.mxu1 %v8709_v23  ;;  %8229 = vmatprep.subr.bf16.mxu0 %v8710_v24  ;;  %v8737_v61 = vld [vmem:[%s10111_s7 + $0x1a8] sm:$0xff]   ;;  %v8741_v1 = vld [vmem:[%s10111_s7 + $0x1a0] sm:$0xff]   ;;  %v8742_v2 = vld [vmem:[%s10111_s7 + $0x158] sm:$0xff]  }
 0x188   : > { %8257 = vmatprep.subr.bf16.mxu1 %v8711_v25  ;;  %v8743_v3 = vld [vmem:[%s10111_s7 + $0x1d8] sm:$0xff]   ;;  %v8746_v6 = vld [vmem:[%s10111_s7 + $0x150] sm:$0xff]   ;;  %v8750_v10 = vld [vmem:[%s10111_s7 + $0x148] sm:$0xff]  }
 0x189   : > { %v8744_v4 = vld [vmem:[%s10111_s7 + $0x118] sm:$0xff]   ;;  %v8747_v7 = vld [vmem:[%s10111_s7 + $0x1d0] sm:$0xff]   ;;  %v8751_v11 = vld [vmem:[%s10111_s7 + $0x1c8] sm:$0xff]  }
 0x18a   : > { %8230 = vmatpush3.bf16.msra.mxu0 %v8712_v26  ;;  %v8745_v5 = vld [vmem:[%s10111_s7 + $0x198] sm:$0xff]   ;;  %v8748_v8 = vld [vmem:[%s10111_s7 + $0x110] sm:$0xff]   ;;  %v8752_v12 = vld [vmem:[%s10111_s7 + $0x108] sm:$0xff]  }
 0x18b   : > { %8258 = vmatpush3.bf16.msra.mxu1 %v8713_v27  ;;  %8231 = vmatprep.subr.bf16.mxu0 %v8714_v28  ;;  %v8749_v9 = vld [vmem:[%s10111_s7 + $0x190] sm:$0xff]   ;;  %v8753_v13 = vld [vmem:[%s10111_s7 + $0x188] sm:$0xff]   ;;  %v8754_v14 = vld [vmem:[%s10111_s7 + $0x140] sm:$0xff]  }
 0x18c   : > { %8259 = vmatprep.subr.bf16.mxu1 %v8715_v29  ;;  %v4478_v15 = vld [vmem:[%s10710_s0 + $0x10] sm:$0xff]  ;;  %v8755_v16 = vld [vmem:[%s10111_s7 + $0x1c0] sm:$0xff]   ;;  %v4479_v20 = vld [vmem:[%s10710_s0 + $0x18] sm:$0xff] }
 0x18d   : > { %v8756_v17 = vld [vmem:[%s10111_s7 + $0x100] sm:$0xff]   ;;  %v4494_v19 = vld [vmem:[%s10710_s0 + $0x90] sm:$0xff]  ;;  %v4495_v21 = vld [vmem:[%s10710_s0 + $0x98] sm:$0xff] }
 0x18e   : > { %8232 = vmatpush3.bf16.msra.mxu0 %v8716_v30  ;;  %v8757_v18 = vld [vmem:[%s10111_s7 + $0x180] sm:$0xff]   ;;  %v7903_v22 = vcombine.low %v4478_v15, %v4494_v19  ;;  %v7904_v23 = vcombine.high %v4478_v15, %v4494_v19  ;;  %v7905_v24 = vcombine.low %v4479_v20, %v4495_v21  ;;  %v7906_v25 = vcombine.high %v4479_v20, %v4495_v21  ;;  %v8758_v26 = vld [vmem:[%s10111_s7 + $0x278] sm:$0xff]   ;;  %v8762_v30 = vld [vmem:[%s10111_s7 + $0x270] sm:$0xff]  }
 0x18f   : > { %8260 = vmatpush3.bf16.msra.mxu1 %v8717_v31  ;;  %8233 = vmatprep.subr.bf16.mxu0 %v8718_v32  ;;  %v8759_v27 = vld [vmem:[%s10111_s7 + $0x2f8] sm:$0xff]   ;;  %v8763_v31 = vld [vmem:[%s10111_s7 + $0x2f0] sm:$0xff]   ;;  %v8766_v38 = vld [vmem:[%s10111_s7 + $0x268] sm:$0xff]  }
 0x190   : > { %8261 = vmatprep.subr.bf16.mxu1 %v8719_v33  ;;  %v8760_v28 = vld [vmem:[%s10111_s7 + $0x238] sm:$0xff]   ;;  %v8764_v32 = vld [vmem:[%s10111_s7 + $0x230] sm:$0xff]   ;;  %v4528_v19 = vld [vmem:[%s10710_s0 + $0x1a0] sm:$0xff] }
 0x191   : > { %v8761_v29 = vld [vmem:[%s10111_s7 + $0x2b8] sm:$0xff]   ;;  %v8765_v33 = vld [vmem:[%s10111_s7 + $0x2b0] sm:$0xff]  }
 0x192   : > { %8234 = vmatpush3.bf16.msra.mxu0 %v8720_v34  ;;  %v4510_v34 = vld [vmem:[%s10710_s0 + $0x110] sm:$0xff]  ;;  %v4511_v40 = vld [vmem:[%s10710_s0 + $0x118] sm:$0xff] }
 0x193   : > { %8262 = vmatpush3.bf16.msra.mxu1 %v8721_v35  ;;  %8235 = vmatprep.subr.bf16.mxu0 %v8722_v36  ;;  %v4526_v35 = vld [vmem:[%s10710_s0 + $0x190] sm:$0xff]  ;;  %v4527_v41 = vld [vmem:[%s10710_s0 + $0x198] sm:$0xff] }
 0x194   : > { %8263 = vmatprep.subr.bf16.mxu1 %v8723_v39  ;;  %v7936_v36 = vcombine.high %v4510_v34, %v4526_v35  ;;  %v7935_v37 = vcombine.low %v4510_v34, %v4526_v35  ;;  %v8767_v39 = vld [vmem:[%s10111_s7 + $0x2e8] sm:$0xff]   ;;  %v8795_v15 = vld [vmem:[%s10111_s7 + $0x3f0] sm:$0xff]   ;;  %v8806_v34 = vld [vmem:[%s10111_s7 + $0x358] sm:$0xff]  }
 0x195   : > { %v8807_v35 = vld [vmem:[%s10111_s7 + $0x3d8] sm:$0xff]  }
 0x196   : > { %8236 = vmatpush3.bf16.msra.mxu0 %v8724_v42  ;;  %v7938_v42 = vcombine.high %v4511_v40, %v4527_v41 }
 0x197   : > { %8264 = vmatpush3.bf16.msra.mxu1 %v8725_v43  ;;  %8277 = vmatprep.subr.bf16.mxu0 %v8726_v46  ;;  %v8768_v43 = vld [vmem:[%s10111_s7 + $0x228] sm:$0xff]   ;;  %v8770_v46 = vld [vmem:[%s10111_s7 + $0x260] sm:$0xff]  }
 0x198   : > { %8305 = vmatprep.subr.bf16.mxu1 %v8727_v47  ;;  %v8771_v47 = vld [vmem:[%s10111_s7 + $0x2e0] sm:$0xff]  }
 0x199   : > { %6941 = vmatmul.mubr.bf16.vlgmr.msra.gmra.mxu0 %v7899_v44  ;;  %v7937_v44 = vcombine.low %v4511_v40, %v4527_v41  ;;  %v8812_v40 = vld [vmem:[%s10111_s7 + $0x310] sm:$0xff]  }
 0x19a   : > { %6990 = vmatmul.mubr.bf16.vlgmr.msra.gmra.mxu1 %v7901_v45  ;;  %8278 = vmatpush3.bf16.msra.mxu0 %v8728_v49  ;;  %v8769_v45 = vld [vmem:[%s10111_s7 + $0x2a8] sm:$0xff]   ;;  %v8773_v49 = vld [vmem:[%s10111_s7 + $0x2a0] sm:$0xff]   ;;  %v8813_v41 = vld [vmem:[%s10111_s7 + $0x390] sm:$0xff]  }
 0x19b   : > { %8306 = vmatpush3.bf16.msra.mxu1 %v8729_v51  ;;  %6948 = vmatprep.mubr.bf16.mxu0 %v7932_v48  ;;  %v8772_v48 = vld [vmem:[%s10111_s7 + $0x220] sm:$0xff]   ;;  %v8775_v51 = vld [vmem:[%s10111_s7 + $0x2d8] sm:$0xff]  }
 0x19c   : > { %8279 = vmatprep.subr.bf16.mxu0 %v8730_v52  ;;  %6997 = vmatprep.mubr.bf16.mxu1 %v7934_v50  ;;  %v8774_v50 = vld [vmem:[%s10111_s7 + $0x258] sm:$0xff]  }
 0x19d   : > { %8307 = vmatprep.subr.bf16.mxu1 %v8731_v53  ;;  %v8776_v52 = vld [vmem:[%s10111_s7 + $0x218] sm:$0xff]  }
 0x19e   : > { %8280 = vmatpush3.bf16.msra.mxu0 %v8732_v54  ;;  %v8777_v53 = vld [vmem:[%s10111_s7 + $0x298] sm:$0xff]   ;;  %v8778_v54 = vld [vmem:[%s10111_s7 + $0x250] sm:$0xff]  }
 0x19f   : > { %8308 = vmatpush3.bf16.msra.mxu1 %v8733_v55  ;;  %8281 = vmatprep.subr.bf16.mxu0 %v8734_v57  ;;  %v8779_v55 = vld [vmem:[%s10111_s7 + $0x2d0] sm:$0xff]  }
 0x1a0   : > { %8309 = vmatprep.subr.bf16.mxu1 %v8735_v59  ;;  %v8781_v57 = vld [vmem:[%s10111_s7 + $0x290] sm:$0xff]   ;;  %v8783_v59 = vld [vmem:[%s10111_s7 + $0x2c8] sm:$0xff]  }
 0x1a1   : > { %6949 = vmatmul.mubr.bf16.gmra.mxu0 %v7931_v56  ;;  %v8780_v56 = vld [vmem:[%s10111_s7 + $0x210] sm:$0xff]  }
 0x1a2   : > { %8282 = vmatpush3.bf16.msra.mxu0 %v8736_v60  ;;  %6998 = vmatmul.mubr.bf16.gmra.mxu1 %v7933_v58  ;;  %v8782_v58 = vld [vmem:[%s10111_s7 + $0x248] sm:$0xff]  }
 0x1a3   : > { %8310 = vmatpush3.bf16.msra.mxu1 %v8737_v61  ;;  %8283 = vmatprep.subr.bf16.mxu0 %v8738_v62  ;;  %v8784_v60 = vld [vmem:[%s10111_s7 + $0x208] sm:$0xff]   ;;  %v8786_v62 = vld [vmem:[%s10111_s7 + $0x240] sm:$0xff]  }
 0x1a4   : > { %8311 = vmatprep.subr.bf16.mxu1 %v8739_v63  ;;  %7038 = vmatprep.mubr.bf16.mxu0 %v7904_v23  ;;  %v8785_v61 = vld [vmem:[%s10111_s7 + $0x288] sm:$0xff]   ;;  %v8787_v63 = vld [vmem:[%s10111_s7 + $0x2c0] sm:$0xff]  }
 0x1a5   : > { %7087 = vmatprep.mubr.bf16.mxu1 %v7906_v25  ;;  %v8799_v23 = vld [vmem:[%s10111_s7 + $0x3e8] sm:$0xff]  }
 0x1a6   : > { %8284 = vmatpush3.bf16.msra.mxu0 %v8740_v0  ;;  %v8788_v0 = vld [vmem:[%s10111_s7 + $0x200] sm:$0xff]   ;;  %v4529_v25 = vld [vmem:[%s10710_s0 + $0x1a8] sm:$0xff] }
 0x1a7   : > { %8312 = vmatpush3.bf16.msra.mxu1 %v8741_v1  ;;  %8285 = vmatprep.subr.bf16.mxu0 %v8742_v2  ;;  %v8789_v1 = vld [vmem:[%s10111_s7 + $0x280] sm:$0xff]  }
 0x1a8   : > { %8313 = vmatprep.subr.bf16.mxu1 %v8743_v3  ;;  %v4480_v2 = vld [vmem:[%s10710_s0 + $0x20] sm:$0xff] }
 0x1a9   : > { %v4496_v3 = vld [vmem:[%s10710_s0 + $0xa0] sm:$0xff] }
 0x1aa   : > { %8286 = vmatpush3.bf16.msra.mxu0 %v8744_v4  ;;  %v7907_v4 = vcombine.low %v4480_v2, %v4496_v3 }
 0x1ab   : > { %8314 = vmatpush3.bf16.msra.mxu1 %v8745_v5  ;;  %8287 = vmatprep.subr.bf16.mxu0 %v8746_v6  ;;  %v7908_v5 = vcombine.high %v4480_v2, %v4496_v3  ;;  %v4481_v6 = vld [vmem:[%s10710_s0 + $0x28] sm:$0xff]  ;;  %v4514_v2 = vld [vmem:[%s10710_s0 + $0x130] sm:$0xff] }
 0x1ac   : > { %8315 = vmatprep.subr.bf16.mxu1 %v8747_v7  ;;  %v4497_v7 = vld [vmem:[%s10710_s0 + $0xa8] sm:$0xff]  ;;  %v4530_v3 = vld [vmem:[%s10710_s0 + $0x1b0] sm:$0xff] }
 0x1ae   : > { %8288 = vmatpush3.bf16.msra.mxu0 %v8748_v8  ;;  %v7909_v8 = vcombine.low %v4481_v6, %v4497_v7 }
 0x1af   : > { %8316 = vmatpush3.bf16.msra.mxu1 %v8749_v9  ;;  %8289 = vmatprep.subr.bf16.mxu0 %v8750_v10  ;;  %v7910_v9 = vcombine.high %v4481_v6, %v4497_v7  ;;  %v8790_v10 = vld [vmem:[%s10111_s7 + $0x378] sm:$0xff]   ;;  %v8830_v6 = vld [vmem:[%s10111_s7 + $0x468] sm:$0xff]  }
 0x1b0   : > { %8317 = vmatprep.subr.bf16.mxu1 %v8751_v11  ;;  %v8791_v11 = vld [vmem:[%s10111_s7 + $0x3f8] sm:$0xff]   ;;  %v8831_v7 = vld [vmem:[%s10111_s7 + $0x4e8] sm:$0xff]  }
 0x1b2   : > { %8290 = vmatpush3.bf16.msra.mxu0 %v8752_v12  ;;  %v8792_v12 = vld [vmem:[%s10111_s7 + $0x338] sm:$0xff]  }
 0x1b3   : > { %8318 = vmatpush3.bf16.msra.mxu1 %v8753_v13  ;;  %8291 = vmatprep.subr.bf16.mxu0 %v8754_v14  ;;  %v8793_v13 = vld [vmem:[%s10111_s7 + $0x3b8] sm:$0xff]   ;;  %v8794_v14 = vld [vmem:[%s10111_s7 + $0x370] sm:$0xff]  }
 0x1b4   : > { %8319 = vmatprep.subr.bf16.mxu1 %v8755_v16  ;;  %v8796_v16 = vld [vmem:[%s10111_s7 + $0x330] sm:$0xff]  }
 0x1b6   : > { %8292 = vmatpush3.bf16.msra.mxu0 %v8756_v17  ;;  %v8797_v17 = vld [vmem:[%s10111_s7 + $0x3b0] sm:$0xff]  }
 0x1b7   : > { %8320 = vmatpush3.bf16.msra.mxu1 %v8757_v18  ;;  %8333 = vmatprep.subr.bf16.mxu0 %v8758_v26  ;;  %v4512_v18 = vld [vmem:[%s10710_s0 + $0x120] sm:$0xff] }
 0x1b8   : > { %8361 = vmatprep.subr.bf16.mxu1 %v8759_v27  ;;  %v7940_v20 = vcombine.high %v4512_v18, %v4528_v19  ;;  %v7939_v21 = vcombine.low %v4512_v18, %v4528_v19  ;;  %v8800_v27 = vld [vmem:[%s10111_s7 + $0x328] sm:$0xff]   ;;  %v8838_v18 = vld [vmem:[%s10111_s7 + $0x458] sm:$0xff]  }
 0x1b9   : > { %7039 = vmatmul.mubr.bf16.vlgmr.msra.gmra.mxu0 %v7903_v22  ;;  %v8798_v22 = vld [vmem:[%s10111_s7 + $0x368] sm:$0xff]   ;;  %v8839_v19 = vld [vmem:[%s10111_s7 + $0x4d8] sm:$0xff]  }
 0x1ba   : > { %7088 = vmatmul.mubr.bf16.vlgmr.msra.gmra.mxu1 %v7905_v24  ;;  %8334 = vmatpush3.bf16.msra.mxu0 %v8760_v28  ;;  %v4513_v24 = vld [vmem:[%s10710_s0 + $0x128] sm:$0xff] }
 0x1bb   : > { %8362 = vmatpush3.bf16.msra.mxu1 %v8761_v29  ;;  %8335 = vmatprep.subr.bf16.mxu0 %v8762_v30  ;;  %v7942_v26 = vcombine.high %v4513_v24, %v4529_v25  ;;  %v7941_v28 = vcombine.low %v4513_v24, %v4529_v25  ;;  %v8801_v29 = vld [vmem:[%s10111_s7 + $0x3a8] sm:$0xff]   ;;  %v8802_v30 = vld [vmem:[%s10111_s7 + $0x360] sm:$0xff]   ;;  %v8844_v24 = vld [vmem:[%s10111_s7 + $0x410] sm:$0xff]  }
 0x1bc   : > { %8363 = vmatprep.subr.bf16.mxu1 %v8763_v31  ;;  %7046 = vmatprep.mubr.bf16.mxu0 %v7936_v36  ;;  %v8803_v31 = vld [vmem:[%s10111_s7 + $0x3e0] sm:$0xff]   ;;  %v8808_v36 = vld [vmem:[%s10111_s7 + $0x318] sm:$0xff]   ;;  %v8845_v25 = vld [vmem:[%s10111_s7 + $0x490] sm:$0xff]  }
 0x1bd   : > { %7095 = vmatprep.mubr.bf16.mxu1 %v7938_v42  ;;  %v8814_v42 = vld [vmem:[%s10111_s7 + $0x348] sm:$0xff]  }
 0x1be   : > { %8336 = vmatpush3.bf16.msra.mxu0 %v8764_v32  ;;  %v8804_v32 = vld [vmem:[%s10111_s7 + $0x320] sm:$0xff]  }
 0x1bf   : > { %8364 = vmatpush3.bf16.msra.mxu1 %v8765_v33  ;;  %8337 = vmatprep.subr.bf16.mxu0 %v8766_v38  ;;  %v8805_v33 = vld [vmem:[%s10111_s7 + $0x3a0] sm:$0xff]   ;;  %v8810_v38 = vld [vmem:[%s10111_s7 + $0x350] sm:$0xff]  }
 0x1c0   : > { %8365 = vmatprep.subr.bf16.mxu1 %v8767_v39  ;;  %v8811_v39 = vld [vmem:[%s10111_s7 + $0x3d0] sm:$0xff]  }
 0x1c1   : > { %7047 = vmatmul.mubr.bf16.gmra.mxu0 %v7935_v37  ;;  %v8809_v37 = vld [vmem:[%s10111_s7 + $0x398] sm:$0xff]  }
 0x1c2   : > { %8338 = vmatpush3.bf16.msra.mxu0 %v8768_v43  ;;  %7096 = vmatmul.mubr.bf16.gmra.mxu1 %v7937_v44  ;;  %v8815_v43 = vld [vmem:[%s10111_s7 + $0x3c8] sm:$0xff]  }
 0x1c3   : > { %8366 = vmatpush3.bf16.msra.mxu1 %v8769_v45  ;;  %8339 = vmatprep.subr.bf16.mxu0 %v8770_v46  ;;  %v8816_v44 = vld [vmem:[%s10111_s7 + $0x308] sm:$0xff]   ;;  %v8818_v46 = vld [vmem:[%s10111_s7 + $0x340] sm:$0xff]  }
 0x1c4   : > { %8367 = vmatprep.subr.bf16.mxu1 %v8771_v47  ;;  %7136 = vmatprep.mubr.bf16.mxu0 %v7908_v5  ;;  %v8817_v45 = vld [vmem:[%s10111_s7 + $0x388] sm:$0xff]   ;;  %v8819_v47 = vld [vmem:[%s10111_s7 + $0x3c0] sm:$0xff]   ;;  %v7943_v5 = vcombine.low %v4514_v2, %v4530_v3 }
 0x1c5   : > { %7185 = vmatprep.mubr.bf16.mxu1 %v7910_v9  ;;  %v4531_v9 = vld [vmem:[%s10710_s0 + $0x1b8] sm:$0xff] }
 0x1c6   : > { %8340 = vmatpush3.bf16.msra.mxu0 %v8772_v48  ;;  %v8820_v48 = vld [vmem:[%s10111_s7 + $0x300] sm:$0xff]  }
 0x1c7   : > { %8368 = vmatpush3.bf16.msra.mxu1 %v8773_v49  ;;  %8341 = vmatprep.subr.bf16.mxu0 %v8774_v50  ;;  %v8821_v49 = vld [vmem:[%s10111_s7 + $0x380] sm:$0xff]   ;;  %v4482_v50 = vld [vmem:[%s10710_s0 + $0x30] sm:$0xff] }
 0x1c8   : > { %8369 = vmatprep.subr.bf16.mxu1 %v8775_v51  ;;  %v4498_v51 = vld [vmem:[%s10710_s0 + $0xb0] sm:$0xff] }
 0x1ca   : > { %8342 = vmatpush3.bf16.msra.mxu0 %v8776_v52  ;;  %v4483_v52 = vld [vmem:[%s10710_s0 + $0x38] sm:$0xff] }
 0x1cb   : > { %8370 = vmatpush3.bf16.msra.mxu1 %v8777_v53  ;;  %8343 = vmatprep.subr.bf16.mxu0 %v8778_v54  ;;  %v7911_v53 = vcombine.low %v4482_v50, %v4498_v51  ;;  %v7912_v54 = vcombine.high %v4482_v50, %v4498_v51  ;;  %v4516_v50 = vld [vmem:[%s10710_s0 + $0x140] sm:$0xff] }
 0x1cc   : > { %8371 = vmatprep.subr.bf16.mxu1 %v8779_v55  ;;  %v4499_v55 = vld [vmem:[%s10710_s0 + $0xb8] sm:$0xff]  ;;  %v4532_v51 = vld [vmem:[%s10710_s0 + $0x1c0] sm:$0xff] }
 0x1ce   : > { %8344 = vmatpush3.bf16.msra.mxu0 %v8780_v56  ;;  %v7913_v56 = vcombine.low %v4483_v52, %v4499_v55 }
 0x1cf   : > { %8372 = vmatpush3.bf16.msra.mxu1 %v8781_v57  ;;  %8345 = vmatprep.subr.bf16.mxu0 %v8782_v58  ;;  %v7914_v57 = vcombine.high %v4483_v52, %v4499_v55  ;;  %v8822_v58 = vld [vmem:[%s10111_s7 + $0x478] sm:$0xff]   ;;  %v7948_v52 = vcombine.high %v4516_v50, %v4532_v51  ;;  %v8863_v55 = vld [vmem:[%s10111_s7 + $0x5e8] sm:$0xff]  }
 0x1d0   : > { %8373 = vmatprep.subr.bf16.mxu1 %v8783_v59  ;;  %v8823_v59 = vld [vmem:[%s10111_s7 + $0x4f8] sm:$0xff]  }
 0x1d2   : > { %8346 = vmatpush3.bf16.msra.mxu0 %v8784_v60  ;;  %v8824_v60 = vld [vmem:[%s10111_s7 + $0x438] sm:$0xff]  }
 0x1d3   : > { %8374 = vmatpush3.bf16.msra.mxu1 %v8785_v61  ;;  %8347 = vmatprep.subr.bf16.mxu0 %v8786_v62  ;;  %v8825_v61 = vld [vmem:[%s10111_s7 + $0x4b8] sm:$0xff]   ;;  %v8826_v62 = vld [vmem:[%s10111_s7 + $0x470] sm:$0xff]  }
 0x1d4   : > { %8375 = vmatprep.subr.bf16.mxu1 %v8787_v63  ;;  %v8827_v63 = vld [vmem:[%s10111_s7 + $0x4f0] sm:$0xff]  }
 0x1d6   : > { %8348 = vmatpush3.bf16.msra.mxu0 %v8788_v0  ;;  %v8828_v0 = vld [vmem:[%s10111_s7 + $0x430] sm:$0xff]  }
 0x1d7   : > { %8376 = vmatpush3.bf16.msra.mxu1 %v8789_v1  ;;  %8389 = vmatprep.subr.bf16.mxu0 %v8790_v10  ;;  %v8829_v1 = vld [vmem:[%s10111_s7 + $0x4b0] sm:$0xff]  }
 0x1d8   : > { %8417 = vmatprep.subr.bf16.mxu1 %v8791_v11  ;;  %v8832_v11 = vld [vmem:[%s10111_s7 + $0x428] sm:$0xff]  }
 0x1d9   : > { %7137 = vmatmul.mubr.bf16.vlgmr.msra.gmra.mxu0 %v7907_v4  ;;  %v7944_v4 = vcombine.high %v4514_v2, %v4530_v3  ;;  %v8870_v2 = vld [vmem:[%s10111_s7 + $0x558] sm:$0xff]  }
 0x1da   : > { %7186 = vmatmul.mubr.bf16.vlgmr.msra.gmra.mxu1 %v7909_v8  ;;  %8390 = vmatpush3.bf16.msra.mxu0 %v8792_v12  ;;  %v4515_v8 = vld [vmem:[%s10710_s0 + $0x138] sm:$0xff] }
 0x1db   : > { %8418 = vmatpush3.bf16.msra.mxu1 %v8793_v13  ;;  %8391 = vmatprep.subr.bf16.mxu0 %v8794_v14  ;;  %v7946_v10 = vcombine.high %v4515_v8, %v4531_v9  ;;  %v7945_v12 = vcombine.low %v4515_v8, %v4531_v9  ;;  %v8833_v13 = vld [vmem:[%s10111_s7 + $0x4a8] sm:$0xff]   ;;  %v8834_v14 = vld [vmem:[%s10111_s7 + $0x460] sm:$0xff]   ;;  %v8871_v3 = vld [vmem:[%s10111_s7 + $0x5d8] sm:$0xff]  }
 0x1dc   : > { %8419 = vmatprep.subr.bf16.mxu1 %v8795_v15  ;;  %7144 = vmatprep.mubr.bf16.mxu0 %v7940_v20  ;;  %v8835_v15 = vld [vmem:[%s10111_s7 + $0x4e0] sm:$0xff]   ;;  %v8840_v20 = vld [vmem:[%s10111_s7 + $0x418] sm:$0xff]   ;;  %v8876_v8 = vld [vmem:[%s10111_s7 + $0x510] sm:$0xff]  }
 0x1dd   : > { %7193 = vmatprep.mubr.bf16.mxu1 %v7942_v26  ;;  %v8846_v26 = vld [vmem:[%s10111_s7 + $0x448] sm:$0xff]   ;;  %v8877_v9 = vld [vmem:[%s10111_s7 + $0x590] sm:$0xff]  }
 0x1de   : > { %8392 = vmatpush3.bf16.msra.mxu0 %v8796_v16  ;;  %v8836_v16 = vld [vmem:[%s10111_s7 + $0x420] sm:$0xff]  }
 0x1df   : > { %8420 = vmatpush3.bf16.msra.mxu1 %v8797_v17  ;;  %8393 = vmatprep.subr.bf16.mxu0 %v8798_v22  ;;  %v8837_v17 = vld [vmem:[%s10111_s7 + $0x4a0] sm:$0xff]   ;;  %v8842_v22 = vld [vmem:[%s10111_s7 + $0x450] sm:$0xff]  }
 0x1e0   : > { %8421 = vmatprep.subr.bf16.mxu1 %v8799_v23  ;;  %v8843_v23 = vld [vmem:[%s10111_s7 + $0x4d0] sm:$0xff]  }
 0x1e1   : > { %7145 = vmatmul.mubr.bf16.gmra.mxu0 %v7939_v21  ;;  %v8841_v21 = vld [vmem:[%s10111_s7 + $0x498] sm:$0xff]  }
 0x1e2   : > { %8394 = vmatpush3.bf16.msra.mxu0 %v8800_v27  ;;  %7194 = vmatmul.mubr.bf16.gmra.mxu1 %v7941_v28  ;;  %v8847_v27 = vld [vmem:[%s10111_s7 + $0x4c8] sm:$0xff]  }
 0x1e3   : > { %8422 = vmatpush3.bf16.msra.mxu1 %v8801_v29  ;;  %8395 = vmatprep.subr.bf16.mxu0 %v8802_v30  ;;  %v8848_v28 = vld [vmem:[%s10111_s7 + $0x408] sm:$0xff]   ;;  %v8850_v30 = vld [vmem:[%s10111_s7 + $0x440] sm:$0xff]  }
 0x1e4   : > { %8423 = vmatprep.subr.bf16.mxu1 %v8803_v31  ;;  %7234 = vmatprep.mubr.bf16.mxu0 %v7912_v54  ;;  %v8849_v29 = vld [vmem:[%s10111_s7 + $0x488] sm:$0xff]   ;;  %v8851_v31 = vld [vmem:[%s10111_s7 + $0x4c0] sm:$0xff]  }
 0x1e5   : > { %7283 = vmatprep.mubr.bf16.mxu1 %v7914_v57  ;;  %v8862_v54 = vld [vmem:[%s10111_s7 + $0x568] sm:$0xff]  }
 0x1e6   : > { %8396 = vmatpush3.bf16.msra.mxu0 %v8804_v32  ;;  %v8852_v32 = vld [vmem:[%s10111_s7 + $0x400] sm:$0xff]   ;;  %v4533_v57 = vld [vmem:[%s10710_s0 + $0x1c8] sm:$0xff] }
 0x1e7   : > { %8424 = vmatpush3.bf16.msra.mxu1 %v8805_v33  ;;  %8397 = vmatprep.subr.bf16.mxu0 %v8806_v34  ;;  %v8853_v33 = vld [vmem:[%s10111_s7 + $0x480] sm:$0xff]  }
 0x1e8   : > { %8425 = vmatprep.subr.bf16.mxu1 %v8807_v35  ;;  %v4484_v34 = vld [vmem:[%s10710_s0 + $0x40] sm:$0xff] }
 0x1e9   : > { %v4500_v35 = vld [vmem:[%s10710_s0 + $0xc0] sm:$0xff] }
 0x1ea   : > { %8398 = vmatpush3.bf16.msra.mxu0 %v8808_v36  ;;  %v4485_v36 = vld [vmem:[%s10710_s0 + $0x48] sm:$0xff] }
 0x1eb   : > { %8426 = vmatpush3.bf16.msra.mxu1 %v8809_v37  ;;  %8399 = vmatprep.subr.bf16.mxu0 %v8810_v38  ;;  %v4501_v37 = vld [vmem:[%s10710_s0 + $0xc8] sm:$0xff]  ;;  %v7915_v38 = vcombine.low %v4484_v34, %v4500_v35 }
 0x1ec   : > { %8427 = vmatprep.subr.bf16.mxu1 %v8811_v39  ;;  %v7916_v39 = vcombine.high %v4484_v34, %v4500_v35  ;;  %v4518_v34 = vld [vmem:[%s10710_s0 + $0x150] sm:$0xff] }
 0x1ed   : > { %v4534_v35 = vld [vmem:[%s10710_s0 + $0x1d0] sm:$0xff] }
 0x1ee   : > { %8400 = vmatpush3.bf16.msra.mxu0 %v8812_v40  ;;  %v7917_v40 = vcombine.low %v4485_v36, %v4501_v37 }
 0x1ef   : > { %8428 = vmatpush3.bf16.msra.mxu1 %v8813_v41  ;;  %8401 = vmatprep.subr.bf16.mxu0 %v8814_v42  ;;  %v7918_v41 = vcombine.high %v4485_v36, %v4501_v37  ;;  %v8854_v42 = vld [vmem:[%s10111_s7 + $0x578] sm:$0xff]   ;;  %v7952_v36 = vcombine.high %v4518_v34, %v4534_v35  ;;  %v7951_v37 = vcombine.low %v4518_v34, %v4534_v35 }
 0x1f0   : > { %8429 = vmatprep.subr.bf16.mxu1 %v8815_v43  ;;  %v8855_v43 = vld [vmem:[%s10111_s7 + $0x5f8] sm:$0xff]  }
 0x1f1   : > { %v8920_v34 = vld [vmem:[%s10111_s7 + $0x738] sm:$0xff]  }
 0x1f2   : > { %8402 = vmatpush3.bf16.msra.mxu0 %v8816_v44  ;;  %v8856_v44 = vld [vmem:[%s10111_s7 + $0x538] sm:$0xff]  }
 0x1f3   : > { %8430 = vmatpush3.bf16.msra.mxu1 %v8817_v45  ;;  %8403 = vmatprep.subr.bf16.mxu0 %v8818_v46  ;;  %v8857_v45 = vld [vmem:[%s10111_s7 + $0x5b8] sm:$0xff]   ;;  %v8858_v46 = vld [vmem:[%s10111_s7 + $0x570] sm:$0xff]  }
 0x1f4   : > { %8431 = vmatprep.subr.bf16.mxu1 %v8819_v47  ;;  %v8859_v47 = vld [vmem:[%s10111_s7 + $0x5f0] sm:$0xff]  }
 0x1f6   : > { %8404 = vmatpush3.bf16.msra.mxu0 %v8820_v48  ;;  %v8860_v48 = vld [vmem:[%s10111_s7 + $0x530] sm:$0xff]  }
 0x1f7   : > { %8432 = vmatpush3.bf16.msra.mxu1 %v8821_v49  ;;  %8445 = vmatprep.subr.bf16.mxu0 %v8822_v58  ;;  %v8861_v49 = vld [vmem:[%s10111_s7 + $0x5b0] sm:$0xff]  }
 0x1f8   : > { %8473 = vmatprep.subr.bf16.mxu1 %v8823_v59  ;;  %v8864_v59 = vld [vmem:[%s10111_s7 + $0x528] sm:$0xff]  }
 0x1f9   : > { %7235 = vmatmul.mubr.bf16.vlgmr.msra.gmra.mxu0 %v7911_v53  ;;  %v7947_v53 = vcombine.low %v4516_v50, %v4532_v51  ;;  %v8902_v50 = vld [vmem:[%s10111_s7 + $0x658] sm:$0xff]  }
 0x1fa   : > { %7284 = vmatmul.mubr.bf16.vlgmr.msra.gmra.mxu1 %v7913_v56  ;;  %8446 = vmatpush3.bf16.msra.mxu0 %v8824_v60  ;;  %v4517_v56 = vld [vmem:[%s10710_s0 + $0x148] sm:$0xff]  ;;  %v8903_v51 = vld [vmem:[%s10111_s7 + $0x6d8] sm:$0xff]  }
 0x1fb   : > { %8474 = vmatpush3.bf16.msra.mxu1 %v8825_v61  ;;  %8447 = vmatprep.subr.bf16.mxu0 %v8826_v62  ;;  %v7950_v58 = vcombine.high %v4517_v56, %v4533_v57  ;;  %v7949_v60 = vcombine.low %v4517_v56, %v4533_v57  ;;  %v8865_v61 = vld [vmem:[%s10111_s7 + $0x5a8] sm:$0xff]   ;;  %v8866_v62 = vld [vmem:[%s10111_s7 + $0x560] sm:$0xff]   ;;  %v8908_v56 = vld [vmem:[%s10111_s7 + $0x610] sm:$0xff]  }
 0x1fc   : > { %8475 = vmatprep.subr.bf16.mxu1 %v8827_v63  ;;  %7242 = vmatprep.mubr.bf16.mxu0 %v7944_v4  ;;  %v8867_v63 = vld [vmem:[%s10111_s7 + $0x5e0] sm:$0xff]   ;;  %v8872_v4 = vld [vmem:[%s10111_s7 + $0x518] sm:$0xff]  }
 0x1fd   : > { %7291 = vmatprep.mubr.bf16.mxu1 %v7946_v10  ;;  %v8878_v10 = vld [vmem:[%s10111_s7 + $0x548] sm:$0xff]  }
 0x1fe   : > { %8448 = vmatpush3.bf16.msra.mxu0 %v8828_v0  ;;  %v8868_v0 = vld [vmem:[%s10111_s7 + $0x520] sm:$0xff]  }
 0x1ff   : > { %8476 = vmatpush3.bf16.msra.mxu1 %v8829_v1  ;;  %8449 = vmatprep.subr.bf16.mxu0 %v8830_v6  ;;  %v8869_v1 = vld [vmem:[%s10111_s7 + $0x5a0] sm:$0xff]   ;;  %v8874_v6 = vld [vmem:[%s10111_s7 + $0x550] sm:$0xff]  }
 0x200   : > { %8477 = vmatprep.subr.bf16.mxu1 %v8831_v7  ;;  %v8875_v7 = vld [vmem:[%s10111_s7 + $0x5d0] sm:$0xff]  }
 0x201   : > { %7243 = vmatmul.mubr.bf16.gmra.mxu0 %v7943_v5  ;;  %v8873_v5 = vld [vmem:[%s10111_s7 + $0x598] sm:$0xff]  }
 0x202   : > { %8450 = vmatpush3.bf16.msra.mxu0 %v8832_v11  ;;  %7292 = vmatmul.mubr.bf16.gmra.mxu1 %v7945_v12  ;;  %v8879_v11 = vld [vmem:[%s10111_s7 + $0x5c8] sm:$0xff]  }
 0x203   : > { %8478 = vmatpush3.bf16.msra.mxu1 %v8833_v13  ;;  %8451 = vmatprep.subr.bf16.mxu0 %v8834_v14  ;;  %v8880_v12 = vld [vmem:[%s10111_s7 + $0x508] sm:$0xff]   ;;  %v8882_v14 = vld [vmem:[%s10111_s7 + $0x540] sm:$0xff]  }
 0x204   : > { %8479 = vmatprep.subr.bf16.mxu1 %v8835_v15  ;;  %7332 = vmatprep.mubr.bf16.mxu0 %v7916_v39  ;;  %v8881_v13 = vld [vmem:[%s10111_s7 + $0x588] sm:$0xff]   ;;  %v8883_v15 = vld [vmem:[%s10111_s7 + $0x5c0] sm:$0xff]  }
 0x205   : > { %7381 = vmatprep.mubr.bf16.mxu1 %v7918_v41  ;;  %v8895_v39 = vld [vmem:[%s10111_s7 + $0x6e8] sm:$0xff]   ;;  %v4535_v41 = vld [vmem:[%s10710_s0 + $0x1d8] sm:$0xff] }
 0x206   : > { %8452 = vmatpush3.bf16.msra.mxu0 %v8836_v16  ;;  %v8884_v16 = vld [vmem:[%s10111_s7 + $0x500] sm:$0xff]  }
 0x207   : > { %8480 = vmatpush3.bf16.msra.mxu1 %v8837_v17  ;;  %8453 = vmatprep.subr.bf16.mxu0 %v8838_v18  ;;  %v8885_v17 = vld [vmem:[%s10111_s7 + $0x580] sm:$0xff]   ;;  %v4486_v18 = vld [vmem:[%s10710_s0 + $0x50] sm:$0xff] }
 0x208   : > { %8481 = vmatprep.subr.bf16.mxu1 %v8839_v19  ;;  %v4502_v19 = vld [vmem:[%s10710_s0 + $0xd0] sm:$0xff] }
 0x20a   : > { %8454 = vmatpush3.bf16.msra.mxu0 %v8840_v20  ;;  %v7919_v20 = vcombine.low %v4486_v18, %v4502_v19 }
 0x20b   : > { %8482 = vmatpush3.bf16.msra.mxu1 %v8841_v21  ;;  %8455 = vmatprep.subr.bf16.mxu0 %v8842_v22  ;;  %v7920_v21 = vcombine.high %v4486_v18, %v4502_v19  ;;  %v4487_v22 = vld [vmem:[%s10710_s0 + $0x58] sm:$0xff]  ;;  %v4504_v18 = vld [vmem:[%s10710_s0 + $0xe0] sm:$0xff]  ;;  %v4489_v19 = vld [vmem:[%s10710_s0 + $0x68] sm:$0xff] }
 0x20c   : > { %8483 = vmatprep.subr.bf16.mxu1 %v8843_v23  ;;  %v4503_v23 = vld [vmem:[%s10710_s0 + $0xd8] sm:$0xff] }
 0x20e   : > { %8456 = vmatpush3.bf16.msra.mxu0 %v8844_v24  ;;  %v7921_v24 = vcombine.low %v4487_v22, %v4503_v23 }
 0x20f   : > { %8484 = vmatpush3.bf16.msra.mxu1 %v8845_v25  ;;  %8457 = vmatprep.subr.bf16.mxu0 %v8846_v26  ;;  %v7922_v25 = vcombine.high %v4487_v22, %v4503_v23  ;;  %v8886_v26 = vld [vmem:[%s10111_s7 + $0x678] sm:$0xff]  }
 0x210   : > { %8485 = vmatprep.subr.bf16.mxu1 %v8847_v27  ;;  %v8887_v27 = vld [vmem:[%s10111_s7 + $0x6f8] sm:$0xff]  }
 0x212   : > { %8458 = vmatpush3.bf16.msra.mxu0 %v8848_v28  ;;  %v8888_v28 = vld [vmem:[%s10111_s7 + $0x638] sm:$0xff]  }
 0x213   : > { %8486 = vmatpush3.bf16.msra.mxu1 %v8849_v29  ;;  %8459 = vmatprep.subr.bf16.mxu0 %v8850_v30  ;;  %v8889_v29 = vld [vmem:[%s10111_s7 + $0x6b8] sm:$0xff]   ;;  %v8890_v30 = vld [vmem:[%s10111_s7 + $0x670] sm:$0xff]  }
 0x214   : > { %8487 = vmatprep.subr.bf16.mxu1 %v8851_v31  ;;  %v8891_v31 = vld [vmem:[%s10111_s7 + $0x6f0] sm:$0xff]  }
 0x216   : > { %8460 = vmatpush3.bf16.msra.mxu0 %v8852_v32  ;;  %v8892_v32 = vld [vmem:[%s10111_s7 + $0x630] sm:$0xff]  }
 0x217   : > { %8488 = vmatpush3.bf16.msra.mxu1 %v8853_v33  ;;  %8501 = vmatprep.subr.bf16.mxu0 %v8854_v42  ;;  %v8893_v33 = vld [vmem:[%s10111_s7 + $0x6b0] sm:$0xff]  }
 0x218   : > { %8529 = vmatprep.subr.bf16.mxu1 %v8855_v43  ;;  %v8896_v43 = vld [vmem:[%s10111_s7 + $0x628] sm:$0xff]  }
 0x219   : > { %7333 = vmatmul.mubr.bf16.vlgmr.msra.gmra.mxu0 %v7915_v38  ;;  %v8894_v38 = vld [vmem:[%s10111_s7 + $0x668] sm:$0xff]  }
 0x21a   : > { %7382 = vmatmul.mubr.bf16.vlgmr.msra.gmra.mxu1 %v7917_v40  ;;  %8502 = vmatpush3.bf16.msra.mxu0 %v8856_v44  ;;  %v4519_v40 = vld [vmem:[%s10710_s0 + $0x158] sm:$0xff] }
 0x21b   : > { %8530 = vmatpush3.bf16.msra.mxu1 %v8857_v45  ;;  %8503 = vmatprep.subr.bf16.mxu0 %v8858_v46  ;;  %v7954_v42 = vcombine.high %v4519_v40, %v4535_v41  ;;  %v7953_v44 = vcombine.low %v4519_v40, %v4535_v41  ;;  %v8897_v45 = vld [vmem:[%s10111_s7 + $0x6a8] sm:$0xff]   ;;  %v8898_v46 = vld [vmem:[%s10111_s7 + $0x660] sm:$0xff]   ;;  %v8922_v40 = vld [vmem:[%s10111_s7 + $0x770] sm:$0xff]  }
 0x21c   : > { %8531 = vmatprep.subr.bf16.mxu1 %v8859_v47  ;;  %7340 = vmatprep.mubr.bf16.mxu0 %v7948_v52  ;;  %v8899_v47 = vld [vmem:[%s10111_s7 + $0x6e0] sm:$0xff]   ;;  %v8904_v52 = vld [vmem:[%s10111_s7 + $0x618] sm:$0xff]  }
 0x21d   : > { %7389 = vmatprep.mubr.bf16.mxu1 %v7950_v58  ;;  %v8909_v58 = vld [vmem:[%s10111_s7 + $0x690] sm:$0xff]  }
 0x21e   : > { %8504 = vmatpush3.bf16.msra.mxu0 %v8860_v48  ;;  %v8900_v48 = vld [vmem:[%s10111_s7 + $0x620] sm:$0xff]  }
 0x21f   : > { %8532 = vmatpush3.bf16.msra.mxu1 %v8861_v49  ;;  %8505 = vmatprep.subr.bf16.mxu0 %v8862_v54  ;;  %v8901_v49 = vld [vmem:[%s10111_s7 + $0x6a0] sm:$0xff]   ;;  %v8906_v54 = vld [vmem:[%s10111_s7 + $0x650] sm:$0xff]  }
 0x220   : > { %8533 = vmatprep.subr.bf16.mxu1 %v8863_v55  ;;  %v8907_v55 = vld [vmem:[%s10111_s7 + $0x6d0] sm:$0xff]  }
 0x221   : > { %7341 = vmatmul.mubr.bf16.gmra.mxu0 %v7947_v53  ;;  %v8905_v53 = vld [vmem:[%s10111_s7 + $0x698] sm:$0xff]  }
 0x222   : > { %8506 = vmatpush3.bf16.msra.mxu0 %v8864_v59  ;;  %7390 = vmatmul.mubr.bf16.gmra.mxu1 %v7949_v60  ;;  %v8910_v60 = vld [vmem:[%s10111_s7 + $0x648] sm:$0xff]  }
 0x223   : > { %8534 = vmatpush3.bf16.msra.mxu1 %v8865_v61  ;;  %8507 = vmatprep.subr.bf16.mxu0 %v8866_v62  ;;  %v8911_v62 = vld [vmem:[%s10111_s7 + $0x6c8] sm:$0xff]  }
 0x224   : > { %8535 = vmatprep.subr.bf16.mxu1 %v8867_v63  ;;  %7430 = vmatprep.mubr.bf16.mxu0 %v7920_v21 }
 0x225   : > { %7479 = vmatprep.mubr.bf16.mxu1 %v7922_v25 }
 0x226   : > { %8508 = vmatpush3.bf16.msra.mxu0 %v8868_v0 }
 0x227   : > { %8536 = vmatpush3.bf16.msra.mxu1 %v8869_v1  ;;  %8509 = vmatprep.subr.bf16.mxu0 %v8870_v2  ;;  %v8912_v1 = vld [vmem:[%s10111_s7 + $0x608] sm:$0xff]  }
 0x228   : > { %8537 = vmatprep.subr.bf16.mxu1 %v8871_v3 }
 0x22a   : > { %8510 = vmatpush3.bf16.msra.mxu0 %v8872_v4  ;;  %v8913_v4 = vld [vmem:[%s10111_s7 + $0x688] sm:$0xff]  }
 0x22b   : > { %8538 = vmatpush3.bf16.msra.mxu1 %v8873_v5  ;;  %8511 = vmatprep.subr.bf16.mxu0 %v8874_v6  ;;  %v8914_v6 = vld [vmem:[%s10111_s7 + $0x640] sm:$0xff]  }
 0x22c   : > { %8539 = vmatprep.subr.bf16.mxu1 %v8875_v7 }
 0x22e   : > { %8512 = vmatpush3.bf16.msra.mxu0 %v8876_v8 }
 0x22f   : > { %8540 = vmatpush3.bf16.msra.mxu1 %v8877_v9  ;;  %8513 = vmatprep.subr.bf16.mxu0 %v8878_v10  ;;  %v8915_v9 = vld [vmem:[%s10111_s7 + $0x6c0] sm:$0xff]  }
 0x230   : > { %8541 = vmatprep.subr.bf16.mxu1 %v8879_v11 }
 0x232   : > { %8514 = vmatpush3.bf16.msra.mxu0 %v8880_v12  ;;  %v8916_v12 = vld [vmem:[%s10111_s7 + $0x600] sm:$0xff]  }
 0x233   : > { %8542 = vmatpush3.bf16.msra.mxu1 %v8881_v13  ;;  %8515 = vmatprep.subr.bf16.mxu0 %v8882_v14 }
 0x234   : > { %8543 = vmatprep.subr.bf16.mxu1 %v8883_v15  ;;  %v8917_v15 = vld [vmem:[%s10111_s7 + $0x680] sm:$0xff]  }
 0x236   : > { %8516 = vmatpush3.bf16.msra.mxu0 %v8884_v16 }
 0x237   : > { %8544 = vmatpush3.bf16.msra.mxu1 %v8885_v17  ;;  %8557 = vmatprep.subr.bf16.mxu0 %v8886_v26  ;;  %v4488_v17 = vld [vmem:[%s10710_s0 + $0x60] sm:$0xff] }
 0x238   : > { %8585 = vmatprep.subr.bf16.mxu1 %v8887_v27  ;;  %v7923_v22 = vcombine.low %v4488_v17, %v4504_v18  ;;  %v7924_v23 = vcombine.high %v4488_v17, %v4504_v18  ;;  %v8944_v18 = vld [vmem:[%s10111_s7 + $0x708] sm:$0xff]  }
 0x239   : > { %7431 = vmatmul.mubr.bf16.vlgmr.msra.gmra.mxu0 %v7919_v20 }
 0x23a   : > { %7480 = vmatmul.mubr.bf16.vlgmr.msra.gmra.mxu1 %v7921_v24  ;;  %8558 = vmatpush3.bf16.msra.mxu0 %v8888_v28  ;;  %v4505_v24 = vld [vmem:[%s10710_s0 + $0xe8] sm:$0xff] }
 0x23b   : > { %8586 = vmatpush3.bf16.msra.mxu1 %v8889_v29  ;;  %8559 = vmatprep.subr.bf16.mxu0 %v8890_v30  ;;  %v7925_v27 = vcombine.low %v4489_v19, %v4505_v24  ;;  %v7926_v28 = vcombine.high %v4489_v19, %v4505_v24  ;;  %v8918_v29 = vld [vmem:[%s10111_s7 + $0x778] sm:$0xff]  }
 0x23c   : > { %8587 = vmatprep.subr.bf16.mxu1 %v8891_v31  ;;  %7438 = vmatprep.mubr.bf16.mxu0 %v7952_v36 }
 0x23d   : > { %7487 = vmatprep.mubr.bf16.mxu1 %v7954_v42  ;;  %v8923_v42 = vld [vmem:[%s10111_s7 + $0x7f0] sm:$0xff]  }
 0x23e   : > { %8560 = vmatpush3.bf16.msra.mxu0 %v8892_v32  ;;  %v8919_v32 = vld [vmem:[%s10111_s7 + $0x7f8] sm:$0xff]  }
 0x23f   : > { %8588 = vmatpush3.bf16.msra.mxu1 %v8893_v33  ;;  %8561 = vmatprep.subr.bf16.mxu0 %v8894_v38 }
 0x240   : > { %8589 = vmatprep.subr.bf16.mxu1 %v8895_v39 }
 0x241   : > { %7439 = vmatmul.mubr.bf16.gmra.mxu0 %v7951_v37  ;;  %v8921_v37 = vld [vmem:[%s10111_s7 + $0x7b8] sm:$0xff]  }
 0x242   : > { %8562 = vmatpush3.bf16.msra.mxu0 %v8896_v43  ;;  %7488 = vmatmul.mubr.bf16.gmra.mxu1 %v7953_v44  ;;  %v8924_v43 = vld [vmem:[%s10111_s7 + $0x730] sm:$0xff]  }
 0x243   : > { %8590 = vmatpush3.bf16.msra.mxu1 %v8897_v45  ;;  %8563 = vmatprep.subr.bf16.mxu0 %v8898_v46  ;;  %v8925_v45 = vld [vmem:[%s10111_s7 + $0x7b0] sm:$0xff]   ;;  %v4520_v46 = vld [vmem:[%s10710_s0 + $0x160] sm:$0xff] }
 0x244   : > { %8591 = vmatprep.subr.bf16.mxu1 %v8899_v47  ;;  %7528 = vmatprep.mubr.bf16.mxu0 %v7924_v23  ;;  %v4536_v47 = vld [vmem:[%s10710_s0 + $0x1e0] sm:$0xff] }
 0x245   : > { %7577 = vmatprep.mubr.bf16.mxu1 %v7926_v28 }
 0x246   : > { %8564 = vmatpush3.bf16.msra.mxu0 %v8900_v48  ;;  %v7956_v48 = vcombine.high %v4520_v46, %v4536_v47 }
 0x247   : > { %8592 = vmatpush3.bf16.msra.mxu1 %v8901_v49  ;;  %8565 = vmatprep.subr.bf16.mxu0 %v8902_v50  ;;  %v7955_v49 = vcombine.low %v4520_v46, %v4536_v47  ;;  %v8926_v50 = vld [vmem:[%s10111_s7 + $0x768] sm:$0xff]  }
 0x248   : > { %8593 = vmatprep.subr.bf16.mxu1 %v8903_v51  ;;  %v8927_v51 = vld [vmem:[%s10111_s7 + $0x7e8] sm:$0xff]  }
 0x24a   : > { %8566 = vmatpush3.bf16.msra.mxu0 %v8904_v52  ;;  %v4521_v52 = vld [vmem:[%s10710_s0 + $0x168] sm:$0xff] }
 0x24b   : > { %8594 = vmatpush3.bf16.msra.mxu1 %v8905_v53  ;;  %8567 = vmatprep.subr.bf16.mxu0 %v8906_v54  ;;  %v4537_v53 = vld [vmem:[%s10710_s0 + $0x1e8] sm:$0xff] }
 0x24c   : > { %8595 = vmatprep.subr.bf16.mxu1 %v8907_v55  ;;  %v7958_v54 = vcombine.high %v4521_v52, %v4537_v53  ;;  %v8928_v55 = vld [vmem:[%s10111_s7 + $0x728] sm:$0xff]  }
 0x24e   : > { %8568 = vmatpush3.bf16.msra.mxu0 %v8908_v56  ;;  %v7957_v56 = vcombine.low %v4521_v52, %v4537_v53 }
 0x24f   : > { %8596 = vmatpush3.bf16.msra.mxu1 %v8909_v58  ;;  %8569 = vmatprep.subr.bf16.mxu0 %v8910_v60  ;;  %v8930_v58 = vld [vmem:[%s10111_s7 + $0x760] sm:$0xff]  }
 0x250   : > { %8597 = vmatprep.subr.bf16.mxu1 %v8911_v62  ;;  %v8932_v60 = vld [vmem:[%s10111_s7 + $0x720] sm:$0xff]   ;;  %v8934_v62 = vld [vmem:[%s10111_s7 + $0x758] sm:$0xff]  }
 0x252   : > { %8570 = vmatpush3.bf16.msra.mxu0 %v8912_v1  ;;  %v8937_v1 = vld [vmem:[%s10111_s7 + $0x798] sm:$0xff]  }
 0x253   : > { %8598 = vmatpush3.bf16.msra.mxu1 %v8913_v4  ;;  %8571 = vmatprep.subr.bf16.mxu0 %v8914_v6  ;;  %v8940_v6 = vld [vmem:[%s10111_s7 + $0x710] sm:$0xff]  }
 0x254   : > { %8599 = vmatprep.subr.bf16.mxu1 %v8915_v9 }
 0x256   : > { %8572 = vmatpush3.bf16.msra.mxu0 %v8916_v12 }
 0x257   : > { %8600 = vmatpush3.bf16.msra.mxu1 %v8917_v15  ;;  %8613 = vmatprep.subr.bf16.mxu0 %v8918_v29 }
 0x258   : > { %8641 = vmatprep.subr.bf16.mxu1 %v8919_v32 }
 0x259   : > { %v8237_v57 = vpop.f32.mrf.mxu0  ;;  %7529 = vmatmul.mubr.bf16.vlgmr.msra.gmra.mxu0 %v7923_v22  ;;  %v8945_v22 = vld [vmem:[%s10111_s7 + $0x788] sm:$0xff]  }
 0x25a   : > { %v8265_v59 = vpop.f32.mrf.mxu1  ;;  %7578 = vmatmul.mubr.bf16.vlgmr.msra.gmra.mxu1 %v7925_v27  ;;  %8614 = vmatpush3.bf16.msra.mxu0 %v8920_v34  ;;  %v8947_v27 = vld [vmem:[%s10111_s7 + $0x7c0] sm:$0xff]   ;;  %v4506_v34 = vld [vmem:[%s10710_s0 + $0xf0] sm:$0xff] }
 0x25b   : > { %v8238_v61 = vpop.f32.mrf.mxu0  ;;  %8642 = vmatpush3.bf16.msra.mxu1 %v8921_v37  ;;  %8615 = vmatprep.subr.bf16.mxu0 %v8922_v40 }
 0x25c   : > { %v8239_v63 = vadd.f32 %v8238_v61, %v8237_v57  ;;  %v8266_v0 = vpop.f32.mrf.mxu1  ;;  %8643 = vmatprep.subr.bf16.mxu1 %v8923_v42  ;;  %7536 = vmatprep.mubr.bf16.mxu0 %v7956_v48  ;;  %v8929_v57 = vld [vmem:[%s10111_s7 + $0x7a8] sm:$0xff]   ;;  %v8933_v61 = vld [vmem:[%s10111_s7 + $0x7a0] sm:$0xff]   ;;  %v4522_v42 = vld [vmem:[%s10710_s0 + $0x170] sm:$0xff] }
 0x25d   : > { %v8267_v2 = vadd.f32 %v8266_v0, %v8265_v59  ;;  %v8240_v3 = vpop.f32.mrf.mxu0  ;;  %7585 = vmatprep.mubr.bf16.mxu1 %v7958_v54  ;;  %v8931_v59 = vld [vmem:[%s10111_s7 + $0x7e0] sm:$0xff]   ;;  %v8936_v0 = vld [vmem:[%s10111_s7 + $0x718] sm:$0xff]  }
 0x25e   : > { %v8268_v5 = vpop.f32.mrf.mxu1  ;;  %8616 = vmatpush3.bf16.msra.mxu0 %v8924_v43  ;;  %v4538_v43 = vld [vmem:[%s10710_s0 + $0x1f0] sm:$0xff] }
 0x25f   : > { %v10470_v7 = vadd.f32 %v8267_v2, %v8239_v63  ;;  %v8241_v8 = vpop.f32.mrf.mxu0  ;;  %8644 = vmatpush3.bf16.msra.mxu1 %v8925_v45  ;;  %8617 = vmatprep.subr.bf16.mxu0 %v8926_v50  ;;  %v8935_v63 = vld [vmem:[%s10111_s7 + $0x7d8] sm:$0xff]   ;;  %v8938_v2 = vld [vmem:[%s10111_s7 + $0x750] sm:$0xff]   ;;  %v7960_v48 = vcombine.high %v4522_v42, %v4538_v43 }
 0x260   : > { %v8242_v10 = vadd.f32 %v8241_v8, %v8240_v3  ;;  %v8269_v11 = vpop.f32.mrf.mxu1  ;;  %8645 = vmatprep.subr.bf16.mxu1 %v8927_v51  ;;  %v4523_v45 = vld [vmem:[%s10710_s0 + $0x178] sm:$0xff] }
 0x261   : > { %v8270_v13 = vadd.f32 %v8269_v11, %v8268_v5  ;;  %v8243_v14 = vpop.f32.mrf.mxu0  ;;  %7537 = vmatmul.mubr.bf16.gmra.mxu0 %v7955_v49  ;;  %v8939_v5 = vld [vmem:[%s10111_s7 + $0x7d0] sm:$0xff]   ;;  %v4539_v49 = vld [vmem:[%s10710_s0 + $0x1f8] sm:$0xff] }
 0x262   : > { %v8271_v16 = vpop.f32.mrf.mxu1  ;;  %8618 = vmatpush3.bf16.msra.mxu0 %v8928_v55  ;;  %7586 = vmatmul.mubr.bf16.gmra.mxu1 %v7957_v56  ;;  %v7962_v51 = vcombine.high %v4523_v45, %v4539_v49 }
 0x263   : > { %v10484_v20 = vadd.f32 %v8270_v13, %v8242_v10  ;;  %v8244_v21 = vpop.f32.mrf.mxu0  ;;  %8646 = vmatpush3.bf16.msra.mxu1 %v8929_v57  ;;  %8619 = vmatprep.subr.bf16.mxu0 %v8930_v58  ;;  %v8941_v10 = vld [vmem:[%s10111_s7 + $0x790] sm:$0xff]   ;;  %v8942_v13 = vld [vmem:[%s10111_s7 + $0x748] sm:$0xff]  }
 0x264   : > { %v8245_v25 = vadd.f32 %v8244_v21, %v8243_v14  ;;  %v8272_v26 = vpop.f32.mrf.mxu1  ;;  %8647 = vmatprep.subr.bf16.mxu1 %v8931_v59 }
 0x265   : > { %v8273_v30 = vadd.f32 %v8272_v26, %v8271_v16  ;;  %v8246_v31 = vpop.f32.mrf.mxu0  ;;  %v8943_v16 = vld [vmem:[%s10111_s7 + $0x7c8] sm:$0xff]   ;;  %v8946_v26 = vld [vmem:[%s10111_s7 + $0x740] sm:$0xff]  }
 0x266   : > { %v8274_v33 = vpop.f32.mrf.mxu1  ;;  %8620 = vmatpush3.bf16.msra.mxu0 %v8932_v60  ;;  %v7959_v60 = vcombine.low %v4522_v42, %v4538_v43 }
 0x267   : > { %v10492_v35 = vadd.f32 %v8273_v30, %v8245_v25  ;;  %v8247_v36 = vpop.f32.mrf.mxu0  ;;  %8648 = vmatpush3.bf16.msra.mxu1 %v8933_v61  ;;  %8621 = vmatprep.subr.bf16.mxu0 %v8934_v62  ;;  %v8949_v30 = vld [vmem:[%s10111_s7 + $0x780] sm:$0xff]   ;;  %v7961_v61 = vcombine.low %v4523_v45, %v4539_v49 }
 0x268   : > { %v8248_v38 = vadd.f32 %v8247_v36, %v8246_v31  ;;  %v8275_v39 = vpop.f32.mrf.mxu1  ;;  %8649 = vmatprep.subr.bf16.mxu1 %v8935_v63  ;;  %v4490_v31 = vld [vmem:[%s10710_s0 + $0x70] sm:$0xff]  ;;  %v4507_v36 = vld [vmem:[%s10710_s0 + $0xf8] sm:$0xff] }
 0x269   : > { %v8276_v41 = vadd.f32 %v8275_v39, %v8274_v33  ;;  %v7928_v39 = vcombine.high %v4490_v31, %v4506_v34 }
 0x26a   : > { %8622 = vmatpush3.bf16.msra.mxu0 %v8936_v0 }
 0x26b   : > { %v10498_v44 = vadd.f32 %v8276_v41, %v8248_v38  ;;  %8650 = vmatpush3.bf16.msra.mxu1 %v8937_v1  ;;  %8623 = vmatprep.subr.bf16.mxu0 %v8938_v2  ;;  %v7927_v38 = vcombine.low %v4490_v31, %v4506_v34 }
 0x26c   : > { %8651 = vmatprep.subr.bf16.mxu1 %v8939_v5  ;;  %7626 = vmatprep.mubr.bf16.mxu0 %v7928_v39 }
 0x26e   : > { %8624 = vmatpush3.bf16.msra.mxu0 %v8940_v6 }
 0x26f   : > { %8652 = vmatpush3.bf16.msra.mxu1 %v8941_v10  ;;  %8625 = vmatprep.subr.bf16.mxu0 %v8942_v13 }
 0x270   : > { %8653 = vmatprep.subr.bf16.mxu1 %v8943_v16 }
 0x272   : > { %8626 = vmatpush3.bf16.msra.mxu0 %v8944_v18 }
 0x273   : > { %8654 = vmatpush3.bf16.msra.mxu1 %v8945_v22  ;;  %8627 = vmatprep.subr.bf16.mxu0 %v8946_v26 }
 0x274   : > { %8655 = vmatprep.subr.bf16.mxu1 %v8947_v27 }
 0x277   : > { %8656 = vmatpush3.bf16.msra.mxu1 %v8949_v30 }
 0x279   : > { %v8293_v3 = vpop.f32.mrf.mxu0 }
 0x27a   : > { %v8321_v4 = vpop.f32.mrf.mxu1 }
 0x27b   : > { %v8294_v8 = vpop.f32.mrf.mxu0 }
 0x27c   : > { %v8322_v9 = vpop.f32.mrf.mxu1  ;;  %v8295_v11 = vadd.f32 %v8294_v8, %v8293_v3 }
 0x27d   : > { %v8323_v12 = vadd.f32 %v8322_v9, %v8321_v4  ;;  %v8296_v14 = vpop.f32.mrf.mxu0 }
 0x27e   : > { %v8324_v15 = vpop.f32.mrf.mxu1  ;;  %v7041_v17 = vadd.f32 %v8295_v11, %v10470_v7  ;;  %v8948_v7 = vld [vmem:[%s10111_s7 + $0x700] sm:$0xff]  }
 0x27f   : > { %v8297_v19 = vpop.f32.mrf.mxu0  ;;  %8628 = vmatpush3.bf16.msra.mxu0 %v8948_v7 }
 0x280   : > { %v8325_v21 = vpop.f32.mrf.mxu1  ;;  %v7090_v23 = vadd.f32 %v8323_v12, %v7041_v17  ;;  %v8298_v24 = vadd.f32 %v8297_v19, %v8296_v14 }
 0x281   : > { %v8326_v25 = vadd.f32 %v8325_v21, %v8324_v15  ;;  %v8299_v29 = vpop.f32.mrf.mxu0 }
 0x282   : > { %v7044_v28 = vadd.f32 %v8298_v24, %v10484_v20  ;;  %v4491_v20 = vld [vmem:[%s10710_s0 + $0x78] sm:$0xff]  ;;  %v8327_v46 = vpop.f32.mrf.mxu1  ;;  %7627 = vmatmul.mubr.bf16.vlgmr.msra.gmra.mxu0 %v7927_v38 }
 0x283   : > { %v8300_v33 = vpop.f32.mrf.mxu0  ;;  %v7929_v40 = vcombine.low %v4491_v20, %v4507_v36  ;;  %v7930_v41 = vcombine.high %v4491_v20, %v4507_v36  ;;  %7634 = vmatprep.mubr.bf16.mxu0 %v7960_v48 }
 0x284   : > { %v7093_v32 = vadd.f32 %v8326_v25, %v7044_v28  ;;  %v8301_v37 = vadd.f32 %v8300_v33, %v8299_v29  ;;  %v8328_v52 = vpop.f32.mrf.mxu1 }
 0x285   : > { %v8302_v47 = vpop.f32.mrf.mxu0  ;;  %7675 = vmatprep.mubr.bf16.mxu1 %v7930_v41  ;;  %v8329_v54 = vadd.f32 %v8328_v52, %v8327_v46 }
 0x286   : > { %v7049_v50 = vadd.f32 %v8301_v37, %v10492_v35  ;;  %7676 = vmatmul.mubr.bf16.vlgmr.msra.gmra.mxu1 %v7929_v40  ;;  %v8330_v56 = vpop.f32.mrf.mxu1 }
 0x287   : > { %v8303_v53 = vpop.f32.mrf.mxu0  ;;  %7683 = vmatprep.mubr.bf16.mxu1 %v7962_v51 }
 0x288   : > { %v8304_v55 = vadd.f32 %v8303_v53, %v8302_v47  ;;  %v7098_v57 = vadd.f32 %v8329_v54, %v7049_v50  ;;  %v8331_v59 = vpop.f32.mrf.mxu1 }
 0x289   : > { %v8332_v62 = vadd.f32 %v8331_v59, %v8330_v56 }
 0x28a   : > { %v7052_v58 = vadd.f32 %v8304_v55, %v10498_v44  ;;  %7635 = vmatmul.mubr.bf16.gmra.mxu0 %v7959_v60 }
 0x28c   : > { %v10565_v35 = vadd.f32 %v8332_v62, %v7052_v58 }
 0x28e   : > { %7684 = vmatmul.mubr.bf16.gmra.mxu1 %v7961_v61 }
 0x299   : > { %v8349_v63 = vpop.f32.mrf.mxu0 }
 0x29a   : > { %v8377_v0 = vpop.f32.mrf.mxu1 }
 0x29b   : > { %v8350_v1 = vpop.f32.mrf.mxu0 }
 0x29c   : > { %v8351_v2 = vadd.f32 %v8350_v1, %v8349_v63  ;;  %v8378_v3 = vpop.f32.mrf.mxu1 }
 0x29d   : > { %v8379_v4 = vadd.f32 %v8378_v3, %v8377_v0  ;;  %v8352_v5 = vpop.f32.mrf.mxu0 }
 0x29e   : > { %v7139_v6 = vadd.f32 %v8351_v2, %v7090_v23  ;;  %v8380_v8 = vpop.f32.mrf.mxu1 }
 0x29f   : > { %v8353_v9 = vpop.f32.mrf.mxu0 }
 0x2a0   : > { %v10567_v10 = vadd.f32 %v8379_v4, %v7139_v6  ;;  %v8354_v44 = vadd.f32 %v8353_v9, %v8352_v5  ;;  %v8381_v11 = vpop.f32.mrf.mxu1  ;;  %v8976_v6 = vmov 0.0  }
 0x2a1   : > { %v8382_v12 = vadd.f32 %v8381_v11, %v8380_v8  ;;  %v8355_v14 = vpop.f32.mrf.mxu0  ;;  %7777 = vst [vmem:[%s10627_s11] sm:$0xff] %v8976_v6 }
 0x2a2   : > { %v7142_v13 = vadd.f32 %v8354_v44, %v7093_v32  ;;  %v8383_v18 = vpop.f32.mrf.mxu1 }
 0x2a3   : > { %v8356_v16 = vpop.f32.mrf.mxu0 }
 0x2a4   : > { %v10569_v15 = vadd.f32 %v8382_v12, %v7142_v13  ;;  %v8357_v17 = vadd.f32 %v8356_v16, %v8355_v14  ;;  %v8384_v21 = vpop.f32.mrf.mxu1 }
 0x2a5   : > { %v8385_v22 = vadd.f32 %v8384_v21, %v8383_v18  ;;  %v10573_v23 = vpop.f32.mrf.mxu0 }
 0x2a6   : > { %v7147_v19 = vadd.f32 %v8357_v17, %v7098_v57  ;;  %v10577_v27 = vpop.f32.mrf.mxu1 }
 0x2a7   : > { %v10575_v25 = vpop.f32.mrf.mxu0 }
 0x2a8   : > { %v10571_v24 = vadd.f32 %v8385_v22, %v7147_v19  ;;  %v10579_v29 = vpop.f32.mrf.mxu1 }
 0x2b9   : > { %v8405_v26 = vpop.f32.mrf.mxu0 }
 0x2ba   : > { %v8433_v7 = vpop.f32.mrf.mxu1 }
 0x2bb   : > { %v8406_v28 = vpop.f32.mrf.mxu0 }
 0x2bc   : > { %v8434_v31 = vpop.f32.mrf.mxu1  ;;  %v8407_v19 = vadd.f32 %v8406_v28, %v8405_v26  ;;  %v8388_v28 = vadd.f32 %v10579_v29, %v10577_v27 }
 0x2bd   : > { %v8408_v30 = vpop.f32.mrf.mxu0 }
 0x2be   : > { %v10581_v33 = vpop.f32.mrf.mxu1  ;;  %v7237_v6 = vadd.f32 %v8407_v19, %v10567_v10 }
 0x2bf   : > { %v8409_v32 = vpop.f32.mrf.mxu0 }
 0x2c0   : > { %v10583_v20 = vpop.f32.mrf.mxu1 }
 0x2c1   : > { %v8411_v34 = vpop.f32.mrf.mxu0 }
 0x2c2   : > { %v10585_v37 = vpop.f32.mrf.mxu1 }
 0x2c3   : > { %v8412_v36 = vpop.f32.mrf.mxu0 }
 0x2c4   : > { %v10589_v39 = vpop.f32.mrf.mxu1 }
 0x2c5   : > { %v10587_v38 = vpop.f32.mrf.mxu0 }
 0x2c6   : > { %v10593_v41 = vpop.f32.mrf.mxu1 }
 0x2c7   : > { %v10591_v40 = vpop.f32.mrf.mxu0 }
 0x2c8   : > { %v10595_v43 = vpop.f32.mrf.mxu1 }
 0x2d9   : > { %v8461_v42 = vpop.f32.mrf.mxu0 }
 0x2da   : > { %v8489_v46 = vpop.f32.mrf.mxu1 }
 0x2db   : > { %v8462_v45 = vpop.f32.mrf.mxu0 }
 0x2dc   : > { %v8490_v48 = vpop.f32.mrf.mxu1 }
 0x2dd   : > { %v8464_v47 = vpop.f32.mrf.mxu0 }
 0x2de   : > { %v10597_v50 = vpop.f32.mrf.mxu1 }
 0x2df   : > { %v8465_v49 = vpop.f32.mrf.mxu0 }
 0x2e0   : > { %v10599_v52 = vpop.f32.mrf.mxu1 }
 0x2e1   : > { %v8467_v51 = vpop.f32.mrf.mxu0 }
 0x2e2   : > { %v10601_v54 = vpop.f32.mrf.mxu1 }
 0x2e3   : > { %v8468_v53 = vpop.f32.mrf.mxu0 }
 0x2e4   : > { %v10605_v56 = vpop.f32.mrf.mxu1  ;;  %v8469_v29 = vadd.f32 %v8468_v53, %v8467_v51 }
 0x2e5   : > { %v10603_v55 = vpop.f32.mrf.mxu0 }
 0x2e6   : > { %v10609_v58 = vpop.f32.mrf.mxu1 }
 0x2e7   : > { %v10607_v57 = vpop.f32.mrf.mxu0 }
 0x2e8   : > { %v10611_v60 = vpop.f32.mrf.mxu1 }
 0x2e9   : > { %10717 = vst [vmem:[#allocation4_spill] sm:$0xff] %v10611_v60 }
 0x2f9   : > { %v8517_v59 = vpop.f32.mrf.mxu0 }
 0x2fa   : > { %v8545_v61 = vpop.f32.mrf.mxu1 }
 0x2fb   : > { %v8518_v62 = vpop.f32.mrf.mxu0 }
 0x2fc   : > { %v8546_v63 = vpop.f32.mrf.mxu1 }
 0x2fd   : > { %v8520_v0 = vpop.f32.mrf.mxu0 }
 0x2fe   : > { %v10619_v1 = vpop.f32.mrf.mxu1 }
 0x2ff   : > { %10718 = vst [vmem:[#allocation5_spill] sm:$0xff] %v10619_v1  ;;  %v8521_v2 = vpop.f32.mrf.mxu0 }
 0x300   : > { %v10622_v3 = vpop.f32.mrf.mxu1 }
 0x301   : > { %10719 = vst [vmem:[#allocation6_spill] sm:$0xff] %v10622_v3  ;;  %v8523_v4 = vpop.f32.mrf.mxu0  ;;  %v8463_v3 = vadd.f32 %v8462_v45, %v8461_v42 }
 0x302   : > { %v10629_v5 = vpop.f32.mrf.mxu1 }
 0x303   : > { %10720 = vst [vmem:[#allocation7_spill] sm:$0xff] %v10629_v5  ;;  %v8524_v8 = vpop.f32.mrf.mxu0  ;;  %v8435_v5 = vadd.f32 %v8434_v31, %v8433_v7  ;;  %v8438_v7 = vadd.f32 %v10583_v20, %v10581_v33 }
 0x304   : > { %v10632_v9 = vpop.f32.mrf.mxu1 }
 0x305   : > { %10721 = vst [vmem:[#allocation8_spill] sm:$0xff] %v10632_v9  ;;  %v10634_v44 = vpop.f32.mrf.mxu0  ;;  %v8410_v9 = vadd.f32 %v8409_v32, %v8408_v30  ;;  %v8466_v30 = vadd.f32 %v8465_v49, %v8464_v47  ;;  %v8441_v32 = vadd.f32 %v10589_v39, %v10585_v37  ;;  %v8547_v39 = vadd.f32 %v8546_v63, %v8545_v61 }
 0x306   : > { %10722 = vst [vmem:[#allocation9_spill] sm:$0xff] %v10634_v44  ;;  %v10636_v11 = vpop.f32.mrf.mxu1  ;;  %v8360_v44 = vadd.f32 %v10575_v25, %v10573_v23  ;;  %v8491_v25 = vadd.f32 %v8490_v48, %v8489_v46  ;;  %v8444_v46 = vadd.f32 %v10595_v43, %v10593_v41  ;;  %v8522_v47 = vadd.f32 %v8521_v2, %v8520_v0  ;;  %v10728_v2 = vld [vmem:[#allocation5_spill] sm:$0xff] }
 0x307   : > { %10723 = vst [vmem:[#allocation10_spill] sm:$0xff] %v10636_v11  ;;  %v10638_v12 = vpop.f32.mrf.mxu0  ;;  %v7240_v60 = vadd.f32 %v8410_v9, %v10569_v15  ;;  %v8472_v48 = vadd.f32 %v10607_v57, %v10603_v55 }
 0x308   : > { %10724 = vst [vmem:[#allocation11_spill] sm:$0xff] %v10638_v12  ;;  %v10640_v13 = vpop.f32.mrf.mxu1  ;;  %v8413_v12 = vadd.f32 %v8412_v36, %v8411_v34  ;;  %v7150_v26 = vadd.f32 %v8360_v44, %v10565_v35  ;;  %v8416_v35 = vadd.f32 %v10591_v40, %v10587_v38  ;;  %v8519_v34 = vadd.f32 %v8518_v62, %v8517_v59 }
 0x309   : > { %10725 = vst [vmem:[#allocation12_spill] sm:$0xff] %v10640_v13  ;;  %v7286_v13 = vadd.f32 %v8435_v5, %v7237_v6  ;;  %v7289_v15 = vadd.f32 %v8438_v7, %v7240_v60  ;;  %v8497_v40 = vadd.f32 %v10605_v56, %v10601_v54  ;;  %v8525_v62 = vadd.f32 %v8524_v8, %v8523_v4  ;;  %v10729_v54 = vld [vmem:[#allocation6_spill] sm:$0xff] }
 0x30a   : > { %v7245_v31 = vadd.f32 %v8413_v12, %v10571_v24  ;;  %v7199_v27 = vadd.f32 %v8388_v28, %v7150_v26  ;;  %v8494_v24 = vadd.f32 %v10599_v52, %v10597_v50  ;;  %v10727_v52 = vld [vmem:[#allocation4_spill] sm:$0xff]  ;;  %v8550_v56 = vadd.f32 %v10729_v54, %v10728_v2  ;;  %v10730_v12 = vld [vmem:[#allocation7_spill] sm:$0xff] }
 0x30b   : > { %v7335_v23 = vadd.f32 %v8463_v3, %v7286_v13  ;;  %v7338_v5 = vadd.f32 %v8466_v30, %v7289_v15  ;;  %v8500_v61 = vadd.f32 %v10727_v52, %v10609_v58 }
 0x30c   : > { %v7294_v33 = vadd.f32 %v8441_v32, %v7245_v31  ;;  %v7248_v20 = vadd.f32 %v8416_v35, %v7199_v27  ;;  %v10731_v13 = vld [vmem:[#allocation8_spill] sm:$0xff] }
 0x30d   : > { %v7384_v45 = vadd.f32 %v8491_v25, %v7335_v23  ;;  %v7387_v53 = vadd.f32 %v8494_v24, %v7338_v5  ;;  %v10732_v19 = vld [vmem:[#allocation9_spill] sm:$0xff] }
 0x30e   : > { %v7343_v38 = vadd.f32 %v8469_v29, %v7294_v33  ;;  %v7297_v60 = vadd.f32 %v8444_v46, %v7248_v20 }
 0x30f   : > { %v7433_v37 = vadd.f32 %v8519_v34, %v7384_v45  ;;  %v7436_v43 = vadd.f32 %v8522_v47, %v7387_v53  ;;  %v10733_v6 = vld [vmem:[#allocation11_spill] sm:$0xff] }
 0x310   : > { %v7392_v3 = vadd.f32 %v8497_v40, %v7343_v38  ;;  %v7346_v50 = vadd.f32 %v8472_v48, %v7297_v60  ;;  %v8528_v26 = vadd.f32 %v10733_v6, %v10732_v19  ;;  %v10735_v35 = vld [vmem:[#allocation12_spill] sm:$0xff] }
 0x311   : > { %v7482_v41 = vadd.f32 %v8547_v39, %v7433_v37 }
 0x312   : > { %v7441_v44 = vadd.f32 %v8525_v62, %v7392_v3  ;;  %v7395_v23 = vadd.f32 %v8500_v61, %v7346_v50 }
 0x319   : > { %v8573_v14 = vpop.f32.mrf.mxu0 }
 0x31a   : > { %v8601_v16 = vpop.f32.mrf.mxu1 }
 0x31b   : > { %v8574_v17 = vpop.f32.mrf.mxu0 }
 0x31c   : > { %v8602_v18 = vpop.f32.mrf.mxu1  ;;  %v8575_v59 = vadd.f32 %v8574_v17, %v8573_v14  ;;  %v8553_v14 = vadd.f32 %v10731_v13, %v10730_v12  ;;  %v7485_v17 = vadd.f32 %v8550_v56, %v7436_v43 }
 0x31d   : > { %v8576_v21 = vpop.f32.mrf.mxu0  ;;  %v8603_v55 = vadd.f32 %v8602_v18, %v8601_v16  ;;  %v7444_v18 = vadd.f32 %v8528_v26, %v7395_v23 }
 0x31e   : > { %v10642_v22 = vpop.f32.mrf.mxu1  ;;  %v7531_v9 = vadd.f32 %v8575_v59, %v7482_v41  ;;  %v7490_v32 = vadd.f32 %v8553_v14, %v7441_v44 }
 0x31f   : > { %10726 = vst [vmem:[#allocation13_spill] sm:$0xff] %v10642_v22  ;;  %v8577_v11 = vpop.f32.mrf.mxu0 }
 0x320   : > { %v10647_v1 = vpop.f32.mrf.mxu1  ;;  %v8578_v57 = vadd.f32 %v8577_v11, %v8576_v21  ;;  %v7580_v25 = vadd.f32 %v8603_v55, %v7531_v9  ;;  %v10734_v21 = vld [vmem:[#allocation10_spill] sm:$0xff] }
 0x321   : > { %v8579_v22 = vpop.f32.mrf.mxu0  ;;  %v8556_v15 = vadd.f32 %v10735_v35, %v10734_v21 }
 0x322   : > { %v10653_v10 = vpop.f32.mrf.mxu1  ;;  %v7534_v30 = vadd.f32 %v8578_v57, %v7485_v17 }
 0x323   : > { %v8580_v36 = vpop.f32.mrf.mxu0  ;;  %v7493_v38 = vadd.f32 %v8556_v15, %v7444_v18  ;;  %v7726_v15 = vlaneseq }
 0x324   : > { %v8608_v42 = vpop.f32.mrf.mxu1  ;;  %v8581_v28 = vadd.f32 %v8580_v36, %v8579_v22 }
 0x325   : > { %v8582_v49 = vpop.f32.mrf.mxu0  ;;  %v8609_v22 = vadd.f32 %v8608_v42, %v10653_v10 }
 0x326   : > { %v8610_v51 = vpop.f32.mrf.mxu1  ;;  %v10736_v34 = vld [vmem:[#allocation13_spill] sm:$0xff]  ;;  %v7539_v45 = vadd.f32 %v8581_v28, %v7490_v32 }
 0x327   : > { %v8583_v63 = vpop.f32.mrf.mxu0  ;;  %v8606_v27 = vadd.f32 %v10647_v1, %v10736_v34  ;;  %v7727_v34 = vshrl.u32 %v7726_v15, 7 }
 0x328   : > { %v8611_v0 = vpop.f32.mrf.mxu1  ;;  %v8584_v46 = vadd.f32 %v8583_v63, %v8582_v49  ;;  %v7588_v53 = vadd.f32 %v8609_v22, %v7539_v45 }
 0x329   : > { %v7583_v20 = vadd.f32 %v8606_v27, %v7534_v30  ;;  %v8612_v62 = vadd.f32 %v8611_v0, %v8610_v51  ;;  %v7718_v27 = vld [vmem:[%s4467_s13] sm:$0x1] }
 0x32a   : > { %v7542_v60 = vadd.f32 %v8584_v46, %v7493_v38 }
 0x32c   : > { %v7591_v54 = vadd.f32 %v8612_v62, %v7542_v60  ;;  %v7758_v60 = vld [vmem:[%s4431_s21 + $0x8] sm:$0xff] }
 0x342   : > { %v8629_v4 = vpop.f32.mrf.mxu0 }
 0x344   : > { %v8630_v58 = vpop.f32.mrf.mxu0 }
 0x345   : > { %v8631_v31 = vadd.f32 %v8630_v58, %v8629_v4 }
 0x346   : > { %v8657_v8 = vpop.f32.mrf.mxu1  ;;  %v8632_v16 = vpop.f32.mrf.mxu0 }
 0x347   : > { %v7629_v29 = vadd.f32 %v8631_v31, %v7580_v25 }
 0x348   : > { %v8658_v7 = vpop.f32.mrf.mxu1  ;;  %v8633_v5 = vpop.f32.mrf.mxu0 }
 0x349   : > { %v8659_v36 = vadd.f32 %v8658_v7, %v8657_v8  ;;  %v8634_v24 = vadd.f32 %v8633_v5, %v8632_v16 }
 0x34a   : > { %v8660_v11 = vpop.f32.mrf.mxu1  ;;  %v8635_v39 = vpop.f32.mrf.mxu0 }
 0x34b   : > { %v10683_v37 = vadd.f32 %v8659_v36, %v7629_v29  ;;  %v7632_v40 = vadd.f32 %v8634_v24, %v7583_v20  ;;  %v7728_v29 = vsub.s32 0, %v7727_v34  ;;  %v7722_v36 = vld [vmem:[%s4470_s17] sm:$0x1] }
 0x34c   : > { %v8661_v33 = vpop.f32.mrf.mxu1  ;;  %v8636_v59 = vpop.f32.mrf.mxu0 }
 0x34d   : > { %v8662_v48 = vadd.f32 %v8661_v33, %v8660_v11  ;;  %v8637_v10 = vadd.f32 %v8636_v59, %v8635_v39  ;;  %v7701_v42 = vmul.f32 %v10683_v37, %v10683_v37 }
 0x34e   : > { %v8663_v47 = vpop.f32.mrf.mxu1  ;;  %v8638_v43 = vpop.f32.mrf.mxu0 }
 0x34f   : > { %v7681_v41 = vadd.f32 %v8662_v48, %v7632_v40  ;;  %v7637_v52 = vadd.f32 %v8637_v10, %v7588_v53 }
 0x350   : > { %v8664_v1 = vpop.f32.mrf.mxu1  ;;  %v8639_v63 = vpop.f32.mrf.mxu0 }
 0x351   : > { %v7692_v3 = vadd.f32 %v7681_v41, %v10683_v37  ;;  %v7702_v50 = vmul.f32 %v7681_v41, %v7681_v41  ;;  %v8665_v61 = vadd.f32 %v8664_v1, %v8663_v47  ;;  %v8640_v55 = vadd.f32 %v8639_v63, %v8638_v43  ;;  %v7757_v1 = vld [vmem:[%s4431_s21] sm:$0xff] }
 0x352   : > { %v8666_v49 = vpop.f32.mrf.mxu1 }
 0x353   : > { %v7705_v56 = vadd.f32 %v7702_v50, %v7701_v42  ;;  %v7686_v9 = vadd.f32 %v8665_v61, %v7637_v52  ;;  %v7640_v0 = vadd.f32 %v8640_v55, %v7591_v54 }
 0x354   : > { %v8667_v2 = vpop.f32.mrf.mxu1 }
 0x355   : > { %v7693_v57 = vadd.f32 %v7692_v3, %v7686_v9  ;;  %v7703_v51 = vmul.f32 %v7686_v9, %v7686_v9  ;;  %v8668_v44 = vadd.f32 %v8667_v2, %v8666_v49 }
 0x357   : > { %v7706_v12 = vadd.f32 %v7705_v56, %v7703_v51  ;;  %v7689_v13 = vadd.f32 %v8668_v44, %v7640_v0 }
 0x359   : > { %v7694_v14 = vadd.f32 %v7693_v57, %v7689_v13  ;;  %v7704_v4 = vmul.f32 %v7689_v13, %v7689_v13 }
 0x35b   : > { %v7695_v8 = vrot.slane %v7694_v14, 4  ;;  %v7707_v17 = vadd.f32 %v7706_v12, %v7704_v4 }
 0x35d   : > { %v7696_v19 = vadd.f32 %v7695_v8, %v7694_v14  ;;  %v7708_v6 = vrot.slane %v7707_v17, 4 }
 0x35f   : > { %v7697_v26 = vrot.slane %v7696_v19, 2  ;;  %v7709_v28 = vadd.f32 %v7708_v6, %v7707_v17 }
 0x361   : > { %v7698_v58 = vadd.f32 %v7697_v26, %v7696_v19  ;;  %v7710_v7 = vrot.slane %v7709_v28, 2 }
 0x363   : > { %v7699_v23 = vrot.slane %v7698_v58, 1  ;;  %v7711_v25 = vadd.f32 %v7710_v7, %v7709_v28 }
 0x365   : > { %v7700_v30 = vadd.f32 %v7699_v23, %v7698_v58  ;;  %v7712_v31 = vrot.slane %v7711_v25, 1 }
 0x367   : > { %v7713_v32 = vadd.f32 %v7712_v31, %v7711_v25  ;;  %v7714_v16 = vmul.f32 0.03125, %v7700_v30 }
 0x369   : > { %v7715_v11 = vmul.f32 0.03125, %v7713_v32  ;;  %v7716_v18 = vmul.f32 %v7714_v16, %v7714_v16 }
 0x36b   : > { %v7717_v21 = vsub.f32 %v7715_v11, %v7716_v18 }
 0x36d   : > { %v7719_v35 = vadd.f32 1e-05, %v7717_v21 }
 0x36f   : > { %8950 = vrsqrt.f32 %v7719_v35 }
 0x37c   : > { %v8951_v45 = vpop.eup %8950 }
 0x37d   : > { %v7721_v22 = vmul.f32 %v8951_v45, %v7718_v27 }
 0x37f   : > { %v7723_v5 = vmul.f32 %v7721_v22, %v7714_v16  ;;  %v7729_v33 = vrot.slane %v7721_v22, %v7728_v29 }
 0x381   : > { %v7724_v20 = vsub.f32 %v7722_v36, %v7723_v5  ;;  %v7731_v46 = vmul.f32 %v7729_v33, %v10683_v37  ;;  %v7732_v24 = vmul.f32 %v7729_v33, %v7681_v41  ;;  %v7733_v39 = vmul.f32 %v7729_v33, %v7686_v9 }
 0x382   : > { %v7734_v47 = vmul.f32 %v7729_v33, %v7689_v13 }
 0x383   : > { %v7739_v38 = vrot.slane %v7724_v20, %v7728_v29 }
 0x385   : > { %v7741_v40 = vadd.f32 %v7739_v38, %v7731_v46  ;;  %v7742_v48 = vadd.f32 %v7739_v38, %v7732_v24  ;;  %v7743_v53 = vadd.f32 %v7739_v38, %v7733_v39  ;;  %v7744_v59 = vadd.f32 %v7739_v38, %v7734_v47 }
 0x387   : > { %vm7745_vm0 = vcmp.ge.f32.partialorder %v7741_v40, 0.0  ;;  %vm7746_vm1 = vcmp.ge.f32.partialorder %v7742_v48, 0.0  ;;  %vm7747_vm2 = vcmp.ge.f32.partialorder %v7743_v53, 0.0  ;;  %vm7748_vm3 = vcmp.ge.f32.partialorder %v7744_v59, 0.0 }
 0x388   : > { %v7749_v62 = vmul.f32 0.2, %v7741_v40  ;;  %v7750_v10 = vmul.f32 0.2, %v7742_v48  ;;  %v7751_v42 = vmul.f32 0.2, %v7743_v53 }
 0x389   : > { %v7752_v43 = vmul.f32 0.2, %v7744_v59 }
 0x38a   : > { %v7753_v37 = vsel %vm7745_vm0, %v7741_v40, %v7749_v62  ;;  %v7754_v41 = vsel %vm7746_vm1, %v7742_v48, %v7750_v10  ;;  %v7755_v49 = vsel %vm7747_vm2, %v7743_v53, %v7751_v42 }
 0x38b   : > { %v7756_v3 = vsel %vm7748_vm3, %v7744_v59, %v7752_v43  ;;  %v7759_v50 = vmul.f32 %v7757_v1, %v7753_v37  ;;  %v7760_v52 = vmul.f32 %v7758_v60, %v7754_v41  ;;  %v7761_v61 = vmul.f32 %v7757_v1, %v7755_v49 }
 0x38c   : > { %v7762_v63 = vmul.f32 %v7758_v60, %v7756_v3 }
 0x38d   : > { %v7763_v2 = vadd.f32 %v7760_v52, %v7759_v50 }
 0x38e   : > { %v7770_v54 = vadd.f32 %v7762_v63, %v7761_v61 }
 0x38f   : > { %v7764_v56 = vrot.slane %v7763_v2, 4 }
 0x390   : > { %v7771_v9 = vrot.slane %v7770_v54, 4 }
 0x391   : > { %v7765_v55 = vadd.f32 %v7764_v56, %v7763_v2 }
 0x392   : > { %v7772_v57 = vadd.f32 %v7771_v9, %v7770_v54 }
 0x393   : > { %v7766_v51 = vrot.slane %v7765_v55, 2 }
 0x394   : > { %v7773_v0 = vrot.slane %v7772_v57, 2 }
 0x395   : > { %v7767_v44 = vadd.f32 %v7766_v51, %v7765_v55 }
 0x396   : > { %v7774_v12 = vadd.f32 %v7773_v0, %v7772_v57 }
 0x397   : > { %v7768_v13 = vrot.slane %v7767_v44, 1 }
 0x398   : > { %v7775_v14 = vrot.slane %v7774_v12, 1 }
 0x399   : > { %v7769_v4 = vadd.f32 %v7768_v13, %v7767_v44 }
 0x39a   : > { %v7776_v8 = vadd.f32 %v7775_v14, %v7774_v12 }
 0x39c   : > { %v7781_v17 = vsel %vm7780_vm4, %v7776_v8, %v7769_v4 }
 0x39d   : > { %7783 = vst [vmem:[%s10627_s11] sm:$0x3] %v7781_v17 }
 0x39e PF: > { %p12_p9 = scmp.ge.s32.totalorder %s9024_s22, 6   ;;  %s10737_s18 = smov %s8970_s19 }
 0x39f   : > { %s10738_s19 = smov %s9033_s25  ;;  %s10739_s20 = smov %s9024_s22 }
 0x3a0   :  { %14 = sbr.rel (!%p12_p9) target bundleno = 2 (0x2), region = 183 }

</bundles_post_ra>
